<compile_context>
chip_gen: v5e
topology: v5e:2x2
jax: 0.10.0
libtpu: 0.0.40
codegen_flags: <defaults>
</compile_context>

<pallas_src>
import functools

import jax
import jax.numpy as jnp
from jax.experimental import pallas as pl
from jax.experimental.pallas import tpu as pltpu

# ---- small hyperparameters consistent with the module structure ----
VOCAB_SIZE = 65
VOCAB_PAD = 128          # lane-dense padded vocab for the lm_head
N_EMBED = 64
N_HEAD = 4
HEAD_SIZE = N_EMBED // N_HEAD
N_LAYER = 2
BLOCK_SIZE = 16          # max context length
LN_EPS = 1e-5
ROWS_TARGET = 256        # target rows (Bb*T) per grid step (fills 256-wide MXU)
NEG_INF = -1e30          # additive causal-mask bias


# ------------------------- fused forward kernel -------------------------

def _fused_forward_kernel(
    x_ref,
    ln1_g_ref, ln1_b_ref,
    wq_ref, wk_ref, wv_ref,
    projw_ref, proj_b_ref,
    ln2_g_ref, ln2_b_ref,
    w1_ref, b1_ref,
    w2_ref, b2_ref,
    lnf_g_ref, lnf_b_ref,
    head_w_ref, head_b_ref,
    o_ref,
    *, n_layer, n_head,
):
    # One grid step = Bb batch elements' entire forward pass, all in VMEM.
    Bb, T, C = x_ref.shape
    hs = C // n_head
    R = Bb * T

    x = x_ref[...].astype(jnp.float32).reshape(R, C)        # (R, C) rows

    # additive causal bias (0 / -1e30), hoisted out of the layer/head loops
    row = jax.lax.broadcasted_iota(jnp.int32, (T, T), 0)
    col = jax.lax.broadcasted_iota(jnp.int32, (T, T), 1)
    causal_bias = jnp.where(col <= row, 0.0, NEG_INF).astype(jnp.float32)

    def layer_norm(v, g, b):
        mu = jnp.mean(v, axis=-1, keepdims=True)
        var = jnp.mean((v - mu) ** 2, axis=-1, keepdims=True)
        return (v - mu) * jax.lax.rsqrt(var + LN_EPS) * g + b

    def mm(a_bf16, w_bf16):
        # bf16 MXU operands, f32 accumulation (weights already stored in bf16)
        return jnp.dot(a_bf16, w_bf16, preferred_element_type=jnp.float32)

    for l in range(n_layer):
        # ---- self-attention sublayer ----
        h = layer_norm(x, ln1_g_ref[l], ln1_b_ref[l])        # f32 stats
        hb = h.astype(jnp.bfloat16)

        att = jnp.zeros((R, C), jnp.float32)
        for hd in range(n_head):
            # per-head weights indexed on leading ref dims: no lane slicing.
            # attention scale is pre-folded into wq at init time.
            qh = mm(hb, wq_ref[l, hd]).astype(jnp.bfloat16).reshape(Bb, T, hs)
            kh = mm(hb, wk_ref[l, hd]).astype(jnp.bfloat16).reshape(Bb, T, hs)
            vh = mm(hb, wv_ref[l, hd]).astype(jnp.bfloat16).reshape(Bb, T, hs)

            # scores batched over Bb (single batch dim), bf16 in / f32 acc
            s = jnp.einsum('btd,bsd->bts', qh, kh,
                           preferred_element_type=jnp.float32)   # (Bb, T, T)
            s = s + causal_bias
            m = jnp.max(s, axis=-1, keepdims=True)
            e = jnp.exp(s - m)
            inv = pl.reciprocal(jnp.sum(e, axis=-1, keepdims=True), approx=True)
            p = (e * inv).astype(jnp.bfloat16)                   # attn dropout = identity
            oh = jnp.einsum('bts,bsd->btd', p, vh,
                            preferred_element_type=jnp.float32)  # (Bb, T, hs)

            # concat(heads) @ Wp  ==  sum_h  head_h @ Wp[h*hs:(h+1)*hs, :]
            att = att + mm(oh.reshape(R, hs).astype(jnp.bfloat16),
                           projw_ref[l, hd])

        x = x + att + proj_b_ref[l]                           # proj (+ identity dropout)

        # ---- feed-forward sublayer ----
        h = layer_norm(x, ln2_g_ref[l], ln2_b_ref[l]).astype(jnp.bfloat16)
        ff = jnp.maximum(mm(h, w1_ref[l]) + b1_ref[l], 0.0)
        x = x + mm(ff.astype(jnp.bfloat16), w2_ref[l]) + b2_ref[l]   # FFN dropout = identity

    # ---- final layernorm + lm_head (lane-dense, padded vocab) ----
    x = layer_norm(x, lnf_g_ref[...], lnf_b_ref[...])
    logits = mm(x.astype(jnp.bfloat16), head_w_ref[...]) + head_b_ref[...]
    o_ref[...] = logits.reshape(o_ref.shape).astype(o_ref.dtype)


# ------------------------- wrapper -------------------------

def _largest_divisor_leq(n, k):
    k = max(1, min(n, k))
    while n % k:
        k -= 1
    return k


def _pick_batch_block(B, T):
    """Rows per step ~ROWS_TARGET, but keep >=2 parallel steps when B allows
    (so both v7x TensorCores get work)."""
    bb = _largest_divisor_leq(B, max(1, ROWS_TARGET // max(T, 1)))
    if B // bb < 2 and B > 1:
        bb = _largest_divisor_leq(B, max(1, -(-B // 2)))      # ceil(B/2)
    return bb


def fused_forward(x, params):
    """x: (B, T, C) fp32 token+pos embeddings. Returns padded bf16 logits (B, T, VOCAB_PAD)."""
    B, T, C = x.shape
    L, H = N_LAYER, N_HEAD
    hs = C // H
    bb = _pick_batch_block(B, T)
    kernel = functools.partial(_fused_forward_kernel, n_layer=L, n_head=H)

    const2 = lambda b: (0, 0)
    const3 = lambda b: (0, 0, 0)
    const4 = lambda b: (0, 0, 0, 0)
    in_specs = [
        pl.BlockSpec((bb, T, C), lambda b: (b, 0, 0)),            # x (batch-blocked)
        pl.BlockSpec((L, 1, C), const3),                          # ln1_g
        pl.BlockSpec((L, 1, C), const3),                          # ln1_b
        pl.BlockSpec((L, H, C, hs), const4),                      # wq (scale folded)
        pl.BlockSpec((L, H, C, hs), const4),                      # wk
        pl.BlockSpec((L, H, C, hs), const4),                      # wv
        pl.BlockSpec((L, H, hs, C), const4),                      # proj_w per-head rows
        pl.BlockSpec((L, 1, C), const3),                          # proj_b
        pl.BlockSpec((L, 1, C), const3),                          # ln2_g
        pl.BlockSpec((L, 1, C), const3),                          # ln2_b
        pl.BlockSpec((L, C, 4 * C), const3),                      # w1
        pl.BlockSpec((L, 1, 4 * C), const3),                      # b1
        pl.BlockSpec((L, 4 * C, C), const3),                      # w2
        pl.BlockSpec((L, 1, C), const3),                          # b2
        pl.BlockSpec((1, C), const2),                             # lnf_g
        pl.BlockSpec((1, C), const2),                             # lnf_b
        pl.BlockSpec((C, VOCAB_PAD), const2),                     # head_w (padded, bf16)
        pl.BlockSpec((1, VOCAB_PAD), const2),                     # head_b (padded)
    ]
    return pl.pallas_call(
        kernel,
        out_shape=jax.ShapeDtypeStruct((B, T, VOCAB_PAD), jnp.bfloat16),
        grid=(B // bb,),
        in_specs=in_specs,
        out_specs=pl.BlockSpec((bb, T, VOCAB_PAD), lambda b: (b, 0, 0)),
        compiler_params=pltpu.CompilerParams(
            dimension_semantics=("parallel",)),                   # 2-TC sharding on v7x
    )(
        x,
        params["ln1_g"], params["ln1_b"],
        params["wq"], params["wk"], params["wv"],
        params["projw"], params["proj_b"],
        params["ln2_g"], params["ln2_b"],
        params["w1"], params["b1"],
        params["w2"], params["b2"],
        params["lnf_g"], params["lnf_b"],
        params["head_w_pad"], params["head_b_pad"],
    )


# ------------------------- parameters & forward -------------------------

def init_params(key):
    def dense(k, shape, scale=0.02):
        return (scale * jax.random.normal(k, shape)).astype(jnp.float32)

    L, C, H, hs = N_LAYER, N_EMBED, N_HEAD, HEAD_SIZE
    keys = jax.random.split(key, 10)
    # PyTorch Head: score = q @ k^T * C**-0.5 with C = x.shape[-1] = n_embed.
    attn_scale = float(C) ** -0.5
    params = {
        "tok_emb": dense(keys[0], (VOCAB_SIZE, C)),
        "pos_emb": dense(keys[1], (BLOCK_SIZE, C)),
        "ln1_g": jnp.ones((L, 1, C), jnp.float32),
        "ln1_b": jnp.zeros((L, 1, C), jnp.float32),
        # per-layer, per-head Q/K/V weights (no bias), bf16; scale folded into wq
        "wq": (attn_scale * dense(keys[2], (L, H, C, hs))).astype(jnp.bfloat16),
        "wk": dense(keys[3], (L, H, C, hs)).astype(jnp.bfloat16),
        "wv": dense(keys[4], (L, H, C, hs)).astype(jnp.bfloat16),
        # output projection split by head rows: concat(heads) @ W == sum_h head_h @ W_h
        "projw": dense(keys[5], (L, H, hs, C)).astype(jnp.bfloat16),
        "proj_b": jnp.zeros((L, 1, C), jnp.float32),
        "ln2_g": jnp.ones((L, 1, C), jnp.float32),
        "ln2_b": jnp.zeros((L, 1, C), jnp.float32),
        "w1": dense(keys[6], (L, C, 4 * C)).astype(jnp.bfloat16),
        "b1": jnp.zeros((L, 1, 4 * C), jnp.float32),
        "w2": dense(keys[7], (L, 4 * C, C)).astype(jnp.bfloat16),
        "b2": jnp.zeros((L, 1, C), jnp.float32),
        "lnf_g": jnp.ones((1, C), jnp.float32),
        "lnf_b": jnp.zeros((1, C), jnp.float32),
    }
    # lm_head zero-padded to VOCAB_PAD=128 output lanes (lane-dense output);
    # columns >= VOCAB_SIZE are zero and sliced off outside the kernel.
    head_w = dense(keys[8], (C, VOCAB_SIZE))
    params["head_w_pad"] = (jnp.zeros((C, VOCAB_PAD), jnp.float32)
                            .at[:, :VOCAB_SIZE].set(head_w)).astype(jnp.bfloat16)
    params["head_b_pad"] = jnp.zeros((1, VOCAB_PAD), jnp.float32)
    return params


def forward(params, idx, targets=None):
    """idx: (B, T) int32 token ids. Returns (logits (B,T,V) f32, loss or None)."""
    B, T = idx.shape
    tok = jnp.take(params["tok_emb"], idx, axis=0)            # (B, T, C) embedding gather (glue)
    pos = params["pos_emb"][:T]                                # (T, C)
    x = (tok + pos[None, :, :]).astype(jnp.float32)

    logits = fused_forward(x, params)                          # single fused Pallas kernel
    logits = logits[:, :, :VOCAB_SIZE].astype(jnp.float32)

    loss = None
    if targets is not None:
        # cross-entropy (glue, not on the hot path); kept in f32
        logp = jax.nn.log_softmax(logits.reshape(B * T, VOCAB_SIZE), axis=-1)
        loss = -jnp.mean(jnp.take_along_axis(
            logp, targets.reshape(B * T, 1), axis=-1))
    return logits, loss


# ------------------------- main -------------------------

if __name__ == "__main__":
    key = jax.random.PRNGKey(0)
    params = init_params(key)

    B, T = 2, 8
    idx = jax.random.randint(jax.random.PRNGKey(1), (B, T), 0, VOCAB_SIZE,
                             dtype=jnp.int32)

    logits, loss = forward(params, idx)
    logits = jax.block_until_ready(logits)
    assert logits.shape == (B, T, VOCAB_SIZE)
    assert loss is None
    assert bool(jnp.all(jnp.isfinite(logits)))
    print("KERNEL_OK")
</pallas_src>

<mosaic_0001>
module attributes {stable_mosaic.version = 11 : i64} {
  func.func @_fused_forward_kernel(%arg0: i32, %arg1: memref<1x8x64xf32, #tpu.memory_space<vmem>>, %arg2: memref<2x1x64xf32, #tpu.memory_space<vmem>>, %arg3: memref<2x1x64xf32, #tpu.memory_space<vmem>>, %arg4: memref<2x4x64x16xbf16, #tpu.memory_space<vmem>>, %arg5: memref<2x4x64x16xbf16, #tpu.memory_space<vmem>>, %arg6: memref<2x4x64x16xbf16, #tpu.memory_space<vmem>>, %arg7: memref<2x4x16x64xbf16, #tpu.memory_space<vmem>>, %arg8: memref<2x1x64xf32, #tpu.memory_space<vmem>>, %arg9: memref<2x1x64xf32, #tpu.memory_space<vmem>>, %arg10: memref<2x1x64xf32, #tpu.memory_space<vmem>>, %arg11: memref<2x64x256xbf16, #tpu.memory_space<vmem>>, %arg12: memref<2x1x256xf32, #tpu.memory_space<vmem>>, %arg13: memref<2x256x64xbf16, #tpu.memory_space<vmem>>, %arg14: memref<2x1x64xf32, #tpu.memory_space<vmem>>, %arg15: memref<1x64xf32, #tpu.memory_space<vmem>>, %arg16: memref<1x64xf32, #tpu.memory_space<vmem>>, %arg17: memref<64x128xbf16, #tpu.memory_space<vmem>>, %arg18: memref<1x128xf32, #tpu.memory_space<vmem>>, %arg19: memref<1x8x128xbf16, #tpu.memory_space<vmem>>) attributes {dimension_semantics = [#tpu.dimension_semantics<parallel>], iteration_bounds = array<i64: 2>, scalar_prefetch = 0 : i64, scratch_operands = 0 : i64, tpu.core_type = #tpu.core_type<tc>, window_params = [{transform_indices = @transform_0, window_bounds = array<i64: 1, 8, 64>}, {pipeline_mode = #tpu.pipeline_mode<synchronous>, transform_indices = @transform_1, window_bounds = array<i64: 2, 1, 64>}, {pipeline_mode = #tpu.pipeline_mode<synchronous>, transform_indices = @transform_2, window_bounds = array<i64: 2, 1, 64>}, {pipeline_mode = #tpu.pipeline_mode<synchronous>, transform_indices = @transform_3, window_bounds = array<i64: 2, 4, 64, 16>}, {pipeline_mode = #tpu.pipeline_mode<synchronous>, transform_indices = @transform_4, window_bounds = array<i64: 2, 4, 64, 16>}, {pipeline_mode = #tpu.pipeline_mode<synchronous>, transform_indices = @transform_5, window_bounds = array<i64: 2, 4, 64, 16>}, {pipeline_mode = #tpu.pipeline_mode<synchronous>, transform_indices = @transform_6, window_bounds = array<i64: 2, 4, 16, 64>}, {pipeline_mode = #tpu.pipeline_mode<synchronous>, transform_indices = @transform_7, window_bounds = array<i64: 2, 1, 64>}, {pipeline_mode = #tpu.pipeline_mode<synchronous>, transform_indices = @transform_8, window_bounds = array<i64: 2, 1, 64>}, {pipeline_mode = #tpu.pipeline_mode<synchronous>, transform_indices = @transform_9, window_bounds = array<i64: 2, 1, 64>}, {pipeline_mode = #tpu.pipeline_mode<synchronous>, transform_indices = @transform_10, window_bounds = array<i64: 2, 64, 256>}, {pipeline_mode = #tpu.pipeline_mode<synchronous>, transform_indices = @transform_11, window_bounds = array<i64: 2, 1, 256>}, {pipeline_mode = #tpu.pipeline_mode<synchronous>, transform_indices = @transform_12, window_bounds = array<i64: 2, 256, 64>}, {pipeline_mode = #tpu.pipeline_mode<synchronous>, transform_indices = @transform_13, window_bounds = array<i64: 2, 1, 64>}, {pipeline_mode = #tpu.pipeline_mode<synchronous>, transform_indices = @transform_14, window_bounds = array<i64: 1, 64>}, {pipeline_mode = #tpu.pipeline_mode<synchronous>, transform_indices = @transform_15, window_bounds = array<i64: 1, 64>}, {pipeline_mode = #tpu.pipeline_mode<synchronous>, transform_indices = @transform_16, window_bounds = array<i64: 64, 128>}, {pipeline_mode = #tpu.pipeline_mode<synchronous>, transform_indices = @transform_17, window_bounds = array<i64: 1, 128>}, {transform_indices = @transform_18, window_bounds = array<i64: 1, 8, 128>}]} {
    %c0 = arith.constant 0 : index
    %c0_0 = arith.constant 0 : index
    %c0_1 = arith.constant 0 : index
    %0 = vector.load %arg1[%c0, %c0_0, %c0_1] : memref<1x8x64xf32, #tpu.memory_space<vmem>>, vector<1x8x64xf32>
    %1 = vector.shape_cast %0 : vector<1x8x64xf32> to vector<8x64xf32>
    %2 = tpu.iota {dimensions = array<i32: 0>} : vector<8x8xi32>
    %3 = tpu.iota {dimensions = array<i32: 1>} : vector<8x8xi32>
    %4 = arith.cmpi sle, %3, %2 : vector<8x8xi32>
    %cst = arith.constant 0.000000e+00 : f32
    %cst_2 = arith.constant -1.000000e+30 : f32
    %5 = vector.broadcast %cst : f32 to vector<8x8xf32>
    %6 = vector.broadcast %cst_2 : f32 to vector<8x8xf32>
    %7 = arith.select %4, %5, %6 : vector<8x8xi1>, vector<8x8xf32>
    %c0_3 = arith.constant 0 : index
    %c0_4 = arith.constant 0 : index
    %c0_5 = arith.constant 0 : index
    %8 = vector.load %arg2[%c0_3, %c0_4, %c0_5] : memref<2x1x64xf32, #tpu.memory_space<vmem>>, vector<1x1x64xf32>
    %9 = vector.shape_cast %8 : vector<1x1x64xf32> to vector<1x64xf32>
    %c0_6 = arith.constant 0 : index
    %c0_7 = arith.constant 0 : index
    %c0_8 = arith.constant 0 : index
    %10 = vector.load %arg3[%c0_6, %c0_7, %c0_8] : memref<2x1x64xf32, #tpu.memory_space<vmem>>, vector<1x1x64xf32>
    %11 = vector.shape_cast %10 : vector<1x1x64xf32> to vector<1x64xf32>
    %cst_9 = arith.constant dense<0.000000e+00> : vector<8xf32>
    %12 = vector.multi_reduction <add>, %1, %cst_9 [1] : vector<8x64xf32> to vector<8xf32>
    %13 = vector.shape_cast %12 : vector<8xf32> to vector<8x1xf32>
    %cst_10 = arith.constant 6.400000e+01 : f32
    %14 = vector.broadcast %cst_10 : f32 to vector<8x1xf32>
    %15 = arith.divf %13, %14 : vector<8x1xf32>
    %16 = vector.broadcast %15 : vector<8x1xf32> to vector<8x64xf32>
    %17 = arith.subf %1, %16 : vector<8x64xf32>
    %18 = arith.mulf %17, %17 : vector<8x64xf32>
    %cst_11 = arith.constant dense<0.000000e+00> : vector<8xf32>
    %19 = vector.multi_reduction <add>, %18, %cst_11 [1] : vector<8x64xf32> to vector<8xf32>
    %20 = vector.shape_cast %19 : vector<8xf32> to vector<8x1xf32>
    %cst_12 = arith.constant 6.400000e+01 : f32
    %21 = vector.broadcast %cst_12 : f32 to vector<8x1xf32>
    %22 = arith.divf %20, %21 : vector<8x1xf32>
    %23 = vector.broadcast %15 : vector<8x1xf32> to vector<8x64xf32>
    %24 = arith.subf %1, %23 : vector<8x64xf32>
    %cst_13 = arith.constant 9.99999974E-6 : f32
    %25 = vector.broadcast %cst_13 : f32 to vector<8x1xf32>
    %26 = arith.addf %22, %25 : vector<8x1xf32>
    %27 = math.rsqrt %26 : vector<8x1xf32>
    %28 = vector.broadcast %27 : vector<8x1xf32> to vector<8x64xf32>
    %29 = arith.mulf %24, %28 : vector<8x64xf32>
    %30 = vector.broadcast %9 : vector<1x64xf32> to vector<8x64xf32>
    %31 = arith.mulf %29, %30 : vector<8x64xf32>
    %32 = vector.broadcast %11 : vector<1x64xf32> to vector<8x64xf32>
    %33 = arith.addf %31, %32 : vector<8x64xf32>
    %34 = arith.truncf %33 : vector<8x64xf32> to vector<8x64xbf16>
    %cst_14 = arith.constant 0.000000e+00 : f32
    %35 = vector.broadcast %cst_14 : f32 to vector<8x64xf32>
    %c0_15 = arith.constant 0 : index
    %c0_16 = arith.constant 0 : index
    %c0_17 = arith.constant 0 : index
    %c0_18 = arith.constant 0 : index
    %36 = vector.load %arg4[%c0_15, %c0_16, %c0_17, %c0_18] : memref<2x4x64x16xbf16, #tpu.memory_space<vmem>>, vector<1x1x64x16xbf16>
    %37 = vector.shape_cast %36 : vector<1x1x64x16xbf16> to vector<64x16xbf16>
    %cst_19 = arith.constant dense<0.000000e+00> : vector<8x16xf32>
    %38 = tpu.matmul %34, %37, %cst_19 {dimension_numbers = #tpu.dot_dimension_numbers<[1], [0], [0], [1], [0, 0, 1, 1], [], []>} : vector<8x64xbf16>, vector<64x16xbf16>, vector<8x16xf32> -> vector<8x16xf32>
    %39 = arith.truncf %38 : vector<8x16xf32> to vector<8x16xbf16>
    %40 = vector.shape_cast %39 : vector<8x16xbf16> to vector<1x8x16xbf16>
    %c0_20 = arith.constant 0 : index
    %c0_21 = arith.constant 0 : index
    %c0_22 = arith.constant 0 : index
    %c0_23 = arith.constant 0 : index
    %41 = vector.load %arg5[%c0_20, %c0_21, %c0_22, %c0_23] : memref<2x4x64x16xbf16, #tpu.memory_space<vmem>>, vector<1x1x64x16xbf16>
    %42 = vector.shape_cast %41 : vector<1x1x64x16xbf16> to vector<64x16xbf16>
    %cst_24 = arith.constant dense<0.000000e+00> : vector<8x16xf32>
    %43 = tpu.matmul %34, %42, %cst_24 {dimension_numbers = #tpu.dot_dimension_numbers<[1], [0], [0], [1], [0, 0, 1, 1], [], []>} : vector<8x64xbf16>, vector<64x16xbf16>, vector<8x16xf32> -> vector<8x16xf32>
    %44 = arith.truncf %43 : vector<8x16xf32> to vector<8x16xbf16>
    %45 = vector.shape_cast %44 : vector<8x16xbf16> to vector<1x8x16xbf16>
    %c0_25 = arith.constant 0 : index
    %c0_26 = arith.constant 0 : index
    %c0_27 = arith.constant 0 : index
    %c0_28 = arith.constant 0 : index
    %46 = vector.load %arg6[%c0_25, %c0_26, %c0_27, %c0_28] : memref<2x4x64x16xbf16, #tpu.memory_space<vmem>>, vector<1x1x64x16xbf16>
    %47 = vector.shape_cast %46 : vector<1x1x64x16xbf16> to vector<64x16xbf16>
    %cst_29 = arith.constant dense<0.000000e+00> : vector<8x16xf32>
    %48 = tpu.matmul %34, %47, %cst_29 {dimension_numbers = #tpu.dot_dimension_numbers<[1], [0], [0], [1], [0, 0, 1, 1], [], []>} : vector<8x64xbf16>, vector<64x16xbf16>, vector<8x16xf32> -> vector<8x16xf32>
    %49 = arith.truncf %48 : vector<8x16xf32> to vector<8x16xbf16>
    %50 = vector.shape_cast %49 : vector<8x16xbf16> to vector<1x8x16xbf16>
    "tpu.trace_start"() <{level = 10 : i32, message = "btd,bsd->bts"}> : () -> ()
    %cst_30 = arith.constant dense<0.000000e+00> : vector<1x8x8xf32>
    %51 = tpu.matmul %40, %45, %cst_30 {dimension_numbers = #tpu.dot_dimension_numbers<[2], [2], [1], [1], [0, 0, 0, 1, 1, 1], [0], [0]>} : vector<1x8x16xbf16>, vector<1x8x16xbf16>, vector<1x8x8xf32> -> vector<1x8x8xf32>
    "tpu.trace_stop"() : () -> ()
    %52 = vector.shape_cast %7 : vector<8x8xf32> to vector<1x8x8xf32>
    %53 = arith.addf %51, %52 : vector<1x8x8xf32>
    %cst_31 = arith.constant dense<0xFF800000> : vector<1x8xf32>
    %54 = vector.multi_reduction <maximumf>, %53, %cst_31 [2] : vector<1x8x8xf32> to vector<1x8xf32>
    %55 = vector.shape_cast %54 : vector<1x8xf32> to vector<1x8x1xf32>
    %56 = vector.broadcast %55 : vector<1x8x1xf32> to vector<1x8x8xf32>
    %57 = arith.subf %53, %56 : vector<1x8x8xf32>
    %58 = math.exp %57 : vector<1x8x8xf32>
    %cst_32 = arith.constant dense<0.000000e+00> : vector<1x8xf32>
    %59 = vector.multi_reduction <add>, %58, %cst_32 [2] : vector<1x8x8xf32> to vector<1x8xf32>
    %60 = vector.shape_cast %59 : vector<1x8xf32> to vector<1x8x1xf32>
    %61 = tpu.reciprocal %60 {approx = true} : vector<1x8x1xf32> -> vector<1x8x1xf32>
    %62 = vector.broadcast %61 : vector<1x8x1xf32> to vector<1x8x8xf32>
    %63 = arith.mulf %58, %62 : vector<1x8x8xf32>
    %64 = arith.truncf %63 : vector<1x8x8xf32> to vector<1x8x8xbf16>
    "tpu.trace_start"() <{level = 10 : i32, message = "bts,bsd->btd"}> : () -> ()
    %cst_33 = arith.constant dense<0.000000e+00> : vector<1x8x16xf32>
    %65 = tpu.matmul %64, %50, %cst_33 {dimension_numbers = #tpu.dot_dimension_numbers<[2], [1], [1], [2], [0, 0, 0, 1, 1, 2], [0], [0]>} : vector<1x8x8xbf16>, vector<1x8x16xbf16>, vector<1x8x16xf32> -> vector<1x8x16xf32>
    "tpu.trace_stop"() : () -> ()
    %66 = vector.shape_cast %65 : vector<1x8x16xf32> to vector<8x16xf32>
    %67 = arith.truncf %66 : vector<8x16xf32> to vector<8x16xbf16>
    %c0_34 = arith.constant 0 : index
    %c0_35 = arith.constant 0 : index
    %c0_36 = arith.constant 0 : index
    %c0_37 = arith.constant 0 : index
    %68 = vector.load %arg7[%c0_34, %c0_35, %c0_36, %c0_37] : memref<2x4x16x64xbf16, #tpu.memory_space<vmem>>, vector<1x1x16x64xbf16>
    %69 = vector.shape_cast %68 : vector<1x1x16x64xbf16> to vector<16x64xbf16>
    %cst_38 = arith.constant dense<0.000000e+00> : vector<8x64xf32>
    %70 = tpu.matmul %67, %69, %cst_38 {dimension_numbers = #tpu.dot_dimension_numbers<[1], [0], [0], [1], [0, 0, 1, 1], [], []>} : vector<8x16xbf16>, vector<16x64xbf16>, vector<8x64xf32> -> vector<8x64xf32>
    %71 = arith.addf %35, %70 : vector<8x64xf32>
    %c0_39 = arith.constant 0 : index
    %c1 = arith.constant 1 : index
    %c0_40 = arith.constant 0 : index
    %c0_41 = arith.constant 0 : index
    %72 = vector.load %arg4[%c0_39, %c1, %c0_40, %c0_41] : memref<2x4x64x16xbf16, #tpu.memory_space<vmem>>, vector<1x1x64x16xbf16>
    %73 = vector.shape_cast %72 : vector<1x1x64x16xbf16> to vector<64x16xbf16>
    %cst_42 = arith.constant dense<0.000000e+00> : vector<8x16xf32>
    %74 = tpu.matmul %34, %73, %cst_42 {dimension_numbers = #tpu.dot_dimension_numbers<[1], [0], [0], [1], [0, 0, 1, 1], [], []>} : vector<8x64xbf16>, vector<64x16xbf16>, vector<8x16xf32> -> vector<8x16xf32>
    %75 = arith.truncf %74 : vector<8x16xf32> to vector<8x16xbf16>
    %76 = vector.shape_cast %75 : vector<8x16xbf16> to vector<1x8x16xbf16>
    %c0_43 = arith.constant 0 : index
    %c1_44 = arith.constant 1 : index
    %c0_45 = arith.constant 0 : index
    %c0_46 = arith.constant 0 : index
    %77 = vector.load %arg5[%c0_43, %c1_44, %c0_45, %c0_46] : memref<2x4x64x16xbf16, #tpu.memory_space<vmem>>, vector<1x1x64x16xbf16>
    %78 = vector.shape_cast %77 : vector<1x1x64x16xbf16> to vector<64x16xbf16>
    %cst_47 = arith.constant dense<0.000000e+00> : vector<8x16xf32>
    %79 = tpu.matmul %34, %78, %cst_47 {dimension_numbers = #tpu.dot_dimension_numbers<[1], [0], [0], [1], [0, 0, 1, 1], [], []>} : vector<8x64xbf16>, vector<64x16xbf16>, vector<8x16xf32> -> vector<8x16xf32>
    %80 = arith.truncf %79 : vector<8x16xf32> to vector<8x16xbf16>
    %81 = vector.shape_cast %80 : vector<8x16xbf16> to vector<1x8x16xbf16>
    %c0_48 = arith.constant 0 : index
    %c1_49 = arith.constant 1 : index
    %c0_50 = arith.constant 0 : index
    %c0_51 = arith.constant 0 : index
    %82 = vector.load %arg6[%c0_48, %c1_49, %c0_50, %c0_51] : memref<2x4x64x16xbf16, #tpu.memory_space<vmem>>, vector<1x1x64x16xbf16>
    %83 = vector.shape_cast %82 : vector<1x1x64x16xbf16> to vector<64x16xbf16>
    %cst_52 = arith.constant dense<0.000000e+00> : vector<8x16xf32>
    %84 = tpu.matmul %34, %83, %cst_52 {dimension_numbers = #tpu.dot_dimension_numbers<[1], [0], [0], [1], [0, 0, 1, 1], [], []>} : vector<8x64xbf16>, vector<64x16xbf16>, vector<8x16xf32> -> vector<8x16xf32>
    %85 = arith.truncf %84 : vector<8x16xf32> to vector<8x16xbf16>
    %86 = vector.shape_cast %85 : vector<8x16xbf16> to vector<1x8x16xbf16>
    "tpu.trace_start"() <{level = 10 : i32, message = "btd,bsd->bts"}> : () -> ()
    %cst_53 = arith.constant dense<0.000000e+00> : vector<1x8x8xf32>
    %87 = tpu.matmul %76, %81, %cst_53 {dimension_numbers = #tpu.dot_dimension_numbers<[2], [2], [1], [1], [0, 0, 0, 1, 1, 1], [0], [0]>} : vector<1x8x16xbf16>, vector<1x8x16xbf16>, vector<1x8x8xf32> -> vector<1x8x8xf32>
    "tpu.trace_stop"() : () -> ()
    %88 = vector.shape_cast %7 : vector<8x8xf32> to vector<1x8x8xf32>
    %89 = arith.addf %87, %88 : vector<1x8x8xf32>
    %cst_54 = arith.constant dense<0xFF800000> : vector<1x8xf32>
    %90 = vector.multi_reduction <maximumf>, %89, %cst_54 [2] : vector<1x8x8xf32> to vector<1x8xf32>
    %91 = vector.shape_cast %90 : vector<1x8xf32> to vector<1x8x1xf32>
    %92 = vector.broadcast %91 : vector<1x8x1xf32> to vector<1x8x8xf32>
    %93 = arith.subf %89, %92 : vector<1x8x8xf32>
    %94 = math.exp %93 : vector<1x8x8xf32>
    %cst_55 = arith.constant dense<0.000000e+00> : vector<1x8xf32>
    %95 = vector.multi_reduction <add>, %94, %cst_55 [2] : vector<1x8x8xf32> to vector<1x8xf32>
    %96 = vector.shape_cast %95 : vector<1x8xf32> to vector<1x8x1xf32>
    %97 = tpu.reciprocal %96 {approx = true} : vector<1x8x1xf32> -> vector<1x8x1xf32>
    %98 = vector.broadcast %97 : vector<1x8x1xf32> to vector<1x8x8xf32>
    %99 = arith.mulf %94, %98 : vector<1x8x8xf32>
    %100 = arith.truncf %99 : vector<1x8x8xf32> to vector<1x8x8xbf16>
    "tpu.trace_start"() <{level = 10 : i32, message = "bts,bsd->btd"}> : () -> ()
    %cst_56 = arith.constant dense<0.000000e+00> : vector<1x8x16xf32>
    %101 = tpu.matmul %100, %86, %cst_56 {dimension_numbers = #tpu.dot_dimension_numbers<[2], [1], [1], [2], [0, 0, 0, 1, 1, 2], [0], [0]>} : vector<1x8x8xbf16>, vector<1x8x16xbf16>, vector<1x8x16xf32> -> vector<1x8x16xf32>
    "tpu.trace_stop"() : () -> ()
    %102 = vector.shape_cast %101 : vector<1x8x16xf32> to vector<8x16xf32>
    %103 = arith.truncf %102 : vector<8x16xf32> to vector<8x16xbf16>
    %c0_57 = arith.constant 0 : index
    %c1_58 = arith.constant 1 : index
    %c0_59 = arith.constant 0 : index
    %c0_60 = arith.constant 0 : index
    %104 = vector.load %arg7[%c0_57, %c1_58, %c0_59, %c0_60] : memref<2x4x16x64xbf16, #tpu.memory_space<vmem>>, vector<1x1x16x64xbf16>
    %105 = vector.shape_cast %104 : vector<1x1x16x64xbf16> to vector<16x64xbf16>
    %cst_61 = arith.constant dense<0.000000e+00> : vector<8x64xf32>
    %106 = tpu.matmul %103, %105, %cst_61 {dimension_numbers = #tpu.dot_dimension_numbers<[1], [0], [0], [1], [0, 0, 1, 1], [], []>} : vector<8x16xbf16>, vector<16x64xbf16>, vector<8x64xf32> -> vector<8x64xf32>
    %107 = arith.addf %71, %106 : vector<8x64xf32>
    %c0_62 = arith.constant 0 : index
    %c2 = arith.constant 2 : index
    %c0_63 = arith.constant 0 : index
    %c0_64 = arith.constant 0 : index
    %108 = vector.load %arg4[%c0_62, %c2, %c0_63, %c0_64] : memref<2x4x64x16xbf16, #tpu.memory_space<vmem>>, vector<1x1x64x16xbf16>
    %109 = vector.shape_cast %108 : vector<1x1x64x16xbf16> to vector<64x16xbf16>
    %cst_65 = arith.constant dense<0.000000e+00> : vector<8x16xf32>
    %110 = tpu.matmul %34, %109, %cst_65 {dimension_numbers = #tpu.dot_dimension_numbers<[1], [0], [0], [1], [0, 0, 1, 1], [], []>} : vector<8x64xbf16>, vector<64x16xbf16>, vector<8x16xf32> -> vector<8x16xf32>
    %111 = arith.truncf %110 : vector<8x16xf32> to vector<8x16xbf16>
    %112 = vector.shape_cast %111 : vector<8x16xbf16> to vector<1x8x16xbf16>
    %c0_66 = arith.constant 0 : index
    %c2_67 = arith.constant 2 : index
    %c0_68 = arith.constant 0 : index
    %c0_69 = arith.constant 0 : index
    %113 = vector.load %arg5[%c0_66, %c2_67, %c0_68, %c0_69] : memref<2x4x64x16xbf16, #tpu.memory_space<vmem>>, vector<1x1x64x16xbf16>
    %114 = vector.shape_cast %113 : vector<1x1x64x16xbf16> to vector<64x16xbf16>
    %cst_70 = arith.constant dense<0.000000e+00> : vector<8x16xf32>
    %115 = tpu.matmul %34, %114, %cst_70 {dimension_numbers = #tpu.dot_dimension_numbers<[1], [0], [0], [1], [0, 0, 1, 1], [], []>} : vector<8x64xbf16>, vector<64x16xbf16>, vector<8x16xf32> -> vector<8x16xf32>
    %116 = arith.truncf %115 : vector<8x16xf32> to vector<8x16xbf16>
    %117 = vector.shape_cast %116 : vector<8x16xbf16> to vector<1x8x16xbf16>
    %c0_71 = arith.constant 0 : index
    %c2_72 = arith.constant 2 : index
    %c0_73 = arith.constant 0 : index
    %c0_74 = arith.constant 0 : index
    %118 = vector.load %arg6[%c0_71, %c2_72, %c0_73, %c0_74] : memref<2x4x64x16xbf16, #tpu.memory_space<vmem>>, vector<1x1x64x16xbf16>
    %119 = vector.shape_cast %118 : vector<1x1x64x16xbf16> to vector<64x16xbf16>
    %cst_75 = arith.constant dense<0.000000e+00> : vector<8x16xf32>
    %120 = tpu.matmul %34, %119, %cst_75 {dimension_numbers = #tpu.dot_dimension_numbers<[1], [0], [0], [1], [0, 0, 1, 1], [], []>} : vector<8x64xbf16>, vector<64x16xbf16>, vector<8x16xf32> -> vector<8x16xf32>
    %121 = arith.truncf %120 : vector<8x16xf32> to vector<8x16xbf16>
    %122 = vector.shape_cast %121 : vector<8x16xbf16> to vector<1x8x16xbf16>
    "tpu.trace_start"() <{level = 10 : i32, message = "btd,bsd->bts"}> : () -> ()
    %cst_76 = arith.constant dense<0.000000e+00> : vector<1x8x8xf32>
    %123 = tpu.matmul %112, %117, %cst_76 {dimension_numbers = #tpu.dot_dimension_numbers<[2], [2], [1], [1], [0, 0, 0, 1, 1, 1], [0], [0]>} : vector<1x8x16xbf16>, vector<1x8x16xbf16>, vector<1x8x8xf32> -> vector<1x8x8xf32>
    "tpu.trace_stop"() : () -> ()
    %124 = vector.shape_cast %7 : vector<8x8xf32> to vector<1x8x8xf32>
    %125 = arith.addf %123, %124 : vector<1x8x8xf32>
    %cst_77 = arith.constant dense<0xFF800000> : vector<1x8xf32>
    %126 = vector.multi_reduction <maximumf>, %125, %cst_77 [2] : vector<1x8x8xf32> to vector<1x8xf32>
    %127 = vector.shape_cast %126 : vector<1x8xf32> to vector<1x8x1xf32>
    %128 = vector.broadcast %127 : vector<1x8x1xf32> to vector<1x8x8xf32>
    %129 = arith.subf %125, %128 : vector<1x8x8xf32>
    %130 = math.exp %129 : vector<1x8x8xf32>
    %cst_78 = arith.constant dense<0.000000e+00> : vector<1x8xf32>
    %131 = vector.multi_reduction <add>, %130, %cst_78 [2] : vector<1x8x8xf32> to vector<1x8xf32>
    %132 = vector.shape_cast %131 : vector<1x8xf32> to vector<1x8x1xf32>
    %133 = tpu.reciprocal %132 {approx = true} : vector<1x8x1xf32> -> vector<1x8x1xf32>
    %134 = vector.broadcast %133 : vector<1x8x1xf32> to vector<1x8x8xf32>
    %135 = arith.mulf %130, %134 : vector<1x8x8xf32>
    %136 = arith.truncf %135 : vector<1x8x8xf32> to vector<1x8x8xbf16>
    "tpu.trace_start"() <{level = 10 : i32, message = "bts,bsd->btd"}> : () -> ()
    %cst_79 = arith.constant dense<0.000000e+00> : vector<1x8x16xf32>
    %137 = tpu.matmul %136, %122, %cst_79 {dimension_numbers = #tpu.dot_dimension_numbers<[2], [1], [1], [2], [0, 0, 0, 1, 1, 2], [0], [0]>} : vector<1x8x8xbf16>, vector<1x8x16xbf16>, vector<1x8x16xf32> -> vector<1x8x16xf32>
    "tpu.trace_stop"() : () -> ()
    %138 = vector.shape_cast %137 : vector<1x8x16xf32> to vector<8x16xf32>
    %139 = arith.truncf %138 : vector<8x16xf32> to vector<8x16xbf16>
    %c0_80 = arith.constant 0 : index
    %c2_81 = arith.constant 2 : index
    %c0_82 = arith.constant 0 : index
    %c0_83 = arith.constant 0 : index
    %140 = vector.load %arg7[%c0_80, %c2_81, %c0_82, %c0_83] : memref<2x4x16x64xbf16, #tpu.memory_space<vmem>>, vector<1x1x16x64xbf16>
    %141 = vector.shape_cast %140 : vector<1x1x16x64xbf16> to vector<16x64xbf16>
    %cst_84 = arith.constant dense<0.000000e+00> : vector<8x64xf32>
    %142 = tpu.matmul %139, %141, %cst_84 {dimension_numbers = #tpu.dot_dimension_numbers<[1], [0], [0], [1], [0, 0, 1, 1], [], []>} : vector<8x16xbf16>, vector<16x64xbf16>, vector<8x64xf32> -> vector<8x64xf32>
    %143 = arith.addf %107, %142 : vector<8x64xf32>
    %c0_85 = arith.constant 0 : index
    %c3 = arith.constant 3 : index
    %c0_86 = arith.constant 0 : index
    %c0_87 = arith.constant 0 : index
    %144 = vector.load %arg4[%c0_85, %c3, %c0_86, %c0_87] : memref<2x4x64x16xbf16, #tpu.memory_space<vmem>>, vector<1x1x64x16xbf16>
    %145 = vector.shape_cast %144 : vector<1x1x64x16xbf16> to vector<64x16xbf16>
    %cst_88 = arith.constant dense<0.000000e+00> : vector<8x16xf32>
    %146 = tpu.matmul %34, %145, %cst_88 {dimension_numbers = #tpu.dot_dimension_numbers<[1], [0], [0], [1], [0, 0, 1, 1], [], []>} : vector<8x64xbf16>, vector<64x16xbf16>, vector<8x16xf32> -> vector<8x16xf32>
    %147 = arith.truncf %146 : vector<8x16xf32> to vector<8x16xbf16>
    %148 = vector.shape_cast %147 : vector<8x16xbf16> to vector<1x8x16xbf16>
    %c0_89 = arith.constant 0 : index
    %c3_90 = arith.constant 3 : index
    %c0_91 = arith.constant 0 : index
    %c0_92 = arith.constant 0 : index
    %149 = vector.load %arg5[%c0_89, %c3_90, %c0_91, %c0_92] : memref<2x4x64x16xbf16, #tpu.memory_space<vmem>>, vector<1x1x64x16xbf16>
    %150 = vector.shape_cast %149 : vector<1x1x64x16xbf16> to vector<64x16xbf16>
    %cst_93 = arith.constant dense<0.000000e+00> : vector<8x16xf32>
    %151 = tpu.matmul %34, %150, %cst_93 {dimension_numbers = #tpu.dot_dimension_numbers<[1], [0], [0], [1], [0, 0, 1, 1], [], []>} : vector<8x64xbf16>, vector<64x16xbf16>, vector<8x16xf32> -> vector<8x16xf32>
    %152 = arith.truncf %151 : vector<8x16xf32> to vector<8x16xbf16>
    %153 = vector.shape_cast %152 : vector<8x16xbf16> to vector<1x8x16xbf16>
    %c0_94 = arith.constant 0 : index
    %c3_95 = arith.constant 3 : index
    %c0_96 = arith.constant 0 : index
    %c0_97 = arith.constant 0 : index
    %154 = vector.load %arg6[%c0_94, %c3_95, %c0_96, %c0_97] : memref<2x4x64x16xbf16, #tpu.memory_space<vmem>>, vector<1x1x64x16xbf16>
    %155 = vector.shape_cast %154 : vector<1x1x64x16xbf16> to vector<64x16xbf16>
    %cst_98 = arith.constant dense<0.000000e+00> : vector<8x16xf32>
    %156 = tpu.matmul %34, %155, %cst_98 {dimension_numbers = #tpu.dot_dimension_numbers<[1], [0], [0], [1], [0, 0, 1, 1], [], []>} : vector<8x64xbf16>, vector<64x16xbf16>, vector<8x16xf32> -> vector<8x16xf32>
    %157 = arith.truncf %156 : vector<8x16xf32> to vector<8x16xbf16>
    %158 = vector.shape_cast %157 : vector<8x16xbf16> to vector<1x8x16xbf16>
    "tpu.trace_start"() <{level = 10 : i32, message = "btd,bsd->bts"}> : () -> ()
    %cst_99 = arith.constant dense<0.000000e+00> : vector<1x8x8xf32>
    %159 = tpu.matmul %148, %153, %cst_99 {dimension_numbers = #tpu.dot_dimension_numbers<[2], [2], [1], [1], [0, 0, 0, 1, 1, 1], [0], [0]>} : vector<1x8x16xbf16>, vector<1x8x16xbf16>, vector<1x8x8xf32> -> vector<1x8x8xf32>
    "tpu.trace_stop"() : () -> ()
    %160 = vector.shape_cast %7 : vector<8x8xf32> to vector<1x8x8xf32>
    %161 = arith.addf %159, %160 : vector<1x8x8xf32>
    %cst_100 = arith.constant dense<0xFF800000> : vector<1x8xf32>
    %162 = vector.multi_reduction <maximumf>, %161, %cst_100 [2] : vector<1x8x8xf32> to vector<1x8xf32>
    %163 = vector.shape_cast %162 : vector<1x8xf32> to vector<1x8x1xf32>
    %164 = vector.broadcast %163 : vector<1x8x1xf32> to vector<1x8x8xf32>
    %165 = arith.subf %161, %164 : vector<1x8x8xf32>
    %166 = math.exp %165 : vector<1x8x8xf32>
    %cst_101 = arith.constant dense<0.000000e+00> : vector<1x8xf32>
    %167 = vector.multi_reduction <add>, %166, %cst_101 [2] : vector<1x8x8xf32> to vector<1x8xf32>
    %168 = vector.shape_cast %167 : vector<1x8xf32> to vector<1x8x1xf32>
    %169 = tpu.reciprocal %168 {approx = true} : vector<1x8x1xf32> -> vector<1x8x1xf32>
    %170 = vector.broadcast %169 : vector<1x8x1xf32> to vector<1x8x8xf32>
    %171 = arith.mulf %166, %170 : vector<1x8x8xf32>
    %172 = arith.truncf %171 : vector<1x8x8xf32> to vector<1x8x8xbf16>
    "tpu.trace_start"() <{level = 10 : i32, message = "bts,bsd->btd"}> : () -> ()
    %cst_102 = arith.constant dense<0.000000e+00> : vector<1x8x16xf32>
    %173 = tpu.matmul %172, %158, %cst_102 {dimension_numbers = #tpu.dot_dimension_numbers<[2], [1], [1], [2], [0, 0, 0, 1, 1, 2], [0], [0]>} : vector<1x8x8xbf16>, vector<1x8x16xbf16>, vector<1x8x16xf32> -> vector<1x8x16xf32>
    "tpu.trace_stop"() : () -> ()
    %174 = vector.shape_cast %173 : vector<1x8x16xf32> to vector<8x16xf32>
    %175 = arith.truncf %174 : vector<8x16xf32> to vector<8x16xbf16>
    %c0_103 = arith.constant 0 : index
    %c3_104 = arith.constant 3 : index
    %c0_105 = arith.constant 0 : index
    %c0_106 = arith.constant 0 : index
    %176 = vector.load %arg7[%c0_103, %c3_104, %c0_105, %c0_106] : memref<2x4x16x64xbf16, #tpu.memory_space<vmem>>, vector<1x1x16x64xbf16>
    %177 = vector.shape_cast %176 : vector<1x1x16x64xbf16> to vector<16x64xbf16>
    %cst_107 = arith.constant dense<0.000000e+00> : vector<8x64xf32>
    %178 = tpu.matmul %175, %177, %cst_107 {dimension_numbers = #tpu.dot_dimension_numbers<[1], [0], [0], [1], [0, 0, 1, 1], [], []>} : vector<8x16xbf16>, vector<16x64xbf16>, vector<8x64xf32> -> vector<8x64xf32>
    %179 = arith.addf %143, %178 : vector<8x64xf32>
    %180 = arith.addf %1, %179 : vector<8x64xf32>
    %c0_108 = arith.constant 0 : index
    %c0_109 = arith.constant 0 : index
    %c0_110 = arith.constant 0 : index
    %181 = vector.load %arg8[%c0_108, %c0_109, %c0_110] : memref<2x1x64xf32, #tpu.memory_space<vmem>>, vector<1x1x64xf32>
    %182 = vector.shape_cast %181 : vector<1x1x64xf32> to vector<1x64xf32>
    %183 = vector.broadcast %182 : vector<1x64xf32> to vector<8x64xf32>
    %184 = arith.addf %180, %183 : vector<8x64xf32>
    %c0_111 = arith.constant 0 : index
    %c0_112 = arith.constant 0 : index
    %c0_113 = arith.constant 0 : index
    %185 = vector.load %arg9[%c0_111, %c0_112, %c0_113] : memref<2x1x64xf32, #tpu.memory_space<vmem>>, vector<1x1x64xf32>
    %186 = vector.shape_cast %185 : vector<1x1x64xf32> to vector<1x64xf32>
    %c0_114 = arith.constant 0 : index
    %c0_115 = arith.constant 0 : index
    %c0_116 = arith.constant 0 : index
    %187 = vector.load %arg10[%c0_114, %c0_115, %c0_116] : memref<2x1x64xf32, #tpu.memory_space<vmem>>, vector<1x1x64xf32>
    %188 = vector.shape_cast %187 : vector<1x1x64xf32> to vector<1x64xf32>
    %cst_117 = arith.constant dense<0.000000e+00> : vector<8xf32>
    %189 = vector.multi_reduction <add>, %184, %cst_117 [1] : vector<8x64xf32> to vector<8xf32>
    %190 = vector.shape_cast %189 : vector<8xf32> to vector<8x1xf32>
    %cst_118 = arith.constant 6.400000e+01 : f32
    %191 = vector.broadcast %cst_118 : f32 to vector<8x1xf32>
    %192 = arith.divf %190, %191 : vector<8x1xf32>
    %193 = vector.broadcast %192 : vector<8x1xf32> to vector<8x64xf32>
    %194 = arith.subf %184, %193 : vector<8x64xf32>
    %195 = arith.mulf %194, %194 : vector<8x64xf32>
    %cst_119 = arith.constant dense<0.000000e+00> : vector<8xf32>
    %196 = vector.multi_reduction <add>, %195, %cst_119 [1] : vector<8x64xf32> to vector<8xf32>
    %197 = vector.shape_cast %196 : vector<8xf32> to vector<8x1xf32>
    %cst_120 = arith.constant 6.400000e+01 : f32
    %198 = vector.broadcast %cst_120 : f32 to vector<8x1xf32>
    %199 = arith.divf %197, %198 : vector<8x1xf32>
    %200 = vector.broadcast %192 : vector<8x1xf32> to vector<8x64xf32>
    %201 = arith.subf %184, %200 : vector<8x64xf32>
    %cst_121 = arith.constant 9.99999974E-6 : f32
    %202 = vector.broadcast %cst_121 : f32 to vector<8x1xf32>
    %203 = arith.addf %199, %202 : vector<8x1xf32>
    %204 = math.rsqrt %203 : vector<8x1xf32>
    %205 = vector.broadcast %204 : vector<8x1xf32> to vector<8x64xf32>
    %206 = arith.mulf %201, %205 : vector<8x64xf32>
    %207 = vector.broadcast %186 : vector<1x64xf32> to vector<8x64xf32>
    %208 = arith.mulf %206, %207 : vector<8x64xf32>
    %209 = vector.broadcast %188 : vector<1x64xf32> to vector<8x64xf32>
    %210 = arith.addf %208, %209 : vector<8x64xf32>
    %211 = arith.truncf %210 : vector<8x64xf32> to vector<8x64xbf16>
    %c0_122 = arith.constant 0 : index
    %c0_123 = arith.constant 0 : index
    %c0_124 = arith.constant 0 : index
    %212 = vector.load %arg11[%c0_122, %c0_123, %c0_124] : memref<2x64x256xbf16, #tpu.memory_space<vmem>>, vector<1x64x256xbf16>
    %213 = vector.shape_cast %212 : vector<1x64x256xbf16> to vector<64x256xbf16>
    %cst_125 = arith.constant dense<0.000000e+00> : vector<8x256xf32>
    %214 = tpu.matmul %211, %213, %cst_125 {dimension_numbers = #tpu.dot_dimension_numbers<[1], [0], [0], [1], [0, 0, 1, 1], [], []>} : vector<8x64xbf16>, vector<64x256xbf16>, vector<8x256xf32> -> vector<8x256xf32>
    %c0_126 = arith.constant 0 : index
    %c0_127 = arith.constant 0 : index
    %c0_128 = arith.constant 0 : index
    %215 = vector.load %arg12[%c0_126, %c0_127, %c0_128] : memref<2x1x256xf32, #tpu.memory_space<vmem>>, vector<1x1x256xf32>
    %216 = vector.shape_cast %215 : vector<1x1x256xf32> to vector<1x256xf32>
    %217 = vector.broadcast %216 : vector<1x256xf32> to vector<8x256xf32>
    %218 = arith.addf %214, %217 : vector<8x256xf32>
    %cst_129 = arith.constant 0.000000e+00 : f32
    %219 = vector.broadcast %cst_129 : f32 to vector<8x256xf32>
    %220 = arith.maximumf %218, %219 : vector<8x256xf32>
    %221 = arith.truncf %220 : vector<8x256xf32> to vector<8x256xbf16>
    %c0_130 = arith.constant 0 : index
    %c0_131 = arith.constant 0 : index
    %c0_132 = arith.constant 0 : index
    %222 = vector.load %arg13[%c0_130, %c0_131, %c0_132] : memref<2x256x64xbf16, #tpu.memory_space<vmem>>, vector<1x256x64xbf16>
    %223 = vector.shape_cast %222 : vector<1x256x64xbf16> to vector<256x64xbf16>
    %cst_133 = arith.constant dense<0.000000e+00> : vector<8x64xf32>
    %224 = tpu.matmul %221, %223, %cst_133 {dimension_numbers = #tpu.dot_dimension_numbers<[1], [0], [0], [1], [0, 0, 1, 1], [], []>} : vector<8x256xbf16>, vector<256x64xbf16>, vector<8x64xf32> -> vector<8x64xf32>
    %225 = arith.addf %184, %224 : vector<8x64xf32>
    %c0_134 = arith.constant 0 : index
    %c0_135 = arith.constant 0 : index
    %c0_136 = arith.constant 0 : index
    %226 = vector.load %arg14[%c0_134, %c0_135, %c0_136] : memref<2x1x64xf32, #tpu.memory_space<vmem>>, vector<1x1x64xf32>
    %227 = vector.shape_cast %226 : vector<1x1x64xf32> to vector<1x64xf32>
    %228 = vector.broadcast %227 : vector<1x64xf32> to vector<8x64xf32>
    %229 = arith.addf %225, %228 : vector<8x64xf32>
    %c1_137 = arith.constant 1 : index
    %c0_138 = arith.constant 0 : index
    %c0_139 = arith.constant 0 : index
    %230 = vector.load %arg2[%c1_137, %c0_138, %c0_139] : memref<2x1x64xf32, #tpu.memory_space<vmem>>, vector<1x1x64xf32>
    %231 = vector.shape_cast %230 : vector<1x1x64xf32> to vector<1x64xf32>
    %c1_140 = arith.constant 1 : index
    %c0_141 = arith.constant 0 : index
    %c0_142 = arith.constant 0 : index
    %232 = vector.load %arg3[%c1_140, %c0_141, %c0_142] : memref<2x1x64xf32, #tpu.memory_space<vmem>>, vector<1x1x64xf32>
    %233 = vector.shape_cast %232 : vector<1x1x64xf32> to vector<1x64xf32>
    %cst_143 = arith.constant dense<0.000000e+00> : vector<8xf32>
    %234 = vector.multi_reduction <add>, %229, %cst_143 [1] : vector<8x64xf32> to vector<8xf32>
    %235 = vector.shape_cast %234 : vector<8xf32> to vector<8x1xf32>
    %cst_144 = arith.constant 6.400000e+01 : f32
    %236 = vector.broadcast %cst_144 : f32 to vector<8x1xf32>
    %237 = arith.divf %235, %236 : vector<8x1xf32>
    %238 = vector.broadcast %237 : vector<8x1xf32> to vector<8x64xf32>
    %239 = arith.subf %229, %238 : vector<8x64xf32>
    %240 = arith.mulf %239, %239 : vector<8x64xf32>
    %cst_145 = arith.constant dense<0.000000e+00> : vector<8xf32>
    %241 = vector.multi_reduction <add>, %240, %cst_145 [1] : vector<8x64xf32> to vector<8xf32>
    %242 = vector.shape_cast %241 : vector<8xf32> to vector<8x1xf32>
    %cst_146 = arith.constant 6.400000e+01 : f32
    %243 = vector.broadcast %cst_146 : f32 to vector<8x1xf32>
    %244 = arith.divf %242, %243 : vector<8x1xf32>
    %245 = vector.broadcast %237 : vector<8x1xf32> to vector<8x64xf32>
    %246 = arith.subf %229, %245 : vector<8x64xf32>
    %cst_147 = arith.constant 9.99999974E-6 : f32
    %247 = vector.broadcast %cst_147 : f32 to vector<8x1xf32>
    %248 = arith.addf %244, %247 : vector<8x1xf32>
    %249 = math.rsqrt %248 : vector<8x1xf32>
    %250 = vector.broadcast %249 : vector<8x1xf32> to vector<8x64xf32>
    %251 = arith.mulf %246, %250 : vector<8x64xf32>
    %252 = vector.broadcast %231 : vector<1x64xf32> to vector<8x64xf32>
    %253 = arith.mulf %251, %252 : vector<8x64xf32>
    %254 = vector.broadcast %233 : vector<1x64xf32> to vector<8x64xf32>
    %255 = arith.addf %253, %254 : vector<8x64xf32>
    %256 = arith.truncf %255 : vector<8x64xf32> to vector<8x64xbf16>
    %cst_148 = arith.constant 0.000000e+00 : f32
    %257 = vector.broadcast %cst_148 : f32 to vector<8x64xf32>
    %c1_149 = arith.constant 1 : index
    %c0_150 = arith.constant 0 : index
    %c0_151 = arith.constant 0 : index
    %c0_152 = arith.constant 0 : index
    %258 = vector.load %arg4[%c1_149, %c0_150, %c0_151, %c0_152] : memref<2x4x64x16xbf16, #tpu.memory_space<vmem>>, vector<1x1x64x16xbf16>
    %259 = vector.shape_cast %258 : vector<1x1x64x16xbf16> to vector<64x16xbf16>
    %cst_153 = arith.constant dense<0.000000e+00> : vector<8x16xf32>
    %260 = tpu.matmul %256, %259, %cst_153 {dimension_numbers = #tpu.dot_dimension_numbers<[1], [0], [0], [1], [0, 0, 1, 1], [], []>} : vector<8x64xbf16>, vector<64x16xbf16>, vector<8x16xf32> -> vector<8x16xf32>
    %261 = arith.truncf %260 : vector<8x16xf32> to vector<8x16xbf16>
    %262 = vector.shape_cast %261 : vector<8x16xbf16> to vector<1x8x16xbf16>
    %c1_154 = arith.constant 1 : index
    %c0_155 = arith.constant 0 : index
    %c0_156 = arith.constant 0 : index
    %c0_157 = arith.constant 0 : index
    %263 = vector.load %arg5[%c1_154, %c0_155, %c0_156, %c0_157] : memref<2x4x64x16xbf16, #tpu.memory_space<vmem>>, vector<1x1x64x16xbf16>
    %264 = vector.shape_cast %263 : vector<1x1x64x16xbf16> to vector<64x16xbf16>
    %cst_158 = arith.constant dense<0.000000e+00> : vector<8x16xf32>
    %265 = tpu.matmul %256, %264, %cst_158 {dimension_numbers = #tpu.dot_dimension_numbers<[1], [0], [0], [1], [0, 0, 1, 1], [], []>} : vector<8x64xbf16>, vector<64x16xbf16>, vector<8x16xf32> -> vector<8x16xf32>
    %266 = arith.truncf %265 : vector<8x16xf32> to vector<8x16xbf16>
    %267 = vector.shape_cast %266 : vector<8x16xbf16> to vector<1x8x16xbf16>
    %c1_159 = arith.constant 1 : index
    %c0_160 = arith.constant 0 : index
    %c0_161 = arith.constant 0 : index
    %c0_162 = arith.constant 0 : index
    %268 = vector.load %arg6[%c1_159, %c0_160, %c0_161, %c0_162] : memref<2x4x64x16xbf16, #tpu.memory_space<vmem>>, vector<1x1x64x16xbf16>
    %269 = vector.shape_cast %268 : vector<1x1x64x16xbf16> to vector<64x16xbf16>
    %cst_163 = arith.constant dense<0.000000e+00> : vector<8x16xf32>
    %270 = tpu.matmul %256, %269, %cst_163 {dimension_numbers = #tpu.dot_dimension_numbers<[1], [0], [0], [1], [0, 0, 1, 1], [], []>} : vector<8x64xbf16>, vector<64x16xbf16>, vector<8x16xf32> -> vector<8x16xf32>
    %271 = arith.truncf %270 : vector<8x16xf32> to vector<8x16xbf16>
    %272 = vector.shape_cast %271 : vector<8x16xbf16> to vector<1x8x16xbf16>
    "tpu.trace_start"() <{level = 10 : i32, message = "btd,bsd->bts"}> : () -> ()
    %cst_164 = arith.constant dense<0.000000e+00> : vector<1x8x8xf32>
    %273 = tpu.matmul %262, %267, %cst_164 {dimension_numbers = #tpu.dot_dimension_numbers<[2], [2], [1], [1], [0, 0, 0, 1, 1, 1], [0], [0]>} : vector<1x8x16xbf16>, vector<1x8x16xbf16>, vector<1x8x8xf32> -> vector<1x8x8xf32>
    "tpu.trace_stop"() : () -> ()
    %274 = vector.shape_cast %7 : vector<8x8xf32> to vector<1x8x8xf32>
    %275 = arith.addf %273, %274 : vector<1x8x8xf32>
    %cst_165 = arith.constant dense<0xFF800000> : vector<1x8xf32>
    %276 = vector.multi_reduction <maximumf>, %275, %cst_165 [2] : vector<1x8x8xf32> to vector<1x8xf32>
    %277 = vector.shape_cast %276 : vector<1x8xf32> to vector<1x8x1xf32>
    %278 = vector.broadcast %277 : vector<1x8x1xf32> to vector<1x8x8xf32>
    %279 = arith.subf %275, %278 : vector<1x8x8xf32>
    %280 = math.exp %279 : vector<1x8x8xf32>
    %cst_166 = arith.constant dense<0.000000e+00> : vector<1x8xf32>
    %281 = vector.multi_reduction <add>, %280, %cst_166 [2] : vector<1x8x8xf32> to vector<1x8xf32>
    %282 = vector.shape_cast %281 : vector<1x8xf32> to vector<1x8x1xf32>
    %283 = tpu.reciprocal %282 {approx = true} : vector<1x8x1xf32> -> vector<1x8x1xf32>
    %284 = vector.broadcast %283 : vector<1x8x1xf32> to vector<1x8x8xf32>
    %285 = arith.mulf %280, %284 : vector<1x8x8xf32>
    %286 = arith.truncf %285 : vector<1x8x8xf32> to vector<1x8x8xbf16>
    "tpu.trace_start"() <{level = 10 : i32, message = "bts,bsd->btd"}> : () -> ()
    %cst_167 = arith.constant dense<0.000000e+00> : vector<1x8x16xf32>
    %287 = tpu.matmul %286, %272, %cst_167 {dimension_numbers = #tpu.dot_dimension_numbers<[2], [1], [1], [2], [0, 0, 0, 1, 1, 2], [0], [0]>} : vector<1x8x8xbf16>, vector<1x8x16xbf16>, vector<1x8x16xf32> -> vector<1x8x16xf32>
    "tpu.trace_stop"() : () -> ()
    %288 = vector.shape_cast %287 : vector<1x8x16xf32> to vector<8x16xf32>
    %289 = arith.truncf %288 : vector<8x16xf32> to vector<8x16xbf16>
    %c1_168 = arith.constant 1 : index
    %c0_169 = arith.constant 0 : index
    %c0_170 = arith.constant 0 : index
    %c0_171 = arith.constant 0 : index
    %290 = vector.load %arg7[%c1_168, %c0_169, %c0_170, %c0_171] : memref<2x4x16x64xbf16, #tpu.memory_space<vmem>>, vector<1x1x16x64xbf16>
    %291 = vector.shape_cast %290 : vector<1x1x16x64xbf16> to vector<16x64xbf16>
    %cst_172 = arith.constant dense<0.000000e+00> : vector<8x64xf32>
    %292 = tpu.matmul %289, %291, %cst_172 {dimension_numbers = #tpu.dot_dimension_numbers<[1], [0], [0], [1], [0, 0, 1, 1], [], []>} : vector<8x16xbf16>, vector<16x64xbf16>, vector<8x64xf32> -> vector<8x64xf32>
    %293 = arith.addf %257, %292 : vector<8x64xf32>
    %c1_173 = arith.constant 1 : index
    %c1_174 = arith.constant 1 : index
    %c0_175 = arith.constant 0 : index
    %c0_176 = arith.constant 0 : index
    %294 = vector.load %arg4[%c1_173, %c1_174, %c0_175, %c0_176] : memref<2x4x64x16xbf16, #tpu.memory_space<vmem>>, vector<1x1x64x16xbf16>
    %295 = vector.shape_cast %294 : vector<1x1x64x16xbf16> to vector<64x16xbf16>
    %cst_177 = arith.constant dense<0.000000e+00> : vector<8x16xf32>
    %296 = tpu.matmul %256, %295, %cst_177 {dimension_numbers = #tpu.dot_dimension_numbers<[1], [0], [0], [1], [0, 0, 1, 1], [], []>} : vector<8x64xbf16>, vector<64x16xbf16>, vector<8x16xf32> -> vector<8x16xf32>
    %297 = arith.truncf %296 : vector<8x16xf32> to vector<8x16xbf16>
    %298 = vector.shape_cast %297 : vector<8x16xbf16> to vector<1x8x16xbf16>
    %c1_178 = arith.constant 1 : index
    %c1_179 = arith.constant 1 : index
    %c0_180 = arith.constant 0 : index
    %c0_181 = arith.constant 0 : index
    %299 = vector.load %arg5[%c1_178, %c1_179, %c0_180, %c0_181] : memref<2x4x64x16xbf16, #tpu.memory_space<vmem>>, vector<1x1x64x16xbf16>
    %300 = vector.shape_cast %299 : vector<1x1x64x16xbf16> to vector<64x16xbf16>
    %cst_182 = arith.constant dense<0.000000e+00> : vector<8x16xf32>
    %301 = tpu.matmul %256, %300, %cst_182 {dimension_numbers = #tpu.dot_dimension_numbers<[1], [0], [0], [1], [0, 0, 1, 1], [], []>} : vector<8x64xbf16>, vector<64x16xbf16>, vector<8x16xf32> -> vector<8x16xf32>
    %302 = arith.truncf %301 : vector<8x16xf32> to vector<8x16xbf16>
    %303 = vector.shape_cast %302 : vector<8x16xbf16> to vector<1x8x16xbf16>
    %c1_183 = arith.constant 1 : index
    %c1_184 = arith.constant 1 : index
    %c0_185 = arith.constant 0 : index
    %c0_186 = arith.constant 0 : index
    %304 = vector.load %arg6[%c1_183, %c1_184, %c0_185, %c0_186] : memref<2x4x64x16xbf16, #tpu.memory_space<vmem>>, vector<1x1x64x16xbf16>
    %305 = vector.shape_cast %304 : vector<1x1x64x16xbf16> to vector<64x16xbf16>
    %cst_187 = arith.constant dense<0.000000e+00> : vector<8x16xf32>
    %306 = tpu.matmul %256, %305, %cst_187 {dimension_numbers = #tpu.dot_dimension_numbers<[1], [0], [0], [1], [0, 0, 1, 1], [], []>} : vector<8x64xbf16>, vector<64x16xbf16>, vector<8x16xf32> -> vector<8x16xf32>
    %307 = arith.truncf %306 : vector<8x16xf32> to vector<8x16xbf16>
    %308 = vector.shape_cast %307 : vector<8x16xbf16> to vector<1x8x16xbf16>
    "tpu.trace_start"() <{level = 10 : i32, message = "btd,bsd->bts"}> : () -> ()
    %cst_188 = arith.constant dense<0.000000e+00> : vector<1x8x8xf32>
    %309 = tpu.matmul %298, %303, %cst_188 {dimension_numbers = #tpu.dot_dimension_numbers<[2], [2], [1], [1], [0, 0, 0, 1, 1, 1], [0], [0]>} : vector<1x8x16xbf16>, vector<1x8x16xbf16>, vector<1x8x8xf32> -> vector<1x8x8xf32>
    "tpu.trace_stop"() : () -> ()
    %310 = vector.shape_cast %7 : vector<8x8xf32> to vector<1x8x8xf32>
    %311 = arith.addf %309, %310 : vector<1x8x8xf32>
    %cst_189 = arith.constant dense<0xFF800000> : vector<1x8xf32>
    %312 = vector.multi_reduction <maximumf>, %311, %cst_189 [2] : vector<1x8x8xf32> to vector<1x8xf32>
    %313 = vector.shape_cast %312 : vector<1x8xf32> to vector<1x8x1xf32>
    %314 = vector.broadcast %313 : vector<1x8x1xf32> to vector<1x8x8xf32>
    %315 = arith.subf %311, %314 : vector<1x8x8xf32>
    %316 = math.exp %315 : vector<1x8x8xf32>
    %cst_190 = arith.constant dense<0.000000e+00> : vector<1x8xf32>
    %317 = vector.multi_reduction <add>, %316, %cst_190 [2] : vector<1x8x8xf32> to vector<1x8xf32>
    %318 = vector.shape_cast %317 : vector<1x8xf32> to vector<1x8x1xf32>
    %319 = tpu.reciprocal %318 {approx = true} : vector<1x8x1xf32> -> vector<1x8x1xf32>
    %320 = vector.broadcast %319 : vector<1x8x1xf32> to vector<1x8x8xf32>
    %321 = arith.mulf %316, %320 : vector<1x8x8xf32>
    %322 = arith.truncf %321 : vector<1x8x8xf32> to vector<1x8x8xbf16>
    "tpu.trace_start"() <{level = 10 : i32, message = "bts,bsd->btd"}> : () -> ()
    %cst_191 = arith.constant dense<0.000000e+00> : vector<1x8x16xf32>
    %323 = tpu.matmul %322, %308, %cst_191 {dimension_numbers = #tpu.dot_dimension_numbers<[2], [1], [1], [2], [0, 0, 0, 1, 1, 2], [0], [0]>} : vector<1x8x8xbf16>, vector<1x8x16xbf16>, vector<1x8x16xf32> -> vector<1x8x16xf32>
    "tpu.trace_stop"() : () -> ()
    %324 = vector.shape_cast %323 : vector<1x8x16xf32> to vector<8x16xf32>
    %325 = arith.truncf %324 : vector<8x16xf32> to vector<8x16xbf16>
    %c1_192 = arith.constant 1 : index
    %c1_193 = arith.constant 1 : index
    %c0_194 = arith.constant 0 : index
    %c0_195 = arith.constant 0 : index
    %326 = vector.load %arg7[%c1_192, %c1_193, %c0_194, %c0_195] : memref<2x4x16x64xbf16, #tpu.memory_space<vmem>>, vector<1x1x16x64xbf16>
    %327 = vector.shape_cast %326 : vector<1x1x16x64xbf16> to vector<16x64xbf16>
    %cst_196 = arith.constant dense<0.000000e+00> : vector<8x64xf32>
    %328 = tpu.matmul %325, %327, %cst_196 {dimension_numbers = #tpu.dot_dimension_numbers<[1], [0], [0], [1], [0, 0, 1, 1], [], []>} : vector<8x16xbf16>, vector<16x64xbf16>, vector<8x64xf32> -> vector<8x64xf32>
    %329 = arith.addf %293, %328 : vector<8x64xf32>
    %c1_197 = arith.constant 1 : index
    %c2_198 = arith.constant 2 : index
    %c0_199 = arith.constant 0 : index
    %c0_200 = arith.constant 0 : index
    %330 = vector.load %arg4[%c1_197, %c2_198, %c0_199, %c0_200] : memref<2x4x64x16xbf16, #tpu.memory_space<vmem>>, vector<1x1x64x16xbf16>
    %331 = vector.shape_cast %330 : vector<1x1x64x16xbf16> to vector<64x16xbf16>
    %cst_201 = arith.constant dense<0.000000e+00> : vector<8x16xf32>
    %332 = tpu.matmul %256, %331, %cst_201 {dimension_numbers = #tpu.dot_dimension_numbers<[1], [0], [0], [1], [0, 0, 1, 1], [], []>} : vector<8x64xbf16>, vector<64x16xbf16>, vector<8x16xf32> -> vector<8x16xf32>
    %333 = arith.truncf %332 : vector<8x16xf32> to vector<8x16xbf16>
    %334 = vector.shape_cast %333 : vector<8x16xbf16> to vector<1x8x16xbf16>
    %c1_202 = arith.constant 1 : index
    %c2_203 = arith.constant 2 : index
    %c0_204 = arith.constant 0 : index
    %c0_205 = arith.constant 0 : index
    %335 = vector.load %arg5[%c1_202, %c2_203, %c0_204, %c0_205] : memref<2x4x64x16xbf16, #tpu.memory_space<vmem>>, vector<1x1x64x16xbf16>
    %336 = vector.shape_cast %335 : vector<1x1x64x16xbf16> to vector<64x16xbf16>
    %cst_206 = arith.constant dense<0.000000e+00> : vector<8x16xf32>
    %337 = tpu.matmul %256, %336, %cst_206 {dimension_numbers = #tpu.dot_dimension_numbers<[1], [0], [0], [1], [0, 0, 1, 1], [], []>} : vector<8x64xbf16>, vector<64x16xbf16>, vector<8x16xf32> -> vector<8x16xf32>
    %338 = arith.truncf %337 : vector<8x16xf32> to vector<8x16xbf16>
    %339 = vector.shape_cast %338 : vector<8x16xbf16> to vector<1x8x16xbf16>
    %c1_207 = arith.constant 1 : index
    %c2_208 = arith.constant 2 : index
    %c0_209 = arith.constant 0 : index
    %c0_210 = arith.constant 0 : index
    %340 = vector.load %arg6[%c1_207, %c2_208, %c0_209, %c0_210] : memref<2x4x64x16xbf16, #tpu.memory_space<vmem>>, vector<1x1x64x16xbf16>
    %341 = vector.shape_cast %340 : vector<1x1x64x16xbf16> to vector<64x16xbf16>
    %cst_211 = arith.constant dense<0.000000e+00> : vector<8x16xf32>
    %342 = tpu.matmul %256, %341, %cst_211 {dimension_numbers = #tpu.dot_dimension_numbers<[1], [0], [0], [1], [0, 0, 1, 1], [], []>} : vector<8x64xbf16>, vector<64x16xbf16>, vector<8x16xf32> -> vector<8x16xf32>
    %343 = arith.truncf %342 : vector<8x16xf32> to vector<8x16xbf16>
    %344 = vector.shape_cast %343 : vector<8x16xbf16> to vector<1x8x16xbf16>
    "tpu.trace_start"() <{level = 10 : i32, message = "btd,bsd->bts"}> : () -> ()
    %cst_212 = arith.constant dense<0.000000e+00> : vector<1x8x8xf32>
    %345 = tpu.matmul %334, %339, %cst_212 {dimension_numbers = #tpu.dot_dimension_numbers<[2], [2], [1], [1], [0, 0, 0, 1, 1, 1], [0], [0]>} : vector<1x8x16xbf16>, vector<1x8x16xbf16>, vector<1x8x8xf32> -> vector<1x8x8xf32>
    "tpu.trace_stop"() : () -> ()
    %346 = vector.shape_cast %7 : vector<8x8xf32> to vector<1x8x8xf32>
    %347 = arith.addf %345, %346 : vector<1x8x8xf32>
    %cst_213 = arith.constant dense<0xFF800000> : vector<1x8xf32>
    %348 = vector.multi_reduction <maximumf>, %347, %cst_213 [2] : vector<1x8x8xf32> to vector<1x8xf32>
    %349 = vector.shape_cast %348 : vector<1x8xf32> to vector<1x8x1xf32>
    %350 = vector.broadcast %349 : vector<1x8x1xf32> to vector<1x8x8xf32>
    %351 = arith.subf %347, %350 : vector<1x8x8xf32>
    %352 = math.exp %351 : vector<1x8x8xf32>
    %cst_214 = arith.constant dense<0.000000e+00> : vector<1x8xf32>
    %353 = vector.multi_reduction <add>, %352, %cst_214 [2] : vector<1x8x8xf32> to vector<1x8xf32>
    %354 = vector.shape_cast %353 : vector<1x8xf32> to vector<1x8x1xf32>
    %355 = tpu.reciprocal %354 {approx = true} : vector<1x8x1xf32> -> vector<1x8x1xf32>
    %356 = vector.broadcast %355 : vector<1x8x1xf32> to vector<1x8x8xf32>
    %357 = arith.mulf %352, %356 : vector<1x8x8xf32>
    %358 = arith.truncf %357 : vector<1x8x8xf32> to vector<1x8x8xbf16>
    "tpu.trace_start"() <{level = 10 : i32, message = "bts,bsd->btd"}> : () -> ()
    %cst_215 = arith.constant dense<0.000000e+00> : vector<1x8x16xf32>
    %359 = tpu.matmul %358, %344, %cst_215 {dimension_numbers = #tpu.dot_dimension_numbers<[2], [1], [1], [2], [0, 0, 0, 1, 1, 2], [0], [0]>} : vector<1x8x8xbf16>, vector<1x8x16xbf16>, vector<1x8x16xf32> -> vector<1x8x16xf32>
    "tpu.trace_stop"() : () -> ()
    %360 = vector.shape_cast %359 : vector<1x8x16xf32> to vector<8x16xf32>
    %361 = arith.truncf %360 : vector<8x16xf32> to vector<8x16xbf16>
    %c1_216 = arith.constant 1 : index
    %c2_217 = arith.constant 2 : index
    %c0_218 = arith.constant 0 : index
    %c0_219 = arith.constant 0 : index
    %362 = vector.load %arg7[%c1_216, %c2_217, %c0_218, %c0_219] : memref<2x4x16x64xbf16, #tpu.memory_space<vmem>>, vector<1x1x16x64xbf16>
    %363 = vector.shape_cast %362 : vector<1x1x16x64xbf16> to vector<16x64xbf16>
    %cst_220 = arith.constant dense<0.000000e+00> : vector<8x64xf32>
    %364 = tpu.matmul %361, %363, %cst_220 {dimension_numbers = #tpu.dot_dimension_numbers<[1], [0], [0], [1], [0, 0, 1, 1], [], []>} : vector<8x16xbf16>, vector<16x64xbf16>, vector<8x64xf32> -> vector<8x64xf32>
    %365 = arith.addf %329, %364 : vector<8x64xf32>
    %c1_221 = arith.constant 1 : index
    %c3_222 = arith.constant 3 : index
    %c0_223 = arith.constant 0 : index
    %c0_224 = arith.constant 0 : index
    %366 = vector.load %arg4[%c1_221, %c3_222, %c0_223, %c0_224] : memref<2x4x64x16xbf16, #tpu.memory_space<vmem>>, vector<1x1x64x16xbf16>
    %367 = vector.shape_cast %366 : vector<1x1x64x16xbf16> to vector<64x16xbf16>
    %cst_225 = arith.constant dense<0.000000e+00> : vector<8x16xf32>
    %368 = tpu.matmul %256, %367, %cst_225 {dimension_numbers = #tpu.dot_dimension_numbers<[1], [0], [0], [1], [0, 0, 1, 1], [], []>} : vector<8x64xbf16>, vector<64x16xbf16>, vector<8x16xf32> -> vector<8x16xf32>
    %369 = arith.truncf %368 : vector<8x16xf32> to vector<8x16xbf16>
    %370 = vector.shape_cast %369 : vector<8x16xbf16> to vector<1x8x16xbf16>
    %c1_226 = arith.constant 1 : index
    %c3_227 = arith.constant 3 : index
    %c0_228 = arith.constant 0 : index
    %c0_229 = arith.constant 0 : index
    %371 = vector.load %arg5[%c1_226, %c3_227, %c0_228, %c0_229] : memref<2x4x64x16xbf16, #tpu.memory_space<vmem>>, vector<1x1x64x16xbf16>
    %372 = vector.shape_cast %371 : vector<1x1x64x16xbf16> to vector<64x16xbf16>
    %cst_230 = arith.constant dense<0.000000e+00> : vector<8x16xf32>
    %373 = tpu.matmul %256, %372, %cst_230 {dimension_numbers = #tpu.dot_dimension_numbers<[1], [0], [0], [1], [0, 0, 1, 1], [], []>} : vector<8x64xbf16>, vector<64x16xbf16>, vector<8x16xf32> -> vector<8x16xf32>
    %374 = arith.truncf %373 : vector<8x16xf32> to vector<8x16xbf16>
    %375 = vector.shape_cast %374 : vector<8x16xbf16> to vector<1x8x16xbf16>
    %c1_231 = arith.constant 1 : index
    %c3_232 = arith.constant 3 : index
    %c0_233 = arith.constant 0 : index
    %c0_234 = arith.constant 0 : index
    %376 = vector.load %arg6[%c1_231, %c3_232, %c0_233, %c0_234] : memref<2x4x64x16xbf16, #tpu.memory_space<vmem>>, vector<1x1x64x16xbf16>
    %377 = vector.shape_cast %376 : vector<1x1x64x16xbf16> to vector<64x16xbf16>
    %cst_235 = arith.constant dense<0.000000e+00> : vector<8x16xf32>
    %378 = tpu.matmul %256, %377, %cst_235 {dimension_numbers = #tpu.dot_dimension_numbers<[1], [0], [0], [1], [0, 0, 1, 1], [], []>} : vector<8x64xbf16>, vector<64x16xbf16>, vector<8x16xf32> -> vector<8x16xf32>
    %379 = arith.truncf %378 : vector<8x16xf32> to vector<8x16xbf16>
    %380 = vector.shape_cast %379 : vector<8x16xbf16> to vector<1x8x16xbf16>
    "tpu.trace_start"() <{level = 10 : i32, message = "btd,bsd->bts"}> : () -> ()
    %cst_236 = arith.constant dense<0.000000e+00> : vector<1x8x8xf32>
    %381 = tpu.matmul %370, %375, %cst_236 {dimension_numbers = #tpu.dot_dimension_numbers<[2], [2], [1], [1], [0, 0, 0, 1, 1, 1], [0], [0]>} : vector<1x8x16xbf16>, vector<1x8x16xbf16>, vector<1x8x8xf32> -> vector<1x8x8xf32>
    "tpu.trace_stop"() : () -> ()
    %382 = vector.shape_cast %7 : vector<8x8xf32> to vector<1x8x8xf32>
    %383 = arith.addf %381, %382 : vector<1x8x8xf32>
    %cst_237 = arith.constant dense<0xFF800000> : vector<1x8xf32>
    %384 = vector.multi_reduction <maximumf>, %383, %cst_237 [2] : vector<1x8x8xf32> to vector<1x8xf32>
    %385 = vector.shape_cast %384 : vector<1x8xf32> to vector<1x8x1xf32>
    %386 = vector.broadcast %385 : vector<1x8x1xf32> to vector<1x8x8xf32>
    %387 = arith.subf %383, %386 : vector<1x8x8xf32>
    %388 = math.exp %387 : vector<1x8x8xf32>
    %cst_238 = arith.constant dense<0.000000e+00> : vector<1x8xf32>
    %389 = vector.multi_reduction <add>, %388, %cst_238 [2] : vector<1x8x8xf32> to vector<1x8xf32>
    %390 = vector.shape_cast %389 : vector<1x8xf32> to vector<1x8x1xf32>
    %391 = tpu.reciprocal %390 {approx = true} : vector<1x8x1xf32> -> vector<1x8x1xf32>
    %392 = vector.broadcast %391 : vector<1x8x1xf32> to vector<1x8x8xf32>
    %393 = arith.mulf %388, %392 : vector<1x8x8xf32>
    %394 = arith.truncf %393 : vector<1x8x8xf32> to vector<1x8x8xbf16>
    "tpu.trace_start"() <{level = 10 : i32, message = "bts,bsd->btd"}> : () -> ()
    %cst_239 = arith.constant dense<0.000000e+00> : vector<1x8x16xf32>
    %395 = tpu.matmul %394, %380, %cst_239 {dimension_numbers = #tpu.dot_dimension_numbers<[2], [1], [1], [2], [0, 0, 0, 1, 1, 2], [0], [0]>} : vector<1x8x8xbf16>, vector<1x8x16xbf16>, vector<1x8x16xf32> -> vector<1x8x16xf32>
    "tpu.trace_stop"() : () -> ()
    %396 = vector.shape_cast %395 : vector<1x8x16xf32> to vector<8x16xf32>
    %397 = arith.truncf %396 : vector<8x16xf32> to vector<8x16xbf16>
    %c1_240 = arith.constant 1 : index
    %c3_241 = arith.constant 3 : index
    %c0_242 = arith.constant 0 : index
    %c0_243 = arith.constant 0 : index
    %398 = vector.load %arg7[%c1_240, %c3_241, %c0_242, %c0_243] : memref<2x4x16x64xbf16, #tpu.memory_space<vmem>>, vector<1x1x16x64xbf16>
    %399 = vector.shape_cast %398 : vector<1x1x16x64xbf16> to vector<16x64xbf16>
    %cst_244 = arith.constant dense<0.000000e+00> : vector<8x64xf32>
    %400 = tpu.matmul %397, %399, %cst_244 {dimension_numbers = #tpu.dot_dimension_numbers<[1], [0], [0], [1], [0, 0, 1, 1], [], []>} : vector<8x16xbf16>, vector<16x64xbf16>, vector<8x64xf32> -> vector<8x64xf32>
    %401 = arith.addf %365, %400 : vector<8x64xf32>
    %402 = arith.addf %229, %401 : vector<8x64xf32>
    %c1_245 = arith.constant 1 : index
    %c0_246 = arith.constant 0 : index
    %c0_247 = arith.constant 0 : index
    %403 = vector.load %arg8[%c1_245, %c0_246, %c0_247] : memref<2x1x64xf32, #tpu.memory_space<vmem>>, vector<1x1x64xf32>
    %404 = vector.shape_cast %403 : vector<1x1x64xf32> to vector<1x64xf32>
    %405 = vector.broadcast %404 : vector<1x64xf32> to vector<8x64xf32>
    %406 = arith.addf %402, %405 : vector<8x64xf32>
    %c1_248 = arith.constant 1 : index
    %c0_249 = arith.constant 0 : index
    %c0_250 = arith.constant 0 : index
    %407 = vector.load %arg9[%c1_248, %c0_249, %c0_250] : memref<2x1x64xf32, #tpu.memory_space<vmem>>, vector<1x1x64xf32>
    %408 = vector.shape_cast %407 : vector<1x1x64xf32> to vector<1x64xf32>
    %c1_251 = arith.constant 1 : index
    %c0_252 = arith.constant 0 : index
    %c0_253 = arith.constant 0 : index
    %409 = vector.load %arg10[%c1_251, %c0_252, %c0_253] : memref<2x1x64xf32, #tpu.memory_space<vmem>>, vector<1x1x64xf32>
    %410 = vector.shape_cast %409 : vector<1x1x64xf32> to vector<1x64xf32>
    %cst_254 = arith.constant dense<0.000000e+00> : vector<8xf32>
    %411 = vector.multi_reduction <add>, %406, %cst_254 [1] : vector<8x64xf32> to vector<8xf32>
    %412 = vector.shape_cast %411 : vector<8xf32> to vector<8x1xf32>
    %cst_255 = arith.constant 6.400000e+01 : f32
    %413 = vector.broadcast %cst_255 : f32 to vector<8x1xf32>
    %414 = arith.divf %412, %413 : vector<8x1xf32>
    %415 = vector.broadcast %414 : vector<8x1xf32> to vector<8x64xf32>
    %416 = arith.subf %406, %415 : vector<8x64xf32>
    %417 = arith.mulf %416, %416 : vector<8x64xf32>
    %cst_256 = arith.constant dense<0.000000e+00> : vector<8xf32>
    %418 = vector.multi_reduction <add>, %417, %cst_256 [1] : vector<8x64xf32> to vector<8xf32>
    %419 = vector.shape_cast %418 : vector<8xf32> to vector<8x1xf32>
    %cst_257 = arith.constant 6.400000e+01 : f32
    %420 = vector.broadcast %cst_257 : f32 to vector<8x1xf32>
    %421 = arith.divf %419, %420 : vector<8x1xf32>
    %422 = vector.broadcast %414 : vector<8x1xf32> to vector<8x64xf32>
    %423 = arith.subf %406, %422 : vector<8x64xf32>
    %cst_258 = arith.constant 9.99999974E-6 : f32
    %424 = vector.broadcast %cst_258 : f32 to vector<8x1xf32>
    %425 = arith.addf %421, %424 : vector<8x1xf32>
    %426 = math.rsqrt %425 : vector<8x1xf32>
    %427 = vector.broadcast %426 : vector<8x1xf32> to vector<8x64xf32>
    %428 = arith.mulf %423, %427 : vector<8x64xf32>
    %429 = vector.broadcast %408 : vector<1x64xf32> to vector<8x64xf32>
    %430 = arith.mulf %428, %429 : vector<8x64xf32>
    %431 = vector.broadcast %410 : vector<1x64xf32> to vector<8x64xf32>
    %432 = arith.addf %430, %431 : vector<8x64xf32>
    %433 = arith.truncf %432 : vector<8x64xf32> to vector<8x64xbf16>
    %c1_259 = arith.constant 1 : index
    %c0_260 = arith.constant 0 : index
    %c0_261 = arith.constant 0 : index
    %434 = vector.load %arg11[%c1_259, %c0_260, %c0_261] : memref<2x64x256xbf16, #tpu.memory_space<vmem>>, vector<1x64x256xbf16>
    %435 = vector.shape_cast %434 : vector<1x64x256xbf16> to vector<64x256xbf16>
    %cst_262 = arith.constant dense<0.000000e+00> : vector<8x256xf32>
    %436 = tpu.matmul %433, %435, %cst_262 {dimension_numbers = #tpu.dot_dimension_numbers<[1], [0], [0], [1], [0, 0, 1, 1], [], []>} : vector<8x64xbf16>, vector<64x256xbf16>, vector<8x256xf32> -> vector<8x256xf32>
    %c1_263 = arith.constant 1 : index
    %c0_264 = arith.constant 0 : index
    %c0_265 = arith.constant 0 : index
    %437 = vector.load %arg12[%c1_263, %c0_264, %c0_265] : memref<2x1x256xf32, #tpu.memory_space<vmem>>, vector<1x1x256xf32>
    %438 = vector.shape_cast %437 : vector<1x1x256xf32> to vector<1x256xf32>
    %439 = vector.broadcast %438 : vector<1x256xf32> to vector<8x256xf32>
    %440 = arith.addf %436, %439 : vector<8x256xf32>
    %cst_266 = arith.constant 0.000000e+00 : f32
    %441 = vector.broadcast %cst_266 : f32 to vector<8x256xf32>
    %442 = arith.maximumf %440, %441 : vector<8x256xf32>
    %443 = arith.truncf %442 : vector<8x256xf32> to vector<8x256xbf16>
    %c1_267 = arith.constant 1 : index
    %c0_268 = arith.constant 0 : index
    %c0_269 = arith.constant 0 : index
    %444 = vector.load %arg13[%c1_267, %c0_268, %c0_269] : memref<2x256x64xbf16, #tpu.memory_space<vmem>>, vector<1x256x64xbf16>
    %445 = vector.shape_cast %444 : vector<1x256x64xbf16> to vector<256x64xbf16>
    %cst_270 = arith.constant dense<0.000000e+00> : vector<8x64xf32>
    %446 = tpu.matmul %443, %445, %cst_270 {dimension_numbers = #tpu.dot_dimension_numbers<[1], [0], [0], [1], [0, 0, 1, 1], [], []>} : vector<8x256xbf16>, vector<256x64xbf16>, vector<8x64xf32> -> vector<8x64xf32>
    %447 = arith.addf %406, %446 : vector<8x64xf32>
    %c1_271 = arith.constant 1 : index
    %c0_272 = arith.constant 0 : index
    %c0_273 = arith.constant 0 : index
    %448 = vector.load %arg14[%c1_271, %c0_272, %c0_273] : memref<2x1x64xf32, #tpu.memory_space<vmem>>, vector<1x1x64xf32>
    %449 = vector.shape_cast %448 : vector<1x1x64xf32> to vector<1x64xf32>
    %450 = vector.broadcast %449 : vector<1x64xf32> to vector<8x64xf32>
    %451 = arith.addf %447, %450 : vector<8x64xf32>
    %c0_274 = arith.constant 0 : index
    %c0_275 = arith.constant 0 : index
    %452 = vector.load %arg15[%c0_274, %c0_275] : memref<1x64xf32, #tpu.memory_space<vmem>>, vector<1x64xf32>
    %c0_276 = arith.constant 0 : index
    %c0_277 = arith.constant 0 : index
    %453 = vector.load %arg16[%c0_276, %c0_277] : memref<1x64xf32, #tpu.memory_space<vmem>>, vector<1x64xf32>
    %cst_278 = arith.constant dense<0.000000e+00> : vector<8xf32>
    %454 = vector.multi_reduction <add>, %451, %cst_278 [1] : vector<8x64xf32> to vector<8xf32>
    %455 = vector.shape_cast %454 : vector<8xf32> to vector<8x1xf32>
    %cst_279 = arith.constant 6.400000e+01 : f32
    %456 = vector.broadcast %cst_279 : f32 to vector<8x1xf32>
    %457 = arith.divf %455, %456 : vector<8x1xf32>
    %458 = vector.broadcast %457 : vector<8x1xf32> to vector<8x64xf32>
    %459 = arith.subf %451, %458 : vector<8x64xf32>
    %460 = arith.mulf %459, %459 : vector<8x64xf32>
    %cst_280 = arith.constant dense<0.000000e+00> : vector<8xf32>
    %461 = vector.multi_reduction <add>, %460, %cst_280 [1] : vector<8x64xf32> to vector<8xf32>
    %462 = vector.shape_cast %461 : vector<8xf32> to vector<8x1xf32>
    %cst_281 = arith.constant 6.400000e+01 : f32
    %463 = vector.broadcast %cst_281 : f32 to vector<8x1xf32>
    %464 = arith.divf %462, %463 : vector<8x1xf32>
    %465 = vector.broadcast %457 : vector<8x1xf32> to vector<8x64xf32>
    %466 = arith.subf %451, %465 : vector<8x64xf32>
    %cst_282 = arith.constant 9.99999974E-6 : f32
    %467 = vector.broadcast %cst_282 : f32 to vector<8x1xf32>
    %468 = arith.addf %464, %467 : vector<8x1xf32>
    %469 = math.rsqrt %468 : vector<8x1xf32>
    %470 = vector.broadcast %469 : vector<8x1xf32> to vector<8x64xf32>
    %471 = arith.mulf %466, %470 : vector<8x64xf32>
    %472 = vector.broadcast %452 : vector<1x64xf32> to vector<8x64xf32>
    %473 = arith.mulf %471, %472 : vector<8x64xf32>
    %474 = vector.broadcast %453 : vector<1x64xf32> to vector<8x64xf32>
    %475 = arith.addf %473, %474 : vector<8x64xf32>
    %476 = arith.truncf %475 : vector<8x64xf32> to vector<8x64xbf16>
    %c0_283 = arith.constant 0 : index
    %c0_284 = arith.constant 0 : index
    %477 = vector.load %arg17[%c0_283, %c0_284] : memref<64x128xbf16, #tpu.memory_space<vmem>>, vector<64x128xbf16>
    %cst_285 = arith.constant dense<0.000000e+00> : vector<8x128xf32>
    %478 = tpu.matmul %476, %477, %cst_285 {dimension_numbers = #tpu.dot_dimension_numbers<[1], [0], [0], [1], [0, 0, 1, 1], [], []>} : vector<8x64xbf16>, vector<64x128xbf16>, vector<8x128xf32> -> vector<8x128xf32>
    %c0_286 = arith.constant 0 : index
    %c0_287 = arith.constant 0 : index
    %479 = vector.load %arg18[%c0_286, %c0_287] : memref<1x128xf32, #tpu.memory_space<vmem>>, vector<1x128xf32>
    %480 = vector.broadcast %479 : vector<1x128xf32> to vector<8x128xf32>
    %481 = arith.addf %478, %480 : vector<8x128xf32>
    %482 = vector.shape_cast %481 : vector<8x128xf32> to vector<1x8x128xf32>
    %483 = arith.truncf %482 : vector<1x8x128xf32> to vector<1x8x128xbf16>
    %c0_288 = arith.constant 0 : index
    %c0_289 = arith.constant 0 : index
    %c0_290 = arith.constant 0 : index
    %484 = vector.load %arg19[%c0_288, %c0_289, %c0_290] : memref<1x8x128xbf16, #tpu.memory_space<vmem>>, vector<1x8x128xbf16>
    tpu.vector_store %arg19[%c0_288, %c0_289, %c0_290], %483 {strides = array<i32>} : memref<1x8x128xbf16, #tpu.memory_space<vmem>>, vector<1x8x128xbf16>,
    return
  }
  func.func @transform_0(%arg0: i32) -> (i32, i32, i32) {
    %c0_i32 = arith.constant 0 : i32
    %c0_i32_0 = arith.constant 0 : i32
    %c0_i32_1 = arith.constant 0 : i32
    return %arg0, %c0_i32, %c0_i32_0 : i32, i32, i32
  }
  func.func @transform_1(%arg0: i32) -> (i32, i32, i32) {
    %c0_i32 = arith.constant 0 : i32
    %c0_i32_0 = arith.constant 0 : i32
    %c0_i32_1 = arith.constant 0 : i32
    %c0_i32_2 = arith.constant 0 : i32
    return %c0_i32, %c0_i32_0, %c0_i32_1 : i32, i32, i32
  }
  func.func @transform_2(%arg0: i32) -> (i32, i32, i32) {
    %c0_i32 = arith.constant 0 : i32
    %c0_i32_0 = arith.constant 0 : i32
    %c0_i32_1 = arith.constant 0 : i32
    %c0_i32_2 = arith.constant 0 : i32
    return %c0_i32, %c0_i32_0, %c0_i32_1 : i32, i32, i32
  }
  func.func @transform_3(%arg0: i32) -> (i32, i32, i32, i32) {
    %c0_i32 = arith.constant 0 : i32
    %c0_i32_0 = arith.constant 0 : i32
    %c0_i32_1 = arith.constant 0 : i32
    %c0_i32_2 = arith.constant 0 : i32
    %c0_i32_3 = arith.constant 0 : i32
    return %c0_i32, %c0_i32_0, %c0_i32_1, %c0_i32_2 : i32, i32, i32, i32
  }
  func.func @transform_4(%arg0: i32) -> (i32, i32, i32, i32) {
    %c0_i32 = arith.constant 0 : i32
    %c0_i32_0 = arith.constant 0 : i32
    %c0_i32_1 = arith.constant 0 : i32
    %c0_i32_2 = arith.constant 0 : i32
    %c0_i32_3 = arith.constant 0 : i32
    return %c0_i32, %c0_i32_0, %c0_i32_1, %c0_i32_2 : i32, i32, i32, i32
  }
  func.func @transform_5(%arg0: i32) -> (i32, i32, i32, i32) {
    %c0_i32 = arith.constant 0 : i32
    %c0_i32_0 = arith.constant 0 : i32
    %c0_i32_1 = arith.constant 0 : i32
    %c0_i32_2 = arith.constant 0 : i32
    %c0_i32_3 = arith.constant 0 : i32
    return %c0_i32, %c0_i32_0, %c0_i32_1, %c0_i32_2 : i32, i32, i32, i32
  }
  func.func @transform_6(%arg0: i32) -> (i32, i32, i32, i32) {
    %c0_i32 = arith.constant 0 : i32
    %c0_i32_0 = arith.constant 0 : i32
    %c0_i32_1 = arith.constant 0 : i32
    %c0_i32_2 = arith.constant 0 : i32
    %c0_i32_3 = arith.constant 0 : i32
    return %c0_i32, %c0_i32_0, %c0_i32_1, %c0_i32_2 : i32, i32, i32, i32
  }
  func.func @transform_7(%arg0: i32) -> (i32, i32, i32) {
    %c0_i32 = arith.constant 0 : i32
    %c0_i32_0 = arith.constant 0 : i32
    %c0_i32_1 = arith.constant 0 : i32
    %c0_i32_2 = arith.constant 0 : i32
    return %c0_i32, %c0_i32_0, %c0_i32_1 : i32, i32, i32
  }
  func.func @transform_8(%arg0: i32) -> (i32, i32, i32) {
    %c0_i32 = arith.constant 0 : i32
    %c0_i32_0 = arith.constant 0 : i32
    %c0_i32_1 = arith.constant 0 : i32
    %c0_i32_2 = arith.constant 0 : i32
    return %c0_i32, %c0_i32_0, %c0_i32_1 : i32, i32, i32
  }
  func.func @transform_9(%arg0: i32) -> (i32, i32, i32) {
    %c0_i32 = arith.constant 0 : i32
    %c0_i32_0 = arith.constant 0 : i32
    %c0_i32_1 = arith.constant 0 : i32
    %c0_i32_2 = arith.constant 0 : i32
    return %c0_i32, %c0_i32_0, %c0_i32_1 : i32, i32, i32
  }
  func.func @transform_10(%arg0: i32) -> (i32, i32, i32) {
    %c0_i32 = arith.constant 0 : i32
    %c0_i32_0 = arith.constant 0 : i32
    %c0_i32_1 = arith.constant 0 : i32
    %c0_i32_2 = arith.constant 0 : i32
    return %c0_i32, %c0_i32_0, %c0_i32_1 : i32, i32, i32
  }
  func.func @transform_11(%arg0: i32) -> (i32, i32, i32) {
    %c0_i32 = arith.constant 0 : i32
    %c0_i32_0 = arith.constant 0 : i32
    %c0_i32_1 = arith.constant 0 : i32
    %c0_i32_2 = arith.constant 0 : i32
    return %c0_i32, %c0_i32_0, %c0_i32_1 : i32, i32, i32
  }
  func.func @transform_12(%arg0: i32) -> (i32, i32, i32) {
    %c0_i32 = arith.constant 0 : i32
    %c0_i32_0 = arith.constant 0 : i32
    %c0_i32_1 = arith.constant 0 : i32
    %c0_i32_2 = arith.constant 0 : i32
    return %c0_i32, %c0_i32_0, %c0_i32_1 : i32, i32, i32
  }
  func.func @transform_13(%arg0: i32) -> (i32, i32, i32) {
    %c0_i32 = arith.constant 0 : i32
    %c0_i32_0 = arith.constant 0 : i32
    %c0_i32_1 = arith.constant 0 : i32
    %c0_i32_2 = arith.constant 0 : i32
    return %c0_i32, %c0_i32_0, %c0_i32_1 : i32, i32, i32
  }
  func.func @transform_14(%arg0: i32) -> (i32, i32) {
    %c0_i32 = arith.constant 0 : i32
    %c0_i32_0 = arith.constant 0 : i32
    %c0_i32_1 = arith.constant 0 : i32
    return %c0_i32, %c0_i32_0 : i32, i32
  }
  func.func @transform_15(%arg0: i32) -> (i32, i32) {
    %c0_i32 = arith.constant 0 : i32
    %c0_i32_0 = arith.constant 0 : i32
    %c0_i32_1 = arith.constant 0 : i32
    return %c0_i32, %c0_i32_0 : i32, i32
  }
  func.func @transform_16(%arg0: i32) -> (i32, i32) {
    %c0_i32 = arith.constant 0 : i32
    %c0_i32_0 = arith.constant 0 : i32
    %c0_i32_1 = arith.constant 0 : i32
    return %c0_i32, %c0_i32_0 : i32, i32
  }
  func.func @transform_17(%arg0: i32) -> (i32, i32) {
    %c0_i32 = arith.constant 0 : i32
    %c0_i32_0 = arith.constant 0 : i32
    %c0_i32_1 = arith.constant 0 : i32
    return %c0_i32, %c0_i32_0 : i32, i32
  }
  func.func @transform_18(%arg0: i32) -> (i32, i32, i32) {
    %c0_i32 = arith.constant 0 : i32
    %c0_i32_0 = arith.constant 0 : i32
    %c0_i32_1 = arith.constant 0 : i32
    return %arg0, %c0_i32, %c0_i32_0 : i32, i32, i32
  }
}

</mosaic_0001>

<bundles_post_ra>
// kernel: tpu_custom_call.1
= control target key start
LH: loop header
LB: loop body
LE: loop exit
PB: predicated region body
PF: predicated region fallthrough
CT: control target
= control target key end

     0   :  { %s5307_s0 = inlined_call_operand.vmem [shape: f32[2,8,64], index: 0, kind: input, shape index: {}]   ;;  %s5308_s1 = inlined_call_operand.vmem [shape: f32[2,1,64], index: 1, kind: input, shape index: {}]   ;;  %s5309_s2 = inlined_call_operand.vmem [shape: f32[2,1,64], index: 2, kind: input, shape index: {}]   ;;  %s5310_s3 = inlined_call_operand.vmem [shape: bf16[2,4,64,16], index: 3, kind: input, shape index: {}]   ;;  %s5311_s4 = inlined_call_operand.vmem [shape: bf16[2,4,64,16], index: 4, kind: input, shape index: {}]   ;;  %s5312_s5 = inlined_call_operand.vmem [shape: bf16[2,4,64,16], index: 5, kind: input, shape index: {}]   ;;  %s5313_s6 = inlined_call_operand.vmem [shape: bf16[2,4,16,64], index: 6, kind: input, shape index: {}]   ;;  %s5314_s7 = inlined_call_operand.vmem [shape: f32[2,1,64], index: 7, kind: input, shape index: {}]   ;;  %s5315_s8 = inlined_call_operand.vmem [shape: f32[2,1,64], index: 8, kind: input, shape index: {}]   ;;  %s5316_s9 = inlined_call_operand.vmem [shape: f32[2,1,64], index: 9, kind: input, shape index: {}]   ;;  %s5317_s10 = inlined_call_operand.vmem [shape: bf16[2,64,256], index: 10, kind: input, shape index: {}]   ;;  %s5318_s11 = inlined_call_operand.vmem [shape: f32[2,1,256], index: 11, kind: input, shape index: {}]   ;;  %s5319_s12 = inlined_call_operand.vmem [shape: bf16[2,256,64], index: 12, kind: input, shape index: {}]   ;;  %s5320_s13 = inlined_call_operand.vmem [shape: f32[2,1,64], index: 13, kind: input, shape index: {}]   ;;  %s5321_s14 = inlined_call_operand.vmem [shape: f32[1,64], index: 14, kind: input, shape index: {}]   ;;  %s5322_s15 = inlined_call_operand.vmem [shape: f32[1,64], index: 15, kind: input, shape index: {}]   ;;  %s5323_s16 = inlined_call_operand.vmem [shape: bf16[64,128], index: 16, kind: input, shape index: {}]   ;;  %s5324_s17 = inlined_call_operand.vmem [shape: f32[1,128], index: 17, kind: input, shape index: {}]   ;;  %s5325_s18 = inlined_call_operand.hbm [shape: bf16[2,8,128], index: 18, kind: output, shape index: {}]  }
   0x1   :  { %5334 = sst [smem:[#allocation11_spill]] %s5307_s0 }
   0x2   :  { %5335 = sst [smem:[#allocation12_spill]] %s5308_s1 }
   0x3   :  { %5336 = sst [smem:[#allocation13_spill]] %s5309_s2 }
   0x4   :  { %5337 = sst [smem:[#allocation14_spill]] %s5310_s3 }
   0x5   :  { %5338 = sst [smem:[#allocation15_spill]] %s5311_s4 }
   0x6   :  { %5339 = sst [smem:[#allocation16_spill]] %s5312_s5 }
   0x7   :  { %23 = vsyncpa [#allocation3], 0 }
   0x8   :  { %25 = vsyncpa [#allocation3 + $0x1], 0  ;;  %s4474_s27 = smov 0   ;;  %s4476_s28 = smov 0  }
   0x9   :  { %s4478_s29 = smov 0   ;;  %s4480_s30 = smov 0  }
   0xa LB: > { %5340 = sst [smem:[#allocation5_spill]] %s4363_s27  ;;  %s4495_s0 = sadd.s32 4294967295, %s4375_s30   ;;  %s4375_s30 = sphi %s4480_s30, %s5357_s30   ;;  %s4371_s29 = sphi %s4478_s29, %s5359_s29   ;;  %s4367_s28 = sphi %s4476_s28, %s5361_s28   ;;  %s4363_s27 = sphi %s4474_s27, %s5360_s27  }
   0xb   : > { %5341 = sst [smem:[#allocation6_spill]] %s4371_s29  ;;  %s3141_s19 = sadd.s32 4294967294, %s4375_s30  }
   0xc   : > { %5342 = sst [smem:[#allocation7_spill]] %s4375_s30  ;;  %s4499_s1 = sadd.s32 1, %s4375_s30  }
   0xd   : > { %5343 = sst [smem:[#allocation8_spill]] %s4499_s1  ;;  %s421_s20 = sadd.s32 1, %s4371_s29 }
   0xe   : > { %s418_s21 = ssub.s32 %s4375_s30, %s4499_s1  ;;  %p431_p0 = scmp.ne.s32.totalorder %s4371_s29, %s4367_s28 }
   0xf   : > { %p419_p1 = scmp.eq.s32.totalorder %s418_s21, 0  ;;  %p432_p2 = scmp.eq.s32.totalorder %s4495_s0, 1 }
  0x10   : > { %p437_p3 = scmp.ne.s32.totalorder %s4367_s28, %s4363_s27  ;;  %p438_p4 = scmp.eq.s32.totalorder %s3141_s19, 1 }
  0x11   : > { %s4510_s22 = scalar_select %p419_p1, %s4371_s29, %s421_s20  }
  0x12   : > { %p4512_p5 = por %p432_p2, %p431_p0  ;;  %p4516_p6 = por %p438_p4, %p437_p3 }
  0x13   : > { %5344 = sst [smem:[#allocation9_spill]] %s4510_s22  ;;  %p3144_p7 = scmp.ge.s32.totalorder %s4375_s30, 1 }
  0x14   : > { %s5346_s23 = scalar_select %p4516_p6, 1, 0 }
  0x15   : > { %p514_p8 = scmp.lt.s32.totalorder %s4375_s30, 3 }
  0x16   : > { %5347 = sst [smem:[#allocation10_spill]] %s5346_s23 }
  0x17   : > { %p515_p9 = pnand %p3144_p7, %p514_p8 }
  0x18   : > { %p567_p10 = scmp.lt.s32.totalorder (!%p515_p9), %s4495_s0, 1  ;;  %s5348_s20 = sld [smem:[#allocation11_spill]] (!%p515_p9) }
  0x19   : > { %518 = sbr.rel (%p515_p9) target bundleno = 6723 (0x1a43), region = 92  ;;  %s5349_s3 = sld [smem:[#allocation14_spill]] (!%p515_p9) }
  0x1a   : > { %s5350_s4 = sld [smem:[#allocation15_spill]] (!%p515_p9)  ;;  %s4054_s26 = sshll.u32 (!%p515_p9), %s4495_s0, 2 }
  0x1b   : > { %s5351_s5 = sld [smem:[#allocation16_spill]] (!%p515_p9)  ;;  %s3077_s30 = scalar_lea.hbm (!%p515_p9), %s5325_s18, %s4054_s26 }
  0x1c   : > { %s5353_s22 = sld [smem:[#allocation13_spill]] (!%p515_p9)  ;;  %s4333_s26 = scalar_lea.hbm (!%p515_p9), %s5325_s18, 8 }
  0x1e   : > { %s568_s24 = scalar_select %p567_p10, %s4495_s0, 1  ;;  %vm581_vm0 = vcmask 523264   ;;  %v4377_v2 = vmov 64.0   ;;  %vm761_vm5 = vcmask 130048   ;;  %vm797_vm6 = vcmask 1043456  }
  0x1f   : > { %4269 = vrcp.f32 %v4377_v2  ;;  %v4060_v14 = vld [vmem:[%s5349_s3 + $0x18] sm:$0xff]  ;;  %v4059_v16 = vld [vmem:[%s5349_s3 + $0x10] sm:$0xff]  ;;  %v4058_v18 = vld [vmem:[%s5349_s3 + $0x8] sm:$0xff]  ;;  %vm781_vm8 = vcmask 64512  }
  0x20   : > { %s3146_s25 = sshll.u32 %s568_s24, 3  ;;  %v4064_v15 = vld [vmem:[%s5350_s4 + $0x18] sm:$0xff]  ;;  %659 = vmatpush.bf16.msra.mxu2 %v4060_v14  ;;  %v4063_v17 = vld [vmem:[%s5350_s4 + $0x10] sm:$0xff]  ;;  %v4062_v19 = vld [vmem:[%s5350_s4 + $0x8] sm:$0xff]  ;;  %s564_s24 = sand.u32 1, %s4367_s28  }
  0x21   : > { %s570_s21 = scalar_lea.vmem %s5348_s20, %s3146_s25  ;;  %705 = vmatpush.bf16.msra.mxu1 %v4064_v15  ;;  %v4057_v20 = vld [vmem:[%s5349_s3] sm:$0xff]  ;;  %v4068_v22 = vld [vmem:[%s5351_s5 + $0x18] sm:$0xff]  ;;  %v4067_v25 = vld [vmem:[%s5351_s5 + $0x10] sm:$0xff]  ;;  %s5352_s20 = sld [smem:[#allocation12_spill]] }
  0x22   : > { %v4527_v0 = vld [vmem:[%s570_s21] sm:$0xff]  ;;  %v4077_v23 = vld [vmem:[%s5350_s4 + $0x38] sm:$0xff]  ;;  %v4076_v26 = vld [vmem:[%s5350_s4 + $0x30] sm:$0xff]  ;;  %s3145_s25 = sshll.u32 %s564_s24, 2 }
  0x23   : > { %v582_v1 = vsel %vm581_vm0, %v4527_v0, 0.0  ;;  %v4061_v21 = vld [vmem:[%s5350_s4] sm:$0xff]  ;;  %v4066_v29 = vld [vmem:[%s5351_s5 + $0x8] sm:$0xff]  ;;  %v4081_v45 = vld [vmem:[%s5351_s5 + $0x38] sm:$0xff]  ;;  %s566_s1 = scalar_lea.vmem [#allocation2], %s3145_s25 }
  0x24   : > { %583 = vadd.xlane.f32.xlu0 %v582_v1  ;;  %660 = vmatpush.bf16.msra.mxu2 %v4059_v16  ;;  %v4075_v30 = vld [vmem:[%s5350_s4 + $0x28] sm:$0xff]  ;;  %v4065_v31 = vld [vmem:[%s5351_s5] sm:$0xff]  ;;  %v4080_v47 = vld [vmem:[%s5351_s5 + $0x30] sm:$0xff]  ;;  %s3079_s23 = sshll.u32 %s566_s1, 4  ;;  %s3080_s23 = int_to_ptr.vmem [resolvable:$true] %s3079_s23 }
  0x25   : > { %v4270_v3 = vpop.eup %4269  ;;  %706 = vmatpush.bf16.msra.mxu1 %v4063_v17  ;;  %v4074_v32 = vld [vmem:[%s5350_s4 + $0x20] sm:$0xff]  ;;  %v4079_v48 = vld [vmem:[%s5351_s5 + $0x28] sm:$0xff]  ;;  %v4073_v14 = vld [vmem:[%s5349_s3 + $0x38] sm:$0xff] }
  0x26   : > { %v586_v4 = vmul.f32 64.0, %v4270_v3  ;;  %vm590_vm1 = vweird.f32 %v4270_v3  ;;  %v4255_v41 = vld [vmem:[%s5353_s22] ss:$0 sm:$0xff] }
  0x27   : > { %v4254_v39 = vld [vmem:[%s5352_s20] ss:$0 sm:$0xff] }
  0x28   : > { %v587_v5 = vsub.f32 1.0, %v586_v4  ;;  %661 = vmatpush.bf16.msra.mxu2 %v4058_v18  ;;  %v4078_v49 = vld [vmem:[%s5351_s5 + $0x20] sm:$0xff]  ;;  %v573_v4 = vlaneseq }
  0x29   : > { %707 = vmatpush.bf16.msra.mxu1 %v4062_v19 }
  0x2a   : > { %v588_v6 = vmul.f32 %v4270_v3, %v587_v5  ;;  %v574_v5 = vshrl.u32 %v573_v4, 7 }
  0x2c   : > { %v589_v7 = vadd.f32 %v4270_v3, %v588_v6  ;;  %662 = vmatpush.bf16.msra.mxu2 %v4057_v20  ;;  %v576_v6 = vand.u32 127, %v573_v4  ;;  %v4072_v20 = vld [vmem:[%s5349_s3 + $0x30] sm:$0xff] }
  0x2d   : > { %708 = vmatpush.bf16.msra.mxu1 %v4061_v21  ;;  %v4071_v21 = vld [vmem:[%s5349_s3 + $0x28] sm:$0xff] }
  0x2e   : > { %v4531_v8 = vsel %vm590_vm1, %v4270_v3, %v589_v7  ;;  %vm577_vm7 = vcmp.le.s32.totalorder %v576_v6, %v574_v5  ;;  %v4378_v7 = vmov -1e+30   ;;  %v4099_v5 = vld [vmem:[%s5349_s3 + $0x78] sm:$0xff] }
  0x30   : > { %751 = vmatpush.bf16.msrb.mxu2 %v4068_v22  ;;  %v4070_v22 = vld [vmem:[%s5349_s3 + $0x20] sm:$0xff] }
  0x31   : > { %901 = vmatpush.bf16.msrb.mxu1 %v4077_v23 }
  0x34   : > { %752 = vmatpush.bf16.msrb.mxu2 %v4067_v25 }
  0x35   : > { %902 = vmatpush.bf16.msrb.mxu1 %v4076_v26 }
  0x38   : > { %753 = vmatpush.bf16.msrb.mxu2 %v4066_v29  ;;  %v4069_v29 = vld [vmem:[%s5313_s6] sm:$0xff] }
  0x39   : > { %903 = vmatpush.bf16.msrb.mxu1 %v4075_v30  ;;  %v4086_v30 = vld [vmem:[%s5349_s3 + $0x58] sm:$0xff] }
  0x3c   : > { %754 = vmatpush.bf16.msrb.mxu2 %v4065_v31  ;;  %v4085_v31 = vld [vmem:[%s5349_s3 + $0x50] sm:$0xff] }
  0x3d   : > { %904 = vmatpush.bf16.msrb.mxu1 %v4074_v32  ;;  %v4084_v32 = vld [vmem:[%s5349_s3 + $0x48] sm:$0xff] }
  0x97   : > { %v584_v9 = vpop.xlane.xlu0 %583 }
  0x98   : > { %v592_v10 = vmul.f32 %v4531_v8, %v584_v9  ;;  %v4619_v9 = vsel %vm577_vm7, 0.0, %v4378_v7  ;;  %v4098_v7 = vld [vmem:[%s5349_s3 + $0x70] sm:$0xff] }
  0x9a   : > { %v593_v11 = vsub.f32 %v4527_v0, %v592_v10 }
  0x9c   : > { %v594_v12 = vmul.f32 %v593_v11, %v593_v11 }
  0x9e   : > { %v595_v13 = vsel %vm581_vm0, %v594_v12, 0.0 }
  0x9f   : > { %596 = vadd.xlane.f32.xlu0 %v595_v13 }
 0x112   : > { %v597_v24 = vpop.xlane.xlu0 %596 }
 0x113   : > { %v598_v27 = vmul.f32 %v597_v24, %v4531_v8 }
 0x115   : > { %v599_v28 = vadd.f32 1e-05, %v598_v27 }
 0x117   : > { %4271 = vrsqrt.f32 %v599_v28  ;;  %vm606_vm3 = vweird.f32 %v599_v28 }
 0x11d   : > { %v4272_v33 = vpop.eup %4271 }
 0x11e   : > { %v601_v34 = vmul.f32 %v4272_v33, %v599_v28  ;;  %vm607_vm2 = vweird.f32 %v4272_v33 }
 0x11f   : > { %vm608_vm4 = vmor %vm606_vm3, %vm607_vm2 }
 0x120   : > { %v602_v35 = vmul.f32 %v4272_v33, %v601_v34 }
 0x122   : > { %v603_v36 = vmul.f32 0.5, %v602_v35 }
 0x124   : > { %v604_v37 = vsub.f32 1.5, %v603_v36 }
 0x126   : > { %v605_v38 = vmul.f32 %v4272_v33, %v604_v37 }
 0x128   : > { %v609_v40 = vsel %vm608_vm4, %v4272_v33, %v605_v38  ;;  %v4083_v33 = vld [vmem:[%s5349_s3 + $0x40] sm:$0xff] }
 0x129   : > { %v610_v42 = vmul.f32 %v609_v40, %v593_v11 }
 0x12b   : > { %v614_v43 = vmul.f32 %v4254_v39, %v610_v42 }
 0x12d   : > { %v618_v44 = vadd.f32 %v4255_v41, %v614_v43 }
 0x12f   : > { %v4594_v46 = vpack.c.bf16 %v618_v44, %v618_v44 }
 0x131   : > { %3163 = vmatmul.msk.bf16.vlgmr.msra.gmra.mxu2 %vm581_vm0, %v4594_v46  ;;  %3180 = vmatmul.msk.bf16.vlgmr.msra.gmra.mxu1 %vm581_vm0, %v4594_v46 }
 0x132   : > { %948 = vmatpush.bf16.msra.mxu2 %v4081_v45 }
 0x136   : > { %949 = vmatpush.bf16.msra.mxu2 %v4080_v47 }
 0x13a   : > { %950 = vmatpush.bf16.msra.mxu2 %v4079_v48 }
 0x13e   : > { %951 = vmatpush.bf16.msra.mxu2 %v4078_v49 }
 0x141   : > { %3197 = vmatmul.msk.bf16.vlgmr.msrb.gmra.mxu2 %vm581_vm0, %v4594_v46  ;;  %3249 = vmatmul.msk.bf16.vlgmr.msrb.gmra.mxu1 %vm581_vm0, %v4594_v46 }
 0x142   : > { %1050 = vmatpush.bf16.msrb.mxu2 %v4069_v29 }
 0x151   : > { %3274 = vmatmul.msk.bf16.vlgmr.msra.gmra.mxu2 %vm581_vm0, %v4594_v46 }
 0x1ae   : > { %v710_v50 = vpop.f32.mrf.mxu1 }
 0x1af   : > { %v714_v51 = vpack.c.bf16 %v710_v50, %v710_v50 }
 0x1b1   : > { %v766_v52 = vsel %vm761_vm5, %v714_v51, 0 }
 0x1b2   : > { %775 = vmatpush.bf16.xpose.msra.mxu3 %v766_v52 }
 0x1b4   : > { %v664_v53 = vpop.f32.mrf.mxu2 }
 0x1b5   : > { %v668_v55 = vpack.c.bf16 %v664_v53, %v664_v53 }
 0x1b6   : > { %v712_v54 = vpop.f32.mrf.mxu1 }
 0x1b7   : > { %v4090_v54 = vld [vmem:[%s5350_s4 + $0x58] sm:$0xff] }
 0x1b9   : > { %3198 = vmatmul.msk.bf16.vlgmr.msra.gmra.mxu3 %vm761_vm5, %v668_v55  ;;  %v4089_v55 = vld [vmem:[%s5350_s4 + $0x50] sm:$0xff] }
 0x1bc   : > { %v666_v56 = vpop.f32.mrf.mxu2 }
 0x1bd   : > { %v4088_v56 = vld [vmem:[%s5350_s4 + $0x48] sm:$0xff] }
 0x1be   : > { %v906_v57 = vpop.f32.mrf.mxu1 }
 0x1bf   : > { %v910_v58 = vpack.c.bf16 %v906_v57, %v906_v57  ;;  %v4087_v57 = vld [vmem:[%s5350_s4 + $0x40] sm:$0xff] }
 0x1c1   : > { %v962_v59 = vsel %vm761_vm5, %v910_v58, 0 }
 0x1c2   : > { %971 = vmatpush.bf16.xpose.msrb.mxu3 %v962_v59 }
 0x1c4   : > { %v756_v60 = vpop.f32.mrf.mxu2 }
 0x1c5   : > { %v760_v61 = vpack.c.bf16 %v756_v60, %v756_v60 }
 0x1c6   : > { %v908_v62 = vpop.f32.mrf.mxu1 }
 0x1c7   : > { %v799_v63 = vsel %vm797_vm6, %v760_v61, 0  ;;  %v4082_v62 = vld [vmem:[%s5313_s6 + $0x8] sm:$0xff] }
 0x1c8   : > { %808 = vmatpush.bf16.msra.mxu0 %v799_v63  ;;  %1028 = vmatpush.bf16.msra.mxu1 %v4082_v62  ;;  %v4094_v63 = vld [vmem:[%s5351_s5 + $0x58] sm:$0xff] }
 0x1ca   : > { %1093 = vmatpush.bf16.msra.mxu3 %v4086_v30 }
 0x1cc   : > { %v758_v1 = vpop.f32.mrf.mxu2  ;;  %854 = vmatpush.bf16.msrb.mxu0 %v4073_v14  ;;  %1187 = vmatpush.bf16.msrb.mxu1 %v4094_v63 }
 0x1cd   : > { %v4093_v1 = vld [vmem:[%s5351_s5 + $0x50] sm:$0xff] }
 0x1ce   : > { %1094 = vmatpush.bf16.msra.mxu3 %v4085_v31 }
 0x1d0   : > { %855 = vmatpush.bf16.msrb.mxu0 %v4072_v20  ;;  %1188 = vmatpush.bf16.msrb.mxu1 %v4093_v1  ;;  %v4101_v20 = vld [vmem:[%s5350_s4 + $0x68] sm:$0xff] }
 0x1d2   : > { %1095 = vmatpush.bf16.msra.mxu3 %v4084_v32 }
 0x1d4   : > { %v953_v2 = vpop.f32.mrf.mxu2  ;;  %856 = vmatpush.bf16.msrb.mxu0 %v4071_v21  ;;  %v4100_v21 = vld [vmem:[%s5350_s4 + $0x60] sm:$0xff] }
 0x1d5   : > { %v957_v25 = vpack.c.bf16 %v953_v2, %v953_v2  ;;  %v4092_v2 = vld [vmem:[%s5351_s5 + $0x48] sm:$0xff] }
 0x1d6   : > { %1096 = vmatpush.bf16.msra.mxu3 %v4083_v33  ;;  %1189 = vmatpush.bf16.msrb.mxu1 %v4092_v2 }
 0x1d7   : > { %v993_v28 = vsel %vm797_vm6, %v957_v25, 0  ;;  %v4095_v25 = vld [vmem:[%s5313_s6 + $0x10] sm:$0xff] }
 0x1d8   : > { %857 = vmatpush.bf16.msrb.mxu0 %v4070_v22 }
 0x1dc   : > { %v955_v3 = vpop.f32.mrf.mxu2 }
 0x1dd   : > { %v4091_v3 = vld [vmem:[%s5351_s5 + $0x40] sm:$0xff] }
 0x1de   : > { %1190 = vmatpush.bf16.msrb.mxu1 %v4091_v3 }
 0x23c   : > { %v777_v10 = vpop.f32.mrf.mxu3 }
 0x23d   : > { %v778_v11 = vadd.f32 %v777_v10, %v4619_v9 }
 0x23f   : > { %v782_v12 = vsel %vm781_vm8, %v778_v11, -inf }
 0x240   : > { %783 = vmax.xlane.f32.xlu1 %v782_v12  ;;  %v4096_v12 = vld [vmem:[%s5349_s3 + $0x60] sm:$0xff] }
 0x244   : > { %v779_v13 = vpop.f32.mrf.mxu3 }
 0x2b3   : > { %v784_v15 = vpop.xlane.xlu1 %783 }
 0x2b4   : > { %v785_v16 = vsub.f32 %v778_v11, %v784_v15  ;;  %v4097_v11 = vld [vmem:[%s5349_s3 + $0x68] sm:$0xff]  ;;  %v4103_v15 = vld [vmem:[%s5350_s4 + $0x78] sm:$0xff] }
 0x2b6   : > { %v786_v17 = vmul.f32 1.442695, %v785_v16 }
 0x2b8   : > { %4273 = vpow2.f32 %v786_v17  ;;  %v4102_v17 = vld [vmem:[%s5350_s4 + $0x70] sm:$0xff] }
 0x2be   : > { %v4274_v18 = vpop.eup %4273 }
 0x2bf   : > { %v788_v19 = vsel %vm781_vm8, %v4274_v18, 0.0 }
 0x2c0   : > { %789 = vadd.xlane.f32.xlu1 %v788_v19 }
 0x333   : > { %v790_v23 = vpop.xlane.xlu1 %789 }
 0x334   : > { %4275 = vrcp.f32 %v790_v23 }
 0x33a   : > { %v4276_v24 = vpop.eup %4275 }
 0x33b   : > { %v792_v26 = vmul.f32 %v4276_v24, %v4274_v18 }
 0x33d   : > { %v793_v27 = vpack.c.bf16 %v792_v26, %v792_v26 }
 0x33f   : > { %3199 = vmatmul.msk.bf16.vlgmr.msra.gmra.mxu0 %vm781_vm8, %v793_v27 }
 0x340   : > { %1002 = vmatpush.bf16.msra.mxu0 %v993_v28 }
 0x34f   : > { %3224 = vmatmul.msk.bf16.vlgmr.msrb.gmra.mxu0 %vm581_vm0, %v4594_v46 }
 0x350   : > { %1140 = vmatpush.bf16.msrb.mxu0 %v4090_v54 }
 0x354   : > { %1141 = vmatpush.bf16.msrb.mxu0 %v4089_v55 }
 0x358   : > { %1142 = vmatpush.bf16.msrb.mxu0 %v4088_v56 }
 0x35c   : > { %1143 = vmatpush.bf16.msrb.mxu0 %v4087_v57 }
 0x3bc   : > { %v810_v34 = vpop.f32.mrf.mxu0 }
 0x3bd   : > { %v814_v35 = vpack.c.bf16 %v810_v34, %v810_v34 }
 0x3bf   : > { %3288 = vmatmul.msk.bf16.vlgmr.msrb.gmra.mxu2 %vm761_vm5, %v814_v35 }
 0x3c4   : > { %v812_v36 = vpop.f32.mrf.mxu0 }
 0x3cc   : > { %v859_v37 = vpop.f32.mrf.mxu0 }
 0x3cd   : > { %v863_v38 = vpack.c.bf16 %v859_v37, %v859_v37 }
 0x3cf   : > { %3275 = vmatmul.msk.bf16.vlgmr.msrb.gmra.mxu3 %vm761_vm5, %v863_v38 }
 0x3d4   : > { %v861_v39 = vpop.f32.mrf.mxu0 }
 0x3df   : > { %3313 = vmatmul.msk.bf16.vlgmr.msra.gmra.mxu3 %vm581_vm0, %v4594_v46 }
 0x442   : > { %v4659_v40 = vpop.f32.mrf.mxu2 }
 0x44a   : > { %v1054_v41 = vpop.f32.mrf.mxu2 }
 0x452   : > { %v973_v42 = vpop.f32.mrf.mxu3 }
 0x453   : > { %v974_v43 = vadd.f32 %v973_v42, %v4619_v9 }
 0x455   : > { %v977_v44 = vsel %vm781_vm8, %v974_v43, -inf }
 0x456   : > { %978 = vmax.xlane.f32.xlu2 %v977_v44 }
 0x45a   : > { %v975_v45 = vpop.f32.mrf.mxu3 }
 0x45b   : > { %v4107_v45 = vld [vmem:[%s5351_s5 + $0x78] sm:$0xff] }
 0x462   : > { %v1098_v47 = vpop.f32.mrf.mxu3 }
 0x463   : > { %v1102_v19 = vpack.c.bf16 %v1098_v47, %v1098_v47  ;;  %v4106_v47 = vld [vmem:[%s5351_s5 + $0x70] sm:$0xff] }
 0x46a   : > { %v1100_v48 = vpop.f32.mrf.mxu3 }
 0x46b   : > { %v4105_v48 = vld [vmem:[%s5351_s5 + $0x68] sm:$0xff] }
 0x4c9   : > { %v979_v49 = vpop.xlane.xlu2 %978 }
 0x4ca   : > { %v980_v50 = vsub.f32 %v974_v43, %v979_v49  ;;  %v4104_v49 = vld [vmem:[%s5351_s5 + $0x60] sm:$0xff] }
 0x4cc   : > { %v981_v51 = vmul.f32 1.442695, %v980_v50 }
 0x4ce   : > { %4277 = vpow2.f32 %v981_v51 }
 0x4d4   : > { %v4278_v52 = vpop.eup %4277 }
 0x4d5   : > { %v983_v53 = vsel %vm781_vm8, %v4278_v52, 0.0 }
 0x4d6   : > { %984 = vadd.xlane.f32.xlu2 %v983_v53 }
 0x549   : > { %v985_v58 = vpop.xlane.xlu2 %984 }
 0x54a   : > { %4279 = vrcp.f32 %v985_v58 }
 0x550   : > { %v4280_v59 = vpop.eup %4279 }
 0x551   : > { %v987_v60 = vmul.f32 %v4280_v59, %v4278_v52 }
 0x553   : > { %v988_v61 = vpack.c.bf16 %v987_v60, %v987_v60 }
 0x555   : > { %3276 = vmatmul.msk.bf16.vlgmr.msra.gmra.mxu0 %vm781_vm8, %v988_v61 }
 0x556   : > { %1267 = vmatpush.bf16.msra.mxu0 %v4095_v25 }
 0x565   : > { %3338 = vmatmul.msk.bf16.vlgmr.msrb.gmra.mxu0 %vm581_vm0, %v4594_v46 }
 0x5d2   : > { %v1004_v4 = vpop.f32.mrf.mxu0 }
 0x5d3   : > { %v1008_v6 = vpack.c.bf16 %v1004_v4, %v1004_v4 }
 0x5d5   : > { %3283 = vmatmul.msk.bf16.vlgmr.msra.gmra.mxu1 %vm761_vm5, %v1008_v6 }
 0x5d6   : > { %1311 = vmatpush.bf16.msra.mxu1 %v4099_v5 }
 0x5da   : > { %v1006_v10 = vpop.f32.mrf.mxu0  ;;  %1312 = vmatpush.bf16.msra.mxu1 %v4098_v7 }
 0x5de   : > { %1313 = vmatpush.bf16.msra.mxu1 %v4097_v11 }
 0x5e2   : > { %v1145_v13 = vpop.f32.mrf.mxu0  ;;  %1314 = vmatpush.bf16.msra.mxu1 %v4096_v12 }
 0x5e3   : > { %v1149_v14 = vpack.c.bf16 %v1145_v13, %v1145_v13 }
 0x5e5   : > { %v1201_v16 = vsel %vm761_vm5, %v1149_v14, 0  ;;  %3363 = vmatmul.msk.bf16.vlgmr.msrb.gmra.mxu1 %vm581_vm0, %v4594_v46 }
 0x5e6   : > { %1210 = vmatpush.bf16.xpose.msra.mxu2 %v1201_v16 }
 0x5ea   : > { %v1147_v18 = vpop.f32.mrf.mxu0 }
 0x5ed   : > { %3364 = vmatmul.msk.bf16.vlgmr.msra.gmra.mxu2 %vm761_vm5, %v1102_v19 }
 0x5ee   : > { %1358 = vmatpush.bf16.msrb.mxu2 %v4103_v15 }
 0x5f2   : > { %1359 = vmatpush.bf16.msrb.mxu2 %v4102_v17 }
 0x5f5   : > { %3397 = vmatmul.msk.bf16.vlgmr.msra.gmra.mxu1 %vm581_vm0, %v4594_v46 }
 0x5f6   : > { %1360 = vmatpush.bf16.msrb.mxu2 %v4101_v20 }
 0x5fa   : > { %1361 = vmatpush.bf16.msrb.mxu2 %v4100_v21 }
 0x5fd   : > { %3422 = vmatmul.msk.bf16.vlgmr.msrb.gmra.mxu2 %vm581_vm0, %v4594_v46 }
 0x652   : > { %v1030_v22 = vpop.f32.mrf.mxu1 }
 0x653   : > { %v1053_v62 = vadd.f32 %v4659_v40, %v1030_v22  ;;  %v4108_v40 = vld [vmem:[%s5313_s6 + $0x18] sm:$0xff]  ;;  %v4256_v22 = vld [vmem:[%s5314_s7] ss:$0 sm:$0xff] }
 0x654   : > { %1485 = vmatpush.bf16.msra.mxu2 %v4108_v40 }
 0x65a   : > { %v1032_v23 = vpop.f32.mrf.mxu1 }
 0x662   : > { %v1192_v24 = vpop.f32.mrf.mxu1 }
 0x663   : > { %v1196_v26 = vpack.c.bf16 %v1192_v24, %v1192_v24 }
 0x665   : > { %v1232_v27 = vsel %vm797_vm6, %v1196_v26, 0 }
 0x666   : > { %1241 = vmatpush.bf16.msrb.mxu3 %v1232_v27 }
 0x66a   : > { %v1194_v28 = vpop.f32.mrf.mxu1  ;;  %1405 = vmatpush.bf16.msra.mxu3 %v4107_v45  ;;  %v4112_v45 = vld [vmem:[%s5317_s10 + $0x14] sm:$0xf0] }
 0x66e   : > { %1406 = vmatpush.bf16.msra.mxu3 %v4106_v47  ;;  %v4111_v47 = vld [vmem:[%s5317_s10 + $0x14] sm:$0xf] }
 0x670   : > { %v1212_v29 = vpop.f32.mrf.mxu2 }
 0x671   : > { %v1213_v30 = vadd.f32 %v1212_v29, %v4619_v9 }
 0x672   : > { %v1316_v31 = vpop.f32.mrf.mxu1  ;;  %1407 = vmatpush.bf16.msra.mxu3 %v4105_v48 }
 0x673   : > { %v1216_v32 = vsel %vm781_vm8, %v1213_v30, -inf  ;;  %v1320_v58 = vpack.c.bf16 %v1316_v31, %v1316_v31 }
 0x674   : > { %1217 = vmax.xlane.f32.xlu0 %v1216_v32  ;;  %v4116_v32 = vld [vmem:[%s5317_s10 + $0x34] sm:$0xf0] }
 0x676   : > { %1408 = vmatpush.bf16.msra.mxu3 %v4104_v49  ;;  %v3469_v49 = vld [vmem:[%s5317_s10 + $0x18] sm:$0xf0] }
 0x678   : > { %v1214_v33 = vpop.f32.mrf.mxu2 }
 0x679   : > { %v4115_v33 = vld [vmem:[%s5317_s10 + $0x34] sm:$0xf] }
 0x67a   : > { %v1318_v34 = vpop.f32.mrf.mxu1 }
 0x680   : > { %v1363_v35 = vpop.f32.mrf.mxu2 }
 0x681   : > { %v1367_v36 = vpack.c.bf16 %v1363_v35, %v1363_v35  ;;  %v3485_v35 = vld [vmem:[%s5317_s10 + $0x38] sm:$0xf0] }
 0x683   : > { %v1419_v37 = vsel %vm761_vm5, %v1367_v36, 0  ;;  %v3488_v36 = vor.u32 %v4115_v33, %v3485_v35 }
 0x684   : > { %1428 = vmatpush.bf16.xpose.msrb.mxu0 %v1419_v37  ;;  %v3475_v37 = vld [vmem:[%s5317_s10 + $0x20] sm:$0xf] }
 0x688   : > { %v1365_v38 = vpop.f32.mrf.mxu2 }
 0x689   : > { %v4114_v38 = vld [vmem:[%s5317_s10 + $0x24] sm:$0xf0] }
 0x6e7   : > { %v1218_v39 = vpop.xlane.xlu0 %1217 }
 0x6e8   : > { %v1219_v41 = vsub.f32 %v1213_v30, %v1218_v39  ;;  %v4113_v39 = vld [vmem:[%s5317_s10 + $0x24] sm:$0xf] }
 0x6ea   : > { %v1220_v42 = vmul.f32 1.442695, %v1219_v41  ;;  %v3476_v41 = vor.u32 %v4114_v38, %v3475_v37 }
 0x6ec   : > { %4281 = vpow2.f32 %v1220_v42  ;;  %v3477_v42 = vld [vmem:[%s5317_s10 + $0x28] sm:$0xf0] }
 0x6f2   : > { %v4282_v43 = vpop.eup %4281 }
 0x6f3   : > { %v1222_v44 = vsel %vm781_vm8, %v4282_v43, 0.0 }
 0x6f4   : > { %1223 = vadd.xlane.f32.xlu1 %v1222_v44  ;;  %v3467_v44 = vld [vmem:[%s5317_s10 + $0x10] sm:$0xf] }
 0x6f5   : > { %v3468_v48 = vor.u32 %v4112_v45, %v3467_v44 }
 0x767   : > { %v1224_v50 = vpop.xlane.xlu1 %1223 }
 0x768   : > { %4283 = vrcp.f32 %v1224_v50  ;;  %v3472_v50 = vor.u32 %v4111_v47, %v3469_v49 }
 0x76e   : > { %v4284_v51 = vpop.eup %4283 }
 0x76f   : > { %v1226_v52 = vmul.f32 %v4284_v51, %v4282_v43  ;;  %v3480_v43 = vor.u32 %v4113_v39, %v3477_v42  ;;  %v3459_v51 = vld [vmem:[%s5317_s10] sm:$0xf] }
 0x771   : > { %v1227_v53 = vpack.c.bf16 %v1226_v52, %v1226_v52  ;;  %v4110_v52 = vld [vmem:[%s5317_s10 + $0x4] sm:$0xf0] }
 0x773   : > { %3365 = vmatmul.msk.bf16.vlgmr.msrb.gmra.mxu3 %vm781_vm8, %v1227_v53  ;;  %v4109_v53 = vld [vmem:[%s5317_s10 + $0x4] sm:$0xf] }
 0x783   : > { %3447 = vmatmul.msk.bf16.vlgmr.msra.gmra.mxu3 %vm581_vm0, %v4594_v46 }
 0x7f6   : > { %v1243_v54 = vpop.f32.mrf.mxu3 }
 0x7f7   : > { %v1247_v55 = vpack.c.bf16 %v1243_v54, %v1243_v54  ;;  %v3460_v54 = vor.u32 %v4110_v52, %v3459_v51 }
 0x7f9   : > { %3372 = vmatmul.msk.bf16.vlgmr.msra.gmra.mxu0 %vm761_vm5, %v1247_v55  ;;  %v3461_v55 = vld [vmem:[%s5317_s10 + $0x8] sm:$0xf0] }
 0x7fa   : > { %1605 = vmatpush.bf16.msra.mxu0 %v3488_v36 }
 0x7fe   : > { %v1245_v56 = vpop.f32.mrf.mxu3  ;;  %1606 = vmatpush.bf16.msra.mxu0 %v3480_v43  ;;  %v4259_v43 = vld [vmem:[%s5320_s13] ss:$0 sm:$0xff] }
 0x7ff   : > { %v3464_v56 = vor.u32 %v4109_v53, %v3461_v55  ;;  %v4140_v55 = vld [vmem:[%s5350_s4 + $0x98] sm:$0xff] }
 0x802   : > { %1607 = vmatpush.bf16.msra.mxu0 %v3472_v50 }
 0x806   : > { %v1410_v57 = vpop.f32.mrf.mxu3  ;;  %1608 = vmatpush.bf16.msra.mxu0 %v3464_v56  ;;  %v4149_v56 = vld [vmem:[%s5349_s3 + $0xb8] sm:$0xff] }
 0x807   : > { %v1414_v59 = vpack.c.bf16 %v1410_v57, %v1410_v57  ;;  %v4132_v57 = vld [vmem:[%s5319_s12 + $0x78] sm:$0xff] }
 0x808   : > { %1759 = vmatpush.bf16.msrb.mxu2 %v4132_v57  ;;  %v4135_v57 = vld [vmem:[%s5349_s3 + $0x90] sm:$0xff] }
 0x809   : > { %v1450_v60 = vsel %vm797_vm6, %v1414_v59, 0  ;;  %3448 = vmatmul.msk.bf16.vlgmr.msrb.gmra.mxu0 %vm761_vm5, %v1320_v58  ;;  %v4124_v58 = vld [vmem:[%s5319_s12 + $0x38] sm:$0xff] }
 0x80a   : > { %1459 = vmatpush.bf16.msrb.mxu1 %v1450_v60  ;;  %1900 = vmatpush.bf16.msrb.mxu0 %v4140_v55 }
 0x80e   : > { %v1412_v61 = vpop.f32.mrf.mxu3  ;;  %1746 = vmatpush.bf16.msra.mxu1 %v4124_v58  ;;  %v4139_v58 = vld [vmem:[%s5350_s4 + $0x90] sm:$0xff] }
 0x80f   : > { %v4131_v61 = vld [vmem:[%s5319_s12 + $0x70] sm:$0xff]  ;;  %1901 = vmatpush.bf16.msrb.mxu0 %v4139_v58 }
 0x810   : > { %1760 = vmatpush.bf16.msrb.mxu2 %v4131_v61  ;;  %v4138_v61 = vld [vmem:[%s5350_s4 + $0x88] sm:$0xff] }
 0x813   : > { %1902 = vmatpush.bf16.msrb.mxu0 %v4138_v61 }
 0x876   : > { %v1269_v63 = vpop.f32.mrf.mxu0 }
 0x877   : > { %v1273_v1 = vadd.f32 %v1269_v63, %v1053_v62  ;;  %v4123_v62 = vld [vmem:[%s5319_s12 + $0x30] sm:$0xff] }
 0x878   : > { %1747 = vmatpush.bf16.msra.mxu1 %v4123_v62  ;;  %v4147_v62 = vld [vmem:[%s5349_s3 + $0xa8] sm:$0xff] }
 0x87e   : > { %v1271_v2 = vpop.f32.mrf.mxu0 }
 0x87f   : > { %v4122_v2 = vld [vmem:[%s5319_s12 + $0x28] sm:$0xff] }
 0x880   : > { %1748 = vmatpush.bf16.msra.mxu1 %v4122_v2  ;;  %v4146_v2 = vld [vmem:[%s5349_s3 + $0xa0] sm:$0xff] }
 0x886   : > { %v1430_v46 = vpop.f32.mrf.mxu0 }
 0x887   : > { %v1431_v3 = vadd.f32 %v1430_v46, %v4619_v9  ;;  %v4129_v46 = vld [vmem:[%s5319_s12 + $0x60] sm:$0xff] }
 0x889   : > { %v1434_v4 = vsel %vm781_vm8, %v1431_v3, -inf }
 0x88a   : > { %1435 = vmax.xlane.f32.xlu2 %v1434_v4 }
 0x88e   : > { %v1432_v5 = vpop.f32.mrf.mxu0 }
 0x8fd   : > { %v1436_v6 = vpop.xlane.xlu2 %1435 }
 0x8fe   : > { %v1437_v7 = vsub.f32 %v1431_v3, %v1436_v6  ;;  %v4121_v3 = vld [vmem:[%s5319_s12 + $0x20] sm:$0xff]  ;;  %v4128_v6 = vld [vmem:[%s5319_s12 + $0x58] sm:$0xff] }
 0x8ff   : > { %1749 = vmatpush.bf16.msra.mxu1 %v4121_v3 }
 0x900   : > { %v1438_v10 = vmul.f32 1.442695, %v1437_v7  ;;  %v4120_v7 = vld [vmem:[%s5319_s12 + $0x18] sm:$0xff] }
 0x902   : > { %4285 = vpow2.f32 %v1438_v10 }
 0x903   : > { %1750 = vmatpush.bf16.msra.mxu1 %v4120_v7  ;;  %v4142_v7 = vld [vmem:[%s5351_s5 + $0x88] sm:$0xff] }
 0x908   : > { %v4286_v11 = vpop.eup %4285 }
 0x909   : > { %v1440_v12 = vsel %vm781_vm8, %v4286_v11, 0.0 }
 0x90a   : > { %1441 = vadd.xlane.f32.xlu0 %v1440_v12  ;;  %v4127_v12 = vld [vmem:[%s5319_s12 + $0x50] sm:$0xff] }
 0x97d   : > { %v1442_v13 = vpop.xlane.xlu0 %1441 }
 0x97e   : > { %4287 = vrcp.f32 %v1442_v13 }
 0x984   : > { %v4288_v14 = vpop.eup %4287 }
 0x985   : > { %v1444_v15 = vmul.f32 %v4288_v14, %v4286_v11  ;;  %v4257_v14 = vld [vmem:[%s5315_s8] ss:$0 sm:$0xff] }
 0x987   : > { %v1445_v16 = vpack.c.bf16 %v1444_v15, %v1444_v15 }
 0x989   : > { %3449 = vmatmul.msk.bf16.vlgmr.msrb.gmra.mxu1 %vm781_vm8, %v1445_v16 }
 0xa06   : > { %v1461_v17 = vpop.f32.mrf.mxu1 }
 0xa07   : > { %v1465_v18 = vpack.c.bf16 %v1461_v17, %v1461_v17  ;;  %v4258_v17 = vld [vmem:[%s5316_s9] ss:$0 sm:$0xff] }
 0xa09   : > { %3456 = vmatmul.msk.bf16.vlgmr.msra.gmra.mxu2 %vm761_vm5, %v1465_v18 }
 0xa0e   : > { %v1463_v19 = vpop.f32.mrf.mxu1 }
 0xa8c   : > { %v1487_v20 = vpop.f32.mrf.mxu2 }
 0xa8d   : > { %v1491_v21 = vadd.f32 %v1487_v20, %v1273_v1  ;;  %v4130_v1 = vld [vmem:[%s5319_s12 + $0x68] sm:$0xff] }
 0xa8e   : > { %1761 = vmatpush.bf16.msrb.mxu2 %v4130_v1  ;;  %v4137_v1 = vld [vmem:[%s5350_s4 + $0x80] sm:$0xff] }
 0xa8f   : > { %v1492_v23 = vadd.f32 %v1491_v21, %v4527_v0  ;;  %v3483_v0 = vld [vmem:[%s5317_s10 + $0x30] sm:$0xf]  ;;  %v4126_v21 = vld [vmem:[%s5319_s12 + $0x48] sm:$0xff]  ;;  %1903 = vmatpush.bf16.msrb.mxu0 %v4137_v1 }
 0xa90   : > { %v3484_v34 = vor.u32 %v4116_v32, %v3483_v0 }
 0xa91   : > { %v4766_v24 = vadd.f32 %v4256_v22, %v1492_v23  ;;  %v4119_v22 = vld [vmem:[%s5319_s12 + $0x10] sm:$0xff]  ;;  %v4125_v23 = vld [vmem:[%s5319_s12 + $0x40] sm:$0xff] }
 0xa92   : > { %1592 = vmatpush.bf16.msrb.mxu3 %v3484_v34  ;;  %1762 = vmatpush.bf16.msrb.mxu2 %v4129_v46  ;;  %v4144_v46 = vld [vmem:[%s5351_s5 + $0x98] sm:$0xff] }
 0xa93   : > { %v1500_v25 = vsel %vm581_vm0, %v4766_v24, 0.0  ;;  %1751 = vmatpush.bf16.msra.mxu1 %v4119_v22  ;;  %v4153_v22 = vld [vmem:[%s5350_s4 + $0xb8] sm:$0xff] }
 0xa94   : > { %v1489_v26 = vpop.f32.mrf.mxu2  ;;  %1501 = vadd.xlane.f32.xlu1 %v1500_v25  ;;  %v4118_v25 = vld [vmem:[%s5319_s12 + $0x8] sm:$0xff] }
 0xa95   : > { %v4117_v26 = vld [vmem:[%s5319_s12] sm:$0xff] }
 0xa96   : > { %1593 = vmatpush.bf16.msrb.mxu3 %v3476_v41  ;;  %1763 = vmatpush.bf16.msrb.mxu2 %v4128_v6 }
 0xa97   : > { %1752 = vmatpush.bf16.msra.mxu1 %v4118_v25  ;;  %v4152_v25 = vld [vmem:[%s5350_s4 + $0xb0] sm:$0xff] }
 0xa9a   : > { %1594 = vmatpush.bf16.msrb.mxu3 %v3468_v48  ;;  %1764 = vmatpush.bf16.msrb.mxu2 %v4127_v12 }
 0xa9b   : > { %1753 = vmatpush.bf16.msra.mxu1 %v4117_v26  ;;  %v4151_v26 = vld [vmem:[%s5350_s4 + $0xa8] sm:$0xff] }
 0xa9e   : > { %1595 = vmatpush.bf16.msrb.mxu3 %v3460_v54  ;;  %1765 = vmatpush.bf16.msrb.mxu2 %v4126_v21 }
 0xaa2   : > { %1766 = vmatpush.bf16.msrb.mxu2 %v4125_v23 }
 0xaa6   : > { %2048 = vmatpush.bf16.msra.mxu2 %v4149_v56 }
 0xb07   : > { %v1502_v27 = vpop.xlane.xlu1 %1501 }
 0xb08   : > { %v1503_v28 = vmul.f32 %v1502_v27, %v4531_v8  ;;  %v1539_v27 = vld [vmem:[%s5318_s11] sm:$0x3] }
 0xb09   : > { %v1541_v0 = vperm.slane %v1539_v27, 0 }
 0xb0a   : > { %v4772_v29 = vsub.f32 %v4766_v24, %v1503_v28  ;;  %v1542_v28 = vperm.slane %v1539_v27, 1  ;;  %v4150_v27 = vld [vmem:[%s5350_s4 + $0xa0] sm:$0xff] }
 0xb0c   : > { %v1505_v30 = vmul.f32 %v4772_v29, %v4772_v29 }
 0xb0e   : > { %v1506_v31 = vsel %vm581_vm0, %v1505_v30, 0.0 }
 0xb0f   : > { %1507 = vadd.xlane.f32.xlu2 %v1506_v31 }
 0xb82   : > { %v1508_v59 = vpop.xlane.xlu2 %1507 }
 0xb83   : > { %v1509_v60 = vmul.f32 %v1508_v59, %v4531_v8  ;;  %v4148_v59 = vld [vmem:[%s5349_s3 + $0xb0] sm:$0xff] }
 0xb84   : > { %2049 = vmatpush.bf16.msra.mxu2 %v4148_v59 }
 0xb85   : > { %v1510_v63 = vadd.f32 1e-05, %v1509_v60  ;;  %v4134_v60 = vld [vmem:[%s5349_s3 + $0x88] sm:$0xff] }
 0xb87   : > { %4289 = vrsqrt.f32 %v1510_v63  ;;  %vm1517_vm10 = vweird.f32 %v1510_v63 }
 0xb88   : > { %2050 = vmatpush.bf16.msra.mxu2 %v4147_v62 }
 0xb8c   : > { %2051 = vmatpush.bf16.msra.mxu2 %v4146_v2 }
 0xb8d   : > { %v4290_v4 = vpop.eup %4289 }
 0xb8e   : > { %v1512_v5 = vmul.f32 %v4290_v4, %v1510_v63  ;;  %vm1518_vm9 = vweird.f32 %v4290_v4  ;;  %v4133_v63 = vld [vmem:[%s5349_s3 + $0x80] sm:$0xff] }
 0xb8f   : > { %vm1519_vm11 = vmor %vm1517_vm10, %vm1518_vm9 }
 0xb90   : > { %v1513_v10 = vmul.f32 %v4290_v4, %v1512_v5  ;;  %v4143_v5 = vld [vmem:[%s5351_s5 + $0x90] sm:$0xff] }
 0xb92   : > { %v1514_v11 = vmul.f32 0.5, %v1513_v10  ;;  %v4141_v10 = vld [vmem:[%s5351_s5 + $0x80] sm:$0xff] }
 0xb94   : > { %v1515_v40 = vsub.f32 1.5, %v1514_v11 }
 0xb96   : > { %v1516_v13 = vmul.f32 %v4290_v4, %v1515_v40 }
 0xb98   : > { %v1520_v15 = vsel %vm1519_vm11, %v4290_v4, %v1516_v13 }
 0xb99   : > { %v1521_v16 = vmul.f32 %v1520_v15, %v4772_v29 }
 0xb9b   : > { %v1525_v18 = vmul.f32 %v4257_v14, %v1521_v16  ;;  %v4260_v16 = vld [vmem:[%s5352_s20 + $0x1] ss:$0 sm:$0xff] }
 0xb9d   : > { %v1529_v19 = vadd.f32 %v4258_v17, %v1525_v18  ;;  %v4261_v18 = vld [vmem:[%s5353_s22 + $0x1] ss:$0 sm:$0xff] }
 0xb9f   : > { %v1530_v20 = vpack.c.bf16 %v1529_v19, %v1529_v19 }
 0xba1   : > { %3489 = vmatmul.msk.bf16.vlgmr.msrb.gmra.mxu3 %vm581_vm0, %v1530_v20  ;;  %3490 = vmatmul.msk.bf16.vlgmr.msra.gmra.mxu0 %vm581_vm0, %v1530_v20 }
 0xc1e   : > { %v1610_v29 = vpop.f32.mrf.mxu0 }
 0xc1f   : > { %v1611_v30 = vadd.f32 %v1610_v29, %v1542_v28 }
 0xc21   : > { %v1615_v31 = vmax.f32 %v1611_v30, 0.0  ;;  %v4157_v30 = vld [vmem:[%s5351_s5 + $0xb8] sm:$0xff] }
 0xc23   : > { %v1617_v32 = vpack.c.bf16 %v1615_v31, %v1615_v31 }
 0xc24   : > { %v1597_v33 = vpop.f32.mrf.mxu3 }
 0xc25   : > { %v1598_v34 = vadd.f32 %v1597_v33, %v1541_v0  ;;  %1767 = vmatmul.bf16.vlgmr.msrb.gmra.mxu2 %v1617_v32  ;;  %v4156_v0 = vld [vmem:[%s5351_s5 + $0xb0] sm:$0xff] }
 0xc26   : > { %v1612_v35 = vpop.f32.mrf.mxu0 }
 0xc27   : > { %v1614_v36 = vmax.f32 %v1598_v34, 0.0 }
 0xc29   : > { %v1616_v37 = vpack.c.bf16 %v1614_v36, %v1614_v36  ;;  %v4155_v36 = vld [vmem:[%s5351_s5 + $0xa8] sm:$0xff] }
 0xc2b   : > { %1754 = vmatmul.bf16.vlgmr.msra.gmra.mxu1 %v1616_v37  ;;  %v4154_v37 = vld [vmem:[%s5351_s5 + $0xa0] sm:$0xff] }
 0xc2c   : > { %v1599_v38 = vpop.f32.mrf.mxu3 }
 0xca8   : > { %v1755_v39 = vpop.f32.mrf.mxu1  ;;  %v1768_v41 = vpop.f32.mrf.mxu2 }
 0xca9   : > { %v1769_v42 = vadd.f32 %v1768_v41, %v1755_v39 }
 0xcab   : > { %v1772_v44 = vadd.f32 %v1769_v42, %v4766_v24  ;;  %v4136_v24 = vld [vmem:[%s5349_s3 + $0x98] sm:$0xff] }
 0xcac   : > { %1853 = vmatpush.bf16.msra.mxu3 %v4136_v24 }
 0xcad   : > { %v4890_v45 = vadd.f32 %v4259_v43, %v1772_v44 }
 0xcaf   : > { %v1782_v47 = vsel %vm581_vm0, %v4890_v45, 0.0 }
 0xcb0   : > { %v1770_v48 = vpop.f32.mrf.mxu2  ;;  %1783 = vadd.xlane.f32.xlu0 %v1782_v47  ;;  %v1757_v49 = vpop.f32.mrf.mxu1  ;;  %1854 = vmatpush.bf16.msra.mxu3 %v4135_v57 }
 0xcb4   : > { %1855 = vmatpush.bf16.msra.mxu3 %v4134_v60 }
 0xcb8   : > { %1856 = vmatpush.bf16.msra.mxu3 %v4133_v63 }
 0xcbc   : > { %1947 = vmatpush.bf16.msrb.mxu3 %v4144_v46  ;;  %v4162_v46 = vld [vmem:[%s5349_s3 + $0xd8] sm:$0xff] }
 0xcc0   : > { %1948 = vmatpush.bf16.msrb.mxu3 %v4143_v5  ;;  %v4160_v5 = vld [vmem:[%s5349_s3 + $0xc8] sm:$0xff] }
 0xcc4   : > { %1949 = vmatpush.bf16.msrb.mxu3 %v4142_v7 }
 0xcc8   : > { %1950 = vmatpush.bf16.msrb.mxu3 %v4141_v10  ;;  %v4145_v10 = vld [vmem:[%s5313_s6 + $0x20] sm:$0xff] }
 0xd23   : > { %v1784_v50 = vpop.xlane.xlu0 %1783 }
 0xd24   : > { %v1785_v51 = vmul.f32 %v1784_v50, %v4531_v8 }
 0xd26   : > { %v1786_v52 = vsub.f32 %v4890_v45, %v1785_v51 }
 0xd28   : > { %v1787_v53 = vmul.f32 %v1786_v52, %v1786_v52 }
 0xd2a   : > { %v1788_v54 = vsel %vm581_vm0, %v1787_v53, 0.0 }
 0xd2b   : > { %1789 = vadd.xlane.f32.xlu1 %v1788_v54 }
 0xd9e   : > { %v1790_v3 = vpop.xlane.xlu1 %1789 }
 0xd9f   : > { %v1791_v4 = vmul.f32 %v1790_v3, %v4531_v8 }
 0xda1   : > { %v1792_v6 = vadd.f32 1e-05, %v1791_v4  ;;  %v4161_v4 = vld [vmem:[%s5349_s3 + $0xd0] sm:$0xff] }
 0xda3   : > { %4291 = vrsqrt.f32 %v1792_v6  ;;  %vm1799_vm13 = vweird.f32 %v1792_v6 }
 0xda9   : > { %v4292_v11 = vpop.eup %4291 }
 0xdaa   : > { %v1794_v12 = vmul.f32 %v4292_v11, %v1792_v6  ;;  %vm1800_vm12 = vweird.f32 %v4292_v11  ;;  %v4159_v6 = vld [vmem:[%s5349_s3 + $0xc0] sm:$0xff] }
 0xdab   : > { %vm1801_vm14 = vmor %vm1799_vm13, %vm1800_vm12 }
 0xdac   : > { %v1795_v40 = vmul.f32 %v4292_v11, %v1794_v12 }
 0xdae   : > { %v1796_v13 = vmul.f32 0.5, %v1795_v40 }
 0xdb0   : > { %v1797_v14 = vsub.f32 1.5, %v1796_v13 }
 0xdb2   : > { %v1798_v15 = vmul.f32 %v4292_v11, %v1797_v14 }
 0xdb4   : > { %v1802_v17 = vsel %vm1801_vm14, %v4292_v11, %v1798_v15 }
 0xdb5   : > { %v1803_v19 = vmul.f32 %v1802_v17, %v1786_v52 }
 0xdb7   : > { %v1807_v20 = vmul.f32 %v4260_v16, %v1803_v19 }
 0xdb9   : > { %v1811_v21 = vadd.f32 %v4261_v18, %v1807_v20 }
 0xdbb   : > { %v4955_v23 = vpack.c.bf16 %v1811_v21, %v1811_v21 }
 0xdbd   : > { %3581 = vmatmul.msk.bf16.vlgmr.msra.gmra.mxu3 %vm581_vm0, %v4955_v23  ;;  %3606 = vmatmul.msk.bf16.vlgmr.msrb.gmra.mxu0 %vm581_vm0, %v4955_v23 }
 0xdbe   : > { %3660 = vmatmul.msk.bf16.vlgmr.msra.gmra.mxu2 %vm581_vm0, %v4955_v23  ;;  %2095 = vmatpush.bf16.msra.mxu3 %v4153_v22 }
 0xdc2   : > { %2096 = vmatpush.bf16.msra.mxu3 %v4152_v25 }
 0xdc6   : > { %2097 = vmatpush.bf16.msra.mxu3 %v4151_v26 }
 0xdca   : > { %2098 = vmatpush.bf16.msra.mxu3 %v4150_v27 }
 0xdcd   : > { %3631 = vmatmul.msk.bf16.vlgmr.msrb.gmra.mxu3 %vm581_vm0, %v4955_v23 }
 0xddd   : > { %3685 = vmatmul.msk.bf16.vlgmr.msra.gmra.mxu3 %vm581_vm0, %v4955_v23 }
 0xe3a   : > { %v1905_v28 = vpop.f32.mrf.mxu0 }
 0xe3b   : > { %v1909_v29 = vpack.c.bf16 %v1905_v28, %v1905_v28  ;;  %v4166_v28 = vld [vmem:[%s5350_s4 + $0xd8] sm:$0xff] }
 0xe3d   : > { %v1961_v31 = vsel %vm761_vm5, %v1909_v29, 0  ;;  %v4165_v29 = vld [vmem:[%s5350_s4 + $0xd0] sm:$0xff] }
 0xe3e   : > { %1970 = vmatpush.bf16.xpose.msra.mxu0 %v1961_v31  ;;  %v4163_v31 = vld [vmem:[%s5350_s4 + $0xc0] sm:$0xff] }
 0xe40   : > { %v1858_v32 = vpop.f32.mrf.mxu3 }
 0xe41   : > { %v2053_v33 = vpop.f32.mrf.mxu2  ;;  %v1862_v35 = vpack.c.bf16 %v1858_v32, %v1858_v32 }
 0xe42   : > { %v1907_v34 = vpop.f32.mrf.mxu0  ;;  %v2057_v7 = vpack.c.bf16 %v2053_v33, %v2053_v33 }
 0xe45   : > { %3632 = vmatmul.msk.bf16.vlgmr.msra.gmra.mxu0 %vm761_vm5, %v1862_v35  ;;  %v4158_v35 = vld [vmem:[%s5313_s6 + $0x28] sm:$0xff] }
 0xe46   : > { %2142 = vmatpush.bf16.msrb.mxu0 %v4157_v30  ;;  %v4164_v30 = vld [vmem:[%s5350_s4 + $0xc8] sm:$0xff]  ;;  %2222 = vmatpush.bf16.msrb.mxu3 %v4158_v35 }
 0xe48   : > { %v1860_v38 = vpop.f32.mrf.mxu3 }
 0xe49   : > { %v2055_v39 = vpop.f32.mrf.mxu2  ;;  %v4168_v38 = vld [vmem:[%s5351_s5 + $0xc8] sm:$0xff] }
 0xe4a   : > { %2143 = vmatpush.bf16.msrb.mxu0 %v4156_v0  ;;  %v4167_v39 = vld [vmem:[%s5351_s5 + $0xc0] sm:$0xff] }
 0xe4e   : > { %2144 = vmatpush.bf16.msrb.mxu0 %v4155_v36  ;;  %v4170_v36 = vld [vmem:[%s5351_s5 + $0xd8] sm:$0xff] }
 0xe4f   : > { %2381 = vmatpush.bf16.msra.mxu3 %v4170_v36 }
 0xe50   : > { %v1952_v41 = vpop.f32.mrf.mxu3 }
 0xe51   : > { %v1956_v42 = vpack.c.bf16 %v1952_v41, %v1952_v41 }
 0xe52   : > { %2145 = vmatpush.bf16.msrb.mxu0 %v4154_v37  ;;  %v4169_v37 = vld [vmem:[%s5351_s5 + $0xd0] sm:$0xff] }
 0xe53   : > { %v1992_v43 = vsel %vm797_vm6, %v1956_v42, 0  ;;  %2382 = vmatpush.bf16.msra.mxu3 %v4169_v37  ;;  %v4175_v42 = vld [vmem:[%s5349_s3 + $0xf8] sm:$0xff] }
 0xe54   : > { %2001 = vmatpush.bf16.msrb.mxu1 %v1992_v43 }
 0xe55   : > { %3710 = vmatmul.msk.bf16.vlgmr.msrb.gmra.mxu0 %vm581_vm0, %v4955_v23 }
 0xe56   : > { %2244 = vmatpush.bf16.msra.mxu0 %v4145_v10 }
 0xe57   : > { %2383 = vmatpush.bf16.msra.mxu3 %v4168_v38 }
 0xe58   : > { %v1954_v44 = vpop.f32.mrf.mxu3 }
 0xe59   : > { %v4174_v44 = vld [vmem:[%s5349_s3 + $0xf0] sm:$0xff] }
 0xe5b   : > { %2384 = vmatpush.bf16.msra.mxu3 %v4167_v39 }
 0xe60   : > { %v2100_v47 = vpop.f32.mrf.mxu3 }
 0xe61   : > { %v2104_v48 = vpack.c.bf16 %v2100_v47, %v2100_v47 }
 0xe63   : > { %v2156_v49 = vsel %vm761_vm5, %v2104_v48, 0  ;;  %v4173_v48 = vld [vmem:[%s5349_s3 + $0xe8] sm:$0xff] }
 0xe64   : > { %2165 = vmatpush.bf16.xpose.msra.mxu1 %v2156_v49  ;;  %v4172_v49 = vld [vmem:[%s5349_s3 + $0xe0] sm:$0xff]  ;;  %s3081_s3 = sshll.u32 %s3077_s30, 4  ;;  %s3082_s3 = int_to_ptr.hbm [resolvable:$true] %s3081_s3 }
 0xe65   : > { %s4327_s0 = sshra.s32 %s3082_s3, 4  ;;  %s4328_s0 = int_to_ptr.hbm [resolvable:$true] %s4327_s0 }
 0xe66   : > { %p4334_p0 = scmp.lt.s32.totalorder %s4328_s0, %s5325_s18 }
 0xe68   : > { %v2102_v50 = vpop.f32.mrf.mxu3 }
 0xec2   : > { %v1972_v51 = vpop.f32.mrf.mxu0 }
 0xec3   : > { %v1973_v52 = vadd.f32 %v1972_v51, %v4619_v9 }
 0xec5   : > { %v1976_v53 = vsel %vm781_vm8, %v1973_v52, -inf }
 0xec6   : > { %1977 = vmax.xlane.f32.xlu2 %v1976_v53 }
 0xeca   : > { %v1974_v54 = vpop.f32.mrf.mxu0 }
 0xecb   : > { %v4178_v54 = vld [vmem:[%s5350_s4 + $0xf0] sm:$0xff] }
 0xed2   : > { %v2147_v24 = vpop.f32.mrf.mxu0 }
 0xed3   : > { %v2151_v55 = vpack.c.bf16 %v2147_v24, %v2147_v24 }
 0xed5   : > { %v2187_v56 = vsel %vm797_vm6, %v2151_v55, 0 }
 0xed6   : > { %2196 = vmatpush.bf16.msrb.mxu2 %v2187_v56  ;;  %v4177_v56 = vld [vmem:[%s5350_s4 + $0xe8] sm:$0xff] }
 0xeda   : > { %v2149_v57 = vpop.f32.mrf.mxu0  ;;  %2334 = vmatpush.bf16.msra.mxu2 %v4166_v28 }
 0xedb   : > { %v4176_v57 = vld [vmem:[%s5350_s4 + $0xe0] sm:$0xff] }
 0xede   : > { %2335 = vmatpush.bf16.msra.mxu2 %v4165_v29 }
 0xee2   : > { %2336 = vmatpush.bf16.msra.mxu2 %v4164_v30 }
 0xee6   : > { %2337 = vmatpush.bf16.msra.mxu2 %v4163_v31 }
 0xf39   : > { %v1978_v58 = vpop.xlane.xlu2 %1977 }
 0xf3a   : > { %v1979_v59 = vsub.f32 %v1973_v52, %v1978_v58  ;;  %v4179_v52 = vld [vmem:[%s5350_s4 + $0xf8] sm:$0xff]  ;;  %s3067_s4 = scalar_lea.sflag [#allocation3], %s564_s24 }
 0xf3c   : > { %v1980_v60 = vmul.f32 1.442695, %v1979_v59  ;;  %v4171_v59 = vld [vmem:[%s5313_s6 + $0x30] sm:$0xff] }
 0xf3e   : > { %4293 = vpow2.f32 %v1980_v60 }
 0xf44   : > { %v4294_v61 = vpop.eup %4293 }
 0xf45   : > { %v1982_v62 = vsel %vm781_vm8, %v4294_v61, 0.0 }
 0xf46   : > { %1983 = vadd.xlane.f32.xlu0 %v1982_v62 }
 0xfb9   : > { %v1984_v63 = vpop.xlane.xlu0 %1983 }
 0xfba   : > { %4295 = vrcp.f32 %v1984_v63 }
 0xfc0   : > { %v4296_v1 = vpop.eup %4295 }
 0xfc1   : > { %v1986_v2 = vmul.f32 %v4296_v1, %v4294_v61 }
 0xfc3   : > { %v1987_v3 = vpack.c.bf16 %v1986_v2, %v1986_v2 }
 0xfc5   : > { %3633 = vmatmul.msk.bf16.vlgmr.msrb.gmra.mxu1 %vm781_vm8, %v1987_v3 }
 0xfc6   : > { %2287 = vmatpush.bf16.msrb.mxu1 %v4162_v46 }
 0xfca   : > { %2288 = vmatpush.bf16.msrb.mxu1 %v4161_v4 }
 0xfce   : > { %2289 = vmatpush.bf16.msrb.mxu1 %v4160_v5 }
 0xfd2   : > { %2290 = vmatpush.bf16.msrb.mxu1 %v4159_v6 }
 0xfd5   : > { %3711 = vmatmul.msk.bf16.vlgmr.msra.gmra.mxu1 %vm761_vm5, %v2057_v7 }
 0xfe5   : > { %3749 = vmatmul.msk.bf16.vlgmr.msrb.gmra.mxu1 %vm581_vm0, %v4955_v23 }
0x1042   : > { %v2003_v11 = vpop.f32.mrf.mxu1 }
0x1043   : > { %v2007_v12 = vpack.c.bf16 %v2003_v11, %v2003_v11 }
0x1045   : > { %3724 = vmatmul.msk.bf16.vlgmr.msra.gmra.mxu0 %vm761_vm5, %v2007_v12 }
0x104a   : > { %v2005_v40 = vpop.f32.mrf.mxu1 }
0x1052   : > { %v2167_v13 = vpop.f32.mrf.mxu1 }
0x1053   : > { %v2168_v14 = vadd.f32 %v2167_v13, %v4619_v9 }
0x1055   : > { %v2171_v15 = vsel %vm781_vm8, %v2168_v14, -inf }
0x1056   : > { %2172 = vmax.xlane.f32.xlu1 %v2171_v15 }
0x105a   : > { %v2169_v16 = vpop.f32.mrf.mxu1 }
0x1062   : > { %v2292_v17 = vpop.f32.mrf.mxu1 }
0x1063   : > { %v2296_v55 = vpack.c.bf16 %v2292_v17, %v2292_v17  ;;  %v4183_v17 = vld [vmem:[%s5351_s5 + $0xf8] sm:$0xff] }
0x106a   : > { %v2294_v18 = vpop.f32.mrf.mxu1 }
0x106b   : > { %v4182_v18 = vld [vmem:[%s5351_s5 + $0xf0] sm:$0xff] }
0x10c2   : > { %v5020_v19 = vpop.f32.mrf.mxu0 }
0x10c9   : > { %v2173_v20 = vpop.xlane.xlu1 %2172 }
0x10ca   : > { %v2174_v21 = vsub.f32 %v2168_v14, %v2173_v20  ;;  %v2248_v22 = vpop.f32.mrf.mxu0  ;;  %v4181_v20 = vld [vmem:[%s5351_s5 + $0xe8] sm:$0xff] }
0x10cc   : > { %v2175_v25 = vmul.f32 1.442695, %v2174_v21  ;;  %v4180_v21 = vld [vmem:[%s5351_s5 + $0xe0] sm:$0xff]  ;;  %s4329_s5 = scalar_lea.hbm %s4328_s0, 4 }
0x10cd   : > { %p4330_p11 = scmp.ne.s32.totalorder %s4328_s0, %s4329_s5  ;;  %p4335_p1 = scmp.lt.s32.totalorder %s4333_s26, %s4329_s5 }
0x10ce   : > { %4297 = vpow2.f32 %v2175_v25 }
0x10cf   : > { %p4331_p12 = pnand %p4330_p11, %p4512_p5  ;;  %p4336_p2 = por %p4335_p1, %p4334_p0 }
0x10d1   : > { %p4332_p13 = pneg %p4331_p12 }
0x10d3   : > { %p4337_p3 = pnand %p4336_p2, %p4332_p13 }
0x10d4   : > { %v4298_v26 = vpop.eup %4297 }
0x10d5   : > { %v2177_v27 = vsel %vm781_vm8, %v4298_v26, 0.0 }
0x10d6   : > { %2178 = vadd.xlane.f32.xlu2 %v2177_v27 }
0x1149   : > { %v2179_v0 = vpop.xlane.xlu2 %2178 }
0x114a   : > { %4299 = vrcp.f32 %v2179_v0 }
0x1150   : > { %v4300_v32 = vpop.eup %4299 }
0x1151   : > { %v2181_v33 = vmul.f32 %v4300_v32, %v4298_v26 }
0x1153   : > { %v2182_v34 = vpack.c.bf16 %v2181_v33, %v2181_v33 }
0x1155   : > { %3712 = vmatmul.msk.bf16.vlgmr.msrb.gmra.mxu2 %vm781_vm8, %v2182_v34 }
0x1156   : > { %2461 = vmatpush.bf16.msrb.mxu2 %v4171_v59 }
0x1165   : > { %3774 = vmatmul.msk.bf16.vlgmr.msra.gmra.mxu2 %vm581_vm0, %v4955_v23 }
0x11d8   : > { %v2198_v41 = vpop.f32.mrf.mxu2 }
0x11d9   : > { %v2202_v43 = vpack.c.bf16 %v2198_v41, %v2198_v41 }
0x11db   : > { %3719 = vmatmul.msk.bf16.vlgmr.msrb.gmra.mxu3 %vm761_vm5, %v2202_v43 }
0x11dc   : > { %2505 = vmatpush.bf16.msrb.mxu3 %v4175_v42 }
0x11e0   : > { %v2200_v47 = vpop.f32.mrf.mxu2  ;;  %2506 = vmatpush.bf16.msrb.mxu3 %v4174_v44 }
0x11e4   : > { %2507 = vmatpush.bf16.msrb.mxu3 %v4173_v48 }
0x11e8   : > { %v2339_v50 = vpop.f32.mrf.mxu2  ;;  %2508 = vmatpush.bf16.msrb.mxu3 %v4172_v49 }
0x11e9   : > { %v2343_v51 = vpack.c.bf16 %v2339_v50, %v2339_v50 }
0x11eb   : > { %v2395_v53 = vsel %vm761_vm5, %v2343_v51, 0  ;;  %3799 = vmatmul.msk.bf16.vlgmr.msra.gmra.mxu3 %vm581_vm0, %v4955_v23 }
0x11ec   : > { %2404 = vmatpush.bf16.xpose.msrb.mxu0 %v2395_v53 }
0x11f0   : > { %v2341_v24 = vpop.f32.mrf.mxu2 }
0x11f3   : > { %3800 = vmatmul.msk.bf16.vlgmr.msrb.gmra.mxu0 %vm761_vm5, %v2296_v55 }
0x11f4   : > { %2552 = vmatpush.bf16.msra.mxu0 %v4179_v52 }
0x11f8   : > { %2553 = vmatpush.bf16.msra.mxu0 %v4178_v54 }
0x11fb   : > { %3833 = vmatmul.msk.bf16.vlgmr.msrb.gmra.mxu3 %vm581_vm0, %v4955_v23 }
0x11fc   : > { %2554 = vmatpush.bf16.msra.mxu0 %v4177_v56 }
0x1200   : > { %2555 = vmatpush.bf16.msra.mxu0 %v4176_v57  ;;  %v4262_v57 = vld [vmem:[%s5314_s7 + $0x1] ss:$0 sm:$0xff] }
0x1203   : > { %3858 = vmatmul.msk.bf16.vlgmr.msra.gmra.mxu0 %vm581_vm0, %v4955_v23 }
0x125e   : > { %v2224_v58 = vpop.f32.mrf.mxu3 }
0x125f   : > { %v2247_v35 = vadd.f32 %v5020_v19, %v2224_v58  ;;  %v4184_v19 = vld [vmem:[%s5313_s6 + $0x38] sm:$0xff] }
0x1260   : > { %2679 = vmatpush.bf16.msrb.mxu0 %v4184_v19 }
0x1266   : > { %v2226_v60 = vpop.f32.mrf.mxu3 }
0x126e   : > { %v2386_v61 = vpop.f32.mrf.mxu3 }
0x126f   : > { %v2390_v62 = vpack.c.bf16 %v2386_v61, %v2386_v61 }
0x1270   : > { %v2406_v63 = vpop.f32.mrf.mxu0 }
0x1271   : > { %v2426_v1 = vsel %vm797_vm6, %v2390_v62, 0  ;;  %v2407_v2 = vadd.f32 %v2406_v63, %v4619_v9 }
0x1272   : > { %2435 = vmatpush.bf16.msra.mxu1 %v2426_v1 }
0x1273   : > { %v2410_v46 = vsel %vm781_vm8, %v2407_v2, -inf }
0x1274   : > { %2411 = vmax.xlane.f32.xlu0 %v2410_v46 }
0x1276   : > { %v2388_v3 = vpop.f32.mrf.mxu3  ;;  %2599 = vmatpush.bf16.msrb.mxu1 %v4183_v17  ;;  %v4187_v17 = vld [vmem:[%s5317_s10 + $0x54] sm:$0xf] }
0x1277   : > { %v4192_v3 = vld [vmem:[%s5317_s10 + $0x74] sm:$0xf0] }
0x1278   : > { %v2408_v4 = vpop.f32.mrf.mxu0 }
0x1279   : > { %v4191_v4 = vld [vmem:[%s5317_s10 + $0x74] sm:$0xf] }
0x127a   : > { %2600 = vmatpush.bf16.msrb.mxu1 %v4182_v18 }
0x127e   : > { %v2510_v5 = vpop.f32.mrf.mxu3  ;;  %2601 = vmatpush.bf16.msrb.mxu1 %v4181_v20  ;;  %v3917_v20 = vld [vmem:[%s5317_s10 + $0x58] sm:$0xf0] }
0x127f   : > { %v2514_v0 = vpack.c.bf16 %v2510_v5, %v2510_v5 }
0x1280   : > { %v2557_v6 = vpop.f32.mrf.mxu0 }
0x1281   : > { %v2561_v7 = vpack.c.bf16 %v2557_v6, %v2557_v6  ;;  %v3933_v6 = vld [vmem:[%s5317_s10 + $0x78] sm:$0xf0] }
0x1282   : > { %2602 = vmatpush.bf16.msrb.mxu1 %v4180_v21  ;;  %v3920_v21 = vor.u32 %v4187_v17, %v3917_v20 }
0x1283   : > { %v2613_v10 = vsel %vm761_vm5, %v2561_v7, 0  ;;  %v3936_v7 = vor.u32 %v4191_v4, %v3933_v6 }
0x1284   : > { %2622 = vmatpush.bf16.xpose.msra.mxu2 %v2613_v10  ;;  %v3923_v10 = vld [vmem:[%s5317_s10 + $0x60] sm:$0xf] }
0x1286   : > { %v2512_v11 = vpop.f32.mrf.mxu3 }
0x1287   : > { %v4190_v11 = vld [vmem:[%s5317_s10 + $0x64] sm:$0xf0] }
0x1288   : > { %v2559_v12 = vpop.f32.mrf.mxu0 }
0x1289   : > { %v4189_v12 = vld [vmem:[%s5317_s10 + $0x64] sm:$0xf] }
0x12e7   : > { %v2412_v40 = vpop.xlane.xlu0 %2411 }
0x12e8   : > { %v2413_v13 = vsub.f32 %v2407_v2, %v2412_v40  ;;  %v3924_v40 = vor.u32 %v4190_v11, %v3923_v10 }
0x12ea   : > { %v2414_v14 = vmul.f32 1.442695, %v2413_v13  ;;  %v3925_v13 = vld [vmem:[%s5317_s10 + $0x68] sm:$0xf0] }
0x12ec   : > { %4301 = vpow2.f32 %v2414_v14  ;;  %v3928_v14 = vor.u32 %v4189_v12, %v3925_v13  ;;  %v4265_v13 = vld [vmem:[%s5320_s13 + $0x1] ss:$0 sm:$0xff] }
0x12f2   : > { %v4302_v15 = vpop.eup %4301 }
0x12f3   : > { %v2416_v16 = vsel %vm781_vm8, %v4302_v15, 0.0 }
0x12f4   : > { %2417 = vadd.xlane.f32.xlu1 %v2416_v16  ;;  %v4188_v16 = vld [vmem:[%s5317_s10 + $0x54] sm:$0xf0] }
0x1367   : > { %v2418_v22 = vpop.xlane.xlu1 %2417 }
0x1368   : > { %4303 = vrcp.f32 %v2418_v22  ;;  %v3907_v22 = vld [vmem:[%s5317_s10 + $0x40] sm:$0xf] }
0x136e   : > { %v4304_v25 = vpop.eup %4303 }
0x136f   : > { %v2420_v26 = vmul.f32 %v4304_v25, %v4302_v15  ;;  %v3915_v15 = vld [vmem:[%s5317_s10 + $0x50] sm:$0xf]  ;;  %v4186_v25 = vld [vmem:[%s5317_s10 + $0x44] sm:$0xf0] }
0x1370   : > { %v3916_v18 = vor.u32 %v4188_v16, %v3915_v15 }
0x1371   : > { %v2421_v27 = vpack.c.bf16 %v2420_v26, %v2420_v26  ;;  %v4185_v26 = vld [vmem:[%s5317_s10 + $0x44] sm:$0xf] }
0x1373   : > { %3801 = vmatmul.msk.bf16.vlgmr.msra.gmra.mxu1 %vm781_vm8, %v2421_v27  ;;  %v3908_v27 = vor.u32 %v4186_v25, %v3907_v22 }
0x1383   : > { %3883 = vmatmul.msk.bf16.vlgmr.msrb.gmra.mxu1 %vm581_vm0, %v4955_v23 }
0x13f0   : > { %v2437_v28 = vpop.f32.mrf.mxu1 }
0x13f1   : > { %v2441_v29 = vpack.c.bf16 %v2437_v28, %v2437_v28  ;;  %v3909_v28 = vld [vmem:[%s5317_s10 + $0x48] sm:$0xf0] }
0x13f3   : > { %3808 = vmatmul.msk.bf16.vlgmr.msrb.gmra.mxu2 %vm761_vm5, %v2441_v29  ;;  %v3912_v29 = vor.u32 %v4185_v26, %v3909_v28  ;;  %v4210_v28 = vld [vmem:[%s5323_s16 + $0x8] sm:$0xff] }
0x13f4   : > { %2804 = vmatpush.bf16.msrb.mxu2 %v3936_v7 }
0x13f8   : > { %v2439_v30 = vpop.f32.mrf.mxu1  ;;  %2805 = vmatpush.bf16.msrb.mxu2 %v3928_v14 }
0x13f9   : > { %v4200_v30 = vld [vmem:[%s5319_s12 + $0xb8] sm:$0xff] }
0x13fc   : > { %2806 = vmatpush.bf16.msrb.mxu2 %v3920_v21 }
0x1400   : > { %v2604_v31 = vpop.f32.mrf.mxu1  ;;  %2807 = vmatpush.bf16.msrb.mxu2 %v3912_v29  ;;  %v4209_v29 = vld [vmem:[%s5323_s16] sm:$0xff] }
0x1401   : > { %v2608_v32 = vpack.c.bf16 %v2604_v31, %v2604_v31  ;;  %v4208_v31 = vld [vmem:[%s5319_s12 + $0xf8] sm:$0xff] }
0x1402   : > { %2959 = vmatpush.bf16.msra.mxu0 %v4208_v31 }
0x1403   : > { %v2644_v33 = vsel %vm797_vm6, %v2608_v32, 0  ;;  %3884 = vmatmul.msk.bf16.vlgmr.msra.gmra.mxu2 %vm761_vm5, %v2514_v0 }
0x1404   : > { %2653 = vmatpush.bf16.msra.mxu3 %v2644_v33  ;;  %v4199_v33 = vld [vmem:[%s5319_s12 + $0xb0] sm:$0xff] }
0x1408   : > { %v2606_v34 = vpop.f32.mrf.mxu1  ;;  %2946 = vmatpush.bf16.msrb.mxu3 %v4200_v30 }
0x1409   : > { %v4207_v34 = vld [vmem:[%s5319_s12 + $0xf0] sm:$0xff] }
0x140a   : > { %2960 = vmatpush.bf16.msra.mxu0 %v4207_v34 }
0x140c   : > { %2947 = vmatpush.bf16.msrb.mxu3 %v4199_v33 }
0x1476   : > { %v2463_v36 = vpop.f32.mrf.mxu2 }
0x1477   : > { %v2467_v37 = vadd.f32 %v2463_v36, %v2247_v35  ;;  %v4198_v36 = vld [vmem:[%s5319_s12 + $0xa8] sm:$0xff] }
0x1478   : > { %2948 = vmatpush.bf16.msrb.mxu3 %v4198_v36 }
0x147e   : > { %v2465_v38 = vpop.f32.mrf.mxu2 }
0x147f   : > { %v4197_v38 = vld [vmem:[%s5319_s12 + $0xa0] sm:$0xff] }
0x1480   : > { %2949 = vmatpush.bf16.msrb.mxu3 %v4197_v38  ;;  %v4266_v38 = vld [vmem:[%s5321_s14] ss:$0 sm:$0xff] }
0x1486   : > { %v2624_v23 = vpop.f32.mrf.mxu2 }
0x1487   : > { %v2625_v39 = vadd.f32 %v2624_v23, %v4619_v9  ;;  %v4205_v23 = vld [vmem:[%s5319_s12 + $0xe0] sm:$0xff] }
0x1489   : > { %v2628_v41 = vsel %vm781_vm8, %v2625_v39, -inf }
0x148a   : > { %2629 = vmax.xlane.f32.xlu2 %v2628_v41 }
0x148e   : > { %v2626_v42 = vpop.f32.mrf.mxu2 }
0x148f   : > { %v4196_v42 = vld [vmem:[%s5319_s12 + $0x98] sm:$0xff] }
0x1490   : > { %2950 = vmatpush.bf16.msrb.mxu3 %v4196_v42 }
0x14fd   : > { %v2630_v43 = vpop.xlane.xlu2 %2629 }
0x14fe   : > { %v2631_v44 = vsub.f32 %v2625_v39, %v2630_v43  ;;  %v4204_v43 = vld [vmem:[%s5319_s12 + $0xd8] sm:$0xff] }
0x1500   : > { %v2632_v47 = vmul.f32 1.442695, %v2631_v44 }
0x1502   : > { %4305 = vpow2.f32 %v2632_v47 }
0x1508   : > { %v4306_v48 = vpop.eup %4305 }
0x1509   : > { %v2634_v49 = vsel %vm781_vm8, %v4306_v48, 0.0 }
0x150a   : > { %2635 = vadd.xlane.f32.xlu0 %v2634_v49 }
0x157d   : > { %v2636_v50 = vpop.xlane.xlu0 %2635 }
0x157e   : > { %4307 = vrcp.f32 %v2636_v50  ;;  %v4263_v50 = vld [vmem:[%s5315_s8 + $0x1] ss:$0 sm:$0xff] }
0x1584   : > { %v4308_v9 = vpop.eup %4307 }
0x1585   : > { %v2638_v51 = vmul.f32 %v4308_v9, %v4306_v48  ;;  %v4195_v48 = vld [vmem:[%s5319_s12 + $0x90] sm:$0xff] }
0x1586   : > { %2951 = vmatpush.bf16.msrb.mxu3 %v4195_v48 }
0x1587   : > { %v2639_v52 = vpack.c.bf16 %v2638_v51, %v2638_v51  ;;  %v4264_v51 = vld [vmem:[%s5316_s9 + $0x1] ss:$0 sm:$0xff] }
0x1589   : > { %3885 = vmatmul.msk.bf16.vlgmr.msra.gmra.mxu3 %vm781_vm8, %v2639_v52 }
0x160c   : > { %v2655_v53 = vpop.f32.mrf.mxu3 }
0x160d   : > { %v2659_v54 = vpack.c.bf16 %v2655_v53, %v2655_v53 }
0x160f   : > { %3892 = vmatmul.msk.bf16.vlgmr.msrb.gmra.mxu0 %vm761_vm5, %v2659_v54 }
0x1614   : > { %v2657_v24 = vpop.f32.mrf.mxu3 }
0x168c   : > { %v2681_v55 = vpop.f32.mrf.mxu0 }
0x168d   : > { %v2685_v56 = vadd.f32 %v2681_v55, %v2467_v37  ;;  %v4206_v37 = vld [vmem:[%s5319_s12 + $0xe8] sm:$0xff] }
0x168e   : > { %2961 = vmatpush.bf16.msra.mxu0 %v4206_v37  ;;  %v4194_v55 = vld [vmem:[%s5319_s12 + $0x88] sm:$0xff] }
0x168f   : > { %v2686_v58 = vadd.f32 %v2685_v56, %v4890_v45  ;;  %v3931_v45 = vld [vmem:[%s5317_s10 + $0x70] sm:$0xf]  ;;  %2952 = vmatpush.bf16.msrb.mxu3 %v4194_v55 }
0x1690   : > { %v3932_v5 = vor.u32 %v4192_v3, %v3931_v45  ;;  %v4203_v56 = vld [vmem:[%s5319_s12 + $0xd0] sm:$0xff] }
0x1691   : > { %v5125_v59 = vadd.f32 %v4262_v57, %v2686_v58  ;;  %v4193_v57 = vld [vmem:[%s5319_s12 + $0x80] sm:$0xff]  ;;  %v4202_v58 = vld [vmem:[%s5319_s12 + $0xc8] sm:$0xff] }
0x1692   : > { %2791 = vmatpush.bf16.msra.mxu1 %v3932_v5  ;;  %2962 = vmatpush.bf16.msra.mxu0 %v4205_v23 }
0x1693   : > { %v2697_v60 = vsel %vm581_vm0, %v5125_v59, 0.0  ;;  %2953 = vmatpush.bf16.msrb.mxu3 %v4193_v57 }
0x1694   : > { %2698 = vadd.xlane.f32.xlu1 %v2697_v60  ;;  %v2683_v61 = vpop.f32.mrf.mxu0  ;;  %v4201_v60 = vld [vmem:[%s5319_s12 + $0xc0] sm:$0xff] }
0x1695   : > { %v3904_v61 = vld [vmem:[%s5318_s11 + $0x2] sm:$0x3] }
0x1696   : > { %2792 = vmatpush.bf16.msra.mxu1 %v3924_v40  ;;  %2963 = vmatpush.bf16.msra.mxu0 %v4204_v43 }
0x169a   : > { %2793 = vmatpush.bf16.msra.mxu1 %v3916_v18  ;;  %2964 = vmatpush.bf16.msra.mxu0 %v4203_v56 }
0x169e   : > { %2794 = vmatpush.bf16.msra.mxu1 %v3908_v27  ;;  %2965 = vmatpush.bf16.msra.mxu0 %v4202_v58  ;;  %v4212_v27 = vld [vmem:[%s5323_s16 + $0x18] sm:$0xff] }
0x16a2   : > { %2966 = vmatpush.bf16.msra.mxu0 %v4201_v60  ;;  %3055 = vmatpush.bf16.msrb.mxu1 %v4212_v27 }
0x1707   : > { %v2699_v62 = vpop.xlane.xlu1 %2698 }
0x1708   : > { %v2700_v63 = vmul.f32 %v2699_v62, %v4531_v8  ;;  %v2740_v62 = vperm.slane %v3904_v61, 0 }
0x170a   : > { %v5131_v1 = vsub.f32 %v5125_v59, %v2700_v63 }
0x170c   : > { %v2702_v2 = vmul.f32 %v5131_v1, %v5131_v1 }
0x170e   : > { %v2703_v46 = vsel %vm581_vm0, %v2702_v2, 0.0 }
0x170f   : > { %2704 = vadd.xlane.f32.xlu2 %v2703_v46  ;;  %v2741_v46 = vperm.slane %v3904_v61, 1 }
0x1782   : > { %v2705_v0 = vpop.xlane.xlu2 %2704 }
0x1783   : > { %v2706_v32 = vmul.f32 %v2705_v0, %v4531_v8 }
0x1785   : > { %v2707_v35 = vadd.f32 1e-05, %v2706_v32 }
0x1787   : > { %4309 = vrsqrt.f32 %v2707_v35  ;;  %vm2714_vm1 = vweird.f32 %v2707_v35 }
0x178d   : > { %v4310_v39 = vpop.eup %4309 }
0x178e   : > { %v2709_v41 = vmul.f32 %v4310_v39, %v2707_v35  ;;  %vm2715_vm15 = vweird.f32 %v4310_v39 }
0x178f   : > { %vm2716_vm2 = vmor %vm2714_vm1, %vm2715_vm15 }
0x1790   : > { %v2710_v44 = vmul.f32 %v4310_v39, %v2709_v41 }
0x1792   : > { %v2711_v47 = vmul.f32 0.5, %v2710_v44  ;;  %v4268_v44 = vld [vmem:[%s5324_s17] ss:$0 sm:$0xff] }
0x1794   : > { %v2712_v49 = vsub.f32 1.5, %v2711_v47 }
0x1796   : > { %v2713_v19 = vmul.f32 %v4310_v39, %v2712_v49 }
0x1798   : > { %v2717_v9 = vsel %vm2716_vm2, %v4310_v39, %v2713_v19 }
0x1799   : > { %v2718_v52 = vmul.f32 %v2717_v9, %v5131_v1 }
0x179b   : > { %v2722_v53 = vmul.f32 %v4263_v50, %v2718_v52 }
0x179d   : > { %v2726_v54 = vadd.f32 %v4264_v51, %v2722_v53 }
0x179f   : > { %v2727_v24 = vpack.c.bf16 %v2726_v54, %v2726_v54 }
0x17a1   : > { %3937 = vmatmul.msk.bf16.vlgmr.msra.gmra.mxu1 %vm581_vm0, %v2727_v24  ;;  %3938 = vmatmul.msk.bf16.vlgmr.msrb.gmra.mxu2 %vm581_vm0, %v2727_v24 }
0x181e   : > { %v2796_v63 = vpop.f32.mrf.mxu1 }
0x181f   : > { %v2797_v1 = vadd.f32 %v2796_v63, %v2740_v62 }
0x1821   : > { %v2813_v2 = vmax.f32 %v2797_v1, 0.0 }
0x1823   : > { %v2815_v45 = vpack.c.bf16 %v2813_v2, %v2813_v2 }
0x1824   : > { %v2809_v3 = vpop.f32.mrf.mxu2 }
0x1825   : > { %v2810_v4 = vadd.f32 %v2809_v3, %v2741_v46  ;;  %2954 = vmatmul.bf16.vlgmr.msrb.gmra.mxu3 %v2815_v45 }
0x1826   : > { %v2798_v5 = vpop.f32.mrf.mxu1 }
0x1827   : > { %v2814_v6 = vmax.f32 %v2810_v4, 0.0 }
0x1829   : > { %v2816_v7 = vpack.c.bf16 %v2814_v6, %v2814_v6 }
0x182b   : > { %2967 = vmatmul.bf16.vlgmr.msra.gmra.mxu0 %v2816_v7 }
0x182c   : > { %v2811_v10 = vpop.f32.mrf.mxu2 }
0x18a8   : > { %v2955_v11 = vpop.f32.mrf.mxu3  ;;  %v2968_v12 = vpop.f32.mrf.mxu0 }
0x18a9   : > { %v2969_v40 = vadd.f32 %v2968_v12, %v2955_v11 }
0x18ab   : > { %v2972_v14 = vadd.f32 %v2969_v40, %v5125_v59  ;;  %v4211_v59 = vld [vmem:[%s5323_s16 + $0x10] sm:$0xff] }
0x18ac   : > { %3056 = vmatpush.bf16.msrb.mxu1 %v4211_v59 }
0x18ad   : > { %v2978_v15 = vadd.f32 %v4265_v13, %v2972_v14 }
0x18af   : > { %v2981_v16 = vsel %vm581_vm0, %v2978_v15, 0.0 }
0x18b0   : > { %v2970_v17 = vpop.f32.mrf.mxu0  ;;  %2982 = vadd.xlane.f32.xlu0 %v2981_v16  ;;  %v2957_v18 = vpop.f32.mrf.mxu3  ;;  %3057 = vmatpush.bf16.msrb.mxu1 %v4210_v28 }
0x18b4   : > { %3058 = vmatpush.bf16.msrb.mxu1 %v4209_v29 }
0x1923   : > { %v2983_v20 = vpop.xlane.xlu0 %2982 }
0x1924   : > { %v2984_v21 = vmul.f32 %v2983_v20, %v4531_v8 }
0x1926   : > { %v2985_v22 = vsub.f32 %v2978_v15, %v2984_v21 }
0x1928   : > { %v2986_v25 = vmul.f32 %v2985_v22, %v2985_v22 }
0x192a   : > { %v2987_v26 = vsel %vm581_vm0, %v2986_v25, 0.0 }
0x192b   : > { %2988 = vadd.xlane.f32.xlu1 %v2987_v26 }
0x199e   : > { %v2989_v30 = vpop.xlane.xlu1 %2988 }
0x199f   : > { %v2990_v31 = vmul.f32 %v2989_v30, %v4531_v8  ;;  %v4267_v8 = vld [vmem:[%s5322_s15] ss:$0 sm:$0xff] }
0x19a1   : > { %v2991_v0 = vadd.f32 1e-05, %v2990_v31 }
0x19a3   : > { %4311 = vrsqrt.f32 %v2991_v0  ;;  %vm2998_vm4 = vweird.f32 %v2991_v0 }
0x19a9   : > { %v4312_v32 = vpop.eup %4311 }
0x19aa   : > { %v2993_v33 = vmul.f32 %v4312_v32, %v2991_v0  ;;  %vm2999_vm3 = vweird.f32 %v4312_v32 }
0x19ab   : > { %vm3000_vm5 = vmor %vm2998_vm4, %vm2999_vm3 }
0x19ac   : > { %v2994_v34 = vmul.f32 %v4312_v32, %v2993_v33 }
0x19ae   : > { %v2995_v35 = vmul.f32 0.5, %v2994_v34 }
0x19b0   : > { %v2996_v36 = vsub.f32 1.5, %v2995_v35 }
0x19b2   : > { %v2997_v37 = vmul.f32 %v4312_v32, %v2996_v36 }
0x19b4   : > { %v3001_v23 = vsel %vm3000_vm5, %v4312_v32, %v2997_v37 }
0x19b5   : > { %v3002_v39 = vmul.f32 %v3001_v23, %v2985_v22 }
0x19b7   : > { %v3006_v41 = vmul.f32 %v4266_v38, %v3002_v39 }
0x19b9   : > { %v3010_v42 = vadd.f32 %v4267_v8, %v3006_v41 }
0x19bb   : > { %v3011_v43 = vpack.c.bf16 %v3010_v42, %v3010_v42 }
0x19bd   : > { %4052 = vmatmul.msk.bf16.vlgmr.msrb.gmra.mxu1 %vm581_vm0, %v3011_v43 }
0x1a3a   : > { %v3060_v47 = vpop.f32.mrf.mxu1 }
0x1a3b   : > { %v3061_v48 = vadd.f32 %v4268_v44, %v3060_v47 }
0x1a3d   : > { %v3064_v49 = vpack.c.bf16 %v3061_v48, %v3061_v48 }
0x1a3f   : > { %3065 = vst [vmem:[%s566_s1] sm:$0xf] %v3064_v49 }
0x1a40   : > { %4340 = shalt.err (!%p4337_p3)
}
0x1a41   : > { %4213 = dma.vmem_to_hbm [thread:$0]  (%p4512_p5), %s3080_s23, 64, %s3082_s3, %s3067_s4  }
0x1a42   : > { %v3062_v19 = vpop.f32.mrf.mxu1 }
0x1a43 PF: > { %s5354_s24 = sld [smem:[#allocation7_spill]] }
0x1a44   : > { %s5355_s27 = sld [smem:[#allocation5_spill]] }
0x1a49   : > { %p4219_p4 = scmp.ge.s32.totalorder %s5354_s24, 2 }
0x1a4a   : > { %s3093_s1 = sand.u32 1, %s5355_s27  }
0x1a4b   : > { %p4216_p7 = pnand %p4219_p4, %p4516_p6  ;;  %s3094_s19 = scalar_lea.sflag [#allocation3], %s3093_s1 }
0x1a4d   : > { %p4217_p8 = pneg %p4216_p7 }
0x1a4f   : > { %4358 = dma.done.wait (%p4217_p8), %s3094_s19, 64  }
0x1a50   : > { %4360 = vsyncadd (%p4217_p8), %s3094_s19, 4294967232  ;;  %s5357_s30 = sld [smem:[#allocation8_spill]]  ;;  %s5360_s27 = smov %s4367_s28 }
0x1a51   : > { %s5358_s5 = sld [smem:[#allocation6_spill]] }
0x1a52   : > { %s5359_s29 = sld [smem:[#allocation9_spill]] }
0x1a56   : > { %p28_p9 = scmp.ge.s32.totalorder %s5357_s30, 4  }
0x1a57   : > { %s5361_s28 = smov %s5358_s5 }
0x1a58   :  { %30 = sbr.rel (!%p28_p9) target bundleno = 10 (0xa), region = 164 }
0x1a5d   :  { %3100 = vsyncpa [#allocation3], 1 }
0x1a5e   :  { %3102 = vsyncpa [#allocation3 + $0x1], 1 }

</bundles_post_ra>
